<compile_context>
chip_gen: v6e
topology: v6e:2x2x1
jax: 0.10.0
libtpu: 0.0.40
codegen_flags: <defaults>
</compile_context>

<pallas_src>
import jax
import jax.numpy as jnp
from jax import lax
from jax.experimental import pallas as pl
from jax.experimental.pallas import tpu as pltpu

L_IN = 32          # sequence length (8192 / 256)
C_IN = 4           # input channels  (input_shape[1])
LATENT = 16        # latent_dim
C1, C2, C3 = 64, 128, 256      # encoder conv channels
D1, D2, D3 = 128, 64, 32       # decoder transpose-conv channels
L_OUT = 8                      # 1 -> 2 -> 4 -> 8 after three stride-2 tconvs
TB_MAX = 32                    # max batch elements per grid step


def _choose_tb(batch):
    """Batch-tile size: a multiple of 8 (f32 sublane tile), <= TB_MAX, and small
    enough that cdiv(batch, tb) >= 2 when the batch allows it (v7x megacore)."""
    half = (batch // 2) // 8 * 8
    return max(8, min(TB_MAX, half))


# ----------------------------- in-kernel helpers -----------------------------

def _shift_down(x, tb):
    """x rows are (l, b); returns value at (l-1, b), zero rows for l == 0."""
    return jnp.concatenate(
        [jnp.zeros((tb, x.shape[1]), x.dtype), x[:-tb, :]], axis=0)


def _shift_up(x, tb):
    """x rows are (l, b); returns value at (l+1, b), zero rows for l == L-1."""
    return jnp.concatenate(
        [x[tb:, :], jnp.zeros((tb, x.shape[1]), x.dtype)], axis=0)


def _conv1d_k3(x, w, b, tb):
    """Conv1d k=3, s=1, p=1 on an l-major tile; 3-dot accumulate form.
    x: (L*tb, Cin) bf16;  w: (3, Cin, Cout) bf16;  b: (1, Cout) f32."""
    y = jnp.dot(_shift_down(x, tb), w[0], preferred_element_type=jnp.float32)
    y = y + jnp.dot(x, w[1], preferred_element_type=jnp.float32)
    y = y + jnp.dot(_shift_up(x, tb), w[2], preferred_element_type=jnp.float32)
    return y + b


def _tconv1d_s2(x, w, b, lin, tb):
    """ConvTranspose1d k=3, s=2, p=1, output_padding=1 on an l-major tile.
    x: (lin*tb, Cin) bf16 rows (m, b);  w: (3, Cin, Cout) bf16;  b: (1, Cout) f32.
      out[(2m  )*tb + b] = x[m, b] @ w[1]
      out[(2m+1)*tb + b] = x[m, b] @ w[2] + x[m+1, b] @ w[0]  (absent at m=lin-1)
    Returns (2*lin*tb, Cout) f32, rows ordered (l, b)."""
    cout = w.shape[2]
    even = jnp.dot(x, w[1], preferred_element_type=jnp.float32)
    odd = jnp.dot(x, w[2], preferred_element_type=jnp.float32)
    if lin > 1:
        odd = odd + jnp.dot(_shift_up(x, tb), w[0],
                            preferred_element_type=jnp.float32)
    # Interleave even/odd rows at tb-block (sublane-tile aligned) granularity.
    ev3 = even.reshape(lin, tb, cout)
    od3 = odd.reshape(lin, tb, cout)
    out = jnp.concatenate([ev3, od3], axis=1).reshape(2 * lin * tb, cout)
    return out + b


# --------------------------------- kernel ------------------------------------

def _make_kernel(tb):
    bf16 = jnp.bfloat16

    def kernel(x_ref, w1_ref, w2_ref, w3_ref, wh_ref, wd_ref,
               wt1_ref, wt2_ref, wt3_ref, bias_ref, eps_ref, out_ref):
        bias = bias_ref[...]                                     # (8, 256) f32
        b1, b2, b3 = bias[0:1, :C1], bias[1:2, :C2], bias[2:3, :C3]
        bh, bd = bias[3:4, :2 * LATENT], bias[4:5, :C3]
        bt1, bt2, bt3 = bias[5:6, :D1], bias[6:7, :D2], bias[7:8, :D3]

        # ---------------- Encoder ----------------
        # conv1: the three K=4 taps were lane-concatenated wrapper-side -> one
        # K=12 matmul (one MXU launch instead of three).
        x_taps = x_ref[0]                                        # (L_IN*tb, 12) bf16
        h1 = jnp.maximum(
            jnp.dot(x_taps, w1_ref[...],
                    preferred_element_type=jnp.float32) + b1, 0.0).astype(bf16)
        h2 = jnp.maximum(_conv1d_k3(h1, w2_ref[...], b2, tb), 0.0).astype(bf16)
        h3 = jnp.maximum(_conv1d_k3(h2, w3_ref[...], b3, tb), 0.0).astype(bf16)

        # fc_mean | fc_log_var fused along the output axis; one batched (over L)
        # contraction (L_IN matmuls with M=tb, K=256, N=32) plus a single reduce.
        h3_3d = h3.reshape(L_IN, tb, C3)
        part = lax.dot_general(
            h3_3d, wh_ref[...],
            dimension_numbers=(((2,), (1,)), ((0,), (0,))),
            preferred_element_type=jnp.float32)                  # (L_IN, tb, 2*LATENT)
        mu_lv = jnp.sum(part, axis=0) + bh                       # (tb, 2*LATENT)
        mu = mu_lv[:, :LATENT]
        lv = mu_lv[:, LATENT:]

        # ---------------- Reparameterize ----------------
        # TODO(synk): torch.randn_like is emulated by passing eps ~ N(0,1) in as
        # an input (deterministic/testable); could be drawn in-kernel with pltpu.prng_*.
        eps = eps_ref[0]                                         # (tb, LATENT) f32
        z = (mu + eps * jnp.exp(0.5 * lv)).astype(bf16)

        # ---------------- Decoder ----------------
        h = (jnp.dot(z, wd_ref[...], preferred_element_type=jnp.float32)
             + bd).astype(bf16)                                  # (tb, 256)
        d1 = jnp.maximum(_tconv1d_s2(h, wt1_ref[...], bt1, 1, tb), 0.0).astype(bf16)
        d2 = jnp.maximum(_tconv1d_s2(d1, wt2_ref[...], bt2, 2, tb), 0.0).astype(bf16)
        d3 = _tconv1d_s2(d2, wt3_ref[...], bt3, 4, tb)           # (8*tb, 32) f32
        recon = jax.nn.sigmoid(d3)

        # ---------------- Lane-dense packed output ----------------
        # One (3*tb, 128) f32 block: rows [0, 2*tb) hold recon with 4 consecutive
        # l-blocks side by side on the 128 lanes (dense writeback DMA); rows
        # [2*tb, 3*tb) hold mu|log_var (zero padded to 128 lanes).
        for g in range(2):
            for j in range(4):
                out_ref[0, g * tb:(g + 1) * tb, j * D3:(j + 1) * D3] = (
                    recon[(4 * g + j) * tb:(4 * g + j + 1) * tb, :])
        out_ref[0, 2 * tb:3 * tb, :2 * LATENT] = mu_lv
        out_ref[0, 2 * tb:3 * tb, 2 * LATENT:] = jnp.zeros(
            (tb, 128 - 2 * LATENT), jnp.float32)

    return kernel


# --------------------------------- wrapper -----------------------------------

def beta_vae_forward(x_ncl, params, eps):
    """x_ncl: (B, C_IN, L_IN) PyTorch NCL.  eps: (B, LATENT) ~ N(0,1).
    Returns (recon (B, D3, L_OUT), mu (B, LATENT), log_var (B, LATENT))."""
    B = x_ncl.shape[0]
    tb = _choose_tb(B)
    T = pl.cdiv(B, tb)
    B_pad = T * tb
    bf16 = jnp.bfloat16

    x = x_ncl.astype(jnp.float32)
    e = eps.astype(jnp.float32)
    if B_pad != B:
        x = jnp.pad(x, ((0, B_pad - B), (0, 0), (0, 0)))
        e = jnp.pad(e, ((0, B_pad - B), (0, 0)))

    # conv1 tap concatenation is done here (trivially fused by XLA) so the
    # kernel's streamed input is a (L_IN*tb, 12) bf16 block and conv1 is one dot.
    x_lbc = jnp.transpose(x, (2, 0, 1))                          # (L, B_pad, C)
    xm1 = jnp.pad(x_lbc, ((1, 0), (0, 0), (0, 0)))[:-1]          # x[l-1]
    xp1 = jnp.pad(x_lbc, ((0, 1), (0, 0), (0, 0)))[1:]           # x[l+1]
    x_taps = jnp.concatenate([xm1, x_lbc, xp1], axis=-1)         # (L, B_pad, 12)
    x_k = (x_taps.reshape(L_IN, T, tb, 3 * C_IN)
           .transpose(1, 0, 2, 3)
           .reshape(T, L_IN * tb, 3 * C_IN).astype(bf16))
    eps_k = e.reshape(T, tb, LATENT)

    # Kernel-side weight layouts (see init_params for the PyTorch mapping).
    def pad_bias(b):
        return jnp.pad(b, ((0, 0), (0, 256 - b.shape[1])))

    weights = [
        params["w1"].reshape(3 * C_IN, C1).astype(bf16),          # conv1 taps fused
        params["w2"].astype(bf16),
        params["w3"].astype(bf16),
        jnp.concatenate([params["wm"], params["wv"]], -1).astype(bf16),  # (L, C3, 2*LAT)
        params["wd"].astype(bf16),
        params["wt1"].astype(bf16),
        params["wt2"].astype(bf16),
        params["wt3"].astype(bf16),
        jnp.concatenate(                                           # packed biases (8, 256)
            [pad_bias(params["b1"]), pad_bias(params["b2"]), pad_bias(params["b3"]),
             pad_bias(jnp.concatenate([params["bm"], params["bv"]], -1)),
             pad_bias(params["bd"]), pad_bias(params["bt1"]),
             pad_bias(params["bt2"]), pad_bias(params["bt3"])], axis=0),
    ]

    def full_spec(a):
        nd = a.ndim
        return pl.BlockSpec(a.shape, lambda t, _nd=nd: (0,) * _nd)

    in_specs = [pl.BlockSpec((1, L_IN * tb, 3 * C_IN), lambda t: (t, 0, 0))]
    in_specs += [full_spec(w) for w in weights]
    in_specs += [pl.BlockSpec((1, tb, LATENT), lambda t: (t, 0, 0))]

    rows_out = 3 * tb            # 2*tb packed recon rows + tb mu|log_var rows
    out_k = pl.pallas_call(
        _make_kernel(tb),
        out_shape=jax.ShapeDtypeStruct((T, rows_out, 128), jnp.float32),
        grid_spec=pltpu.PrefetchScalarGridSpec(
            num_scalar_prefetch=0,
            grid=(T,),
            in_specs=in_specs,
            out_specs=pl.BlockSpec((1, rows_out, 128), lambda t: (t, 0, 0)),
        ),
        compiler_params=pltpu.CompilerParams(
            dimension_semantics=("parallel",)),
    )(x_k, *weights, eps_k)

    # Unpack: recon rows are (g, b) with 4 l-blocks of D3 channels on the lanes.
    rec = out_k[:, :2 * tb, :].reshape(T, 2, tb, 4, D3)          # (t, g, b, j, c)
    recon = (rec.transpose(0, 2, 4, 1, 3)                        # (t, b, c, g, j)
             .reshape(T, tb, D3, L_OUT)
             .reshape(B_pad, D3, L_OUT)[:B])                     # PyTorch NCL output
    mulv = out_k[:, 2 * tb:, :2 * LATENT].reshape(B_pad, 2 * LATENT)[:B]
    return recon, mulv[:, :LATENT], mulv[:, LATENT:]


# ------------------------------ parameter init --------------------------------

def init_params(key):
    """Random parameters in kernel-friendly layouts.

    Mapping from real PyTorch weights (needed when porting a trained model):
      Conv1d weight (Cout, Cin, k)          -> w[k, c, o]  = W_pt[o, c, k]          shape (3, Cin, Cout)
      ConvTranspose1d weight (Cin, Cout, k) -> wt[k, c, o] = W_pt[c, o, k]          shape (3, Cin, Cout)
      fc_mean / fc_log_var (LAT, 8192)      -> wm[l, c, o] = W_pt[o, c*L_IN + l]    shape (L, C3, LAT)
                                               (PyTorch flattens NCL as c*L + l)
      fc_decode weight (C3, LAT)            -> wd[i, o]    = W_pt[o, i]             shape (LAT, C3)
      biases                                -> shape (1, C)
    """
    ks = jax.random.split(key, 18)

    def w(k, shape, fan_in):
        return jax.random.normal(k, shape, jnp.float32) * (1.0 / jnp.sqrt(fan_in))

    def b(k, c):
        return jax.random.normal(k, (1, c), jnp.float32) * 0.01

    p = {}
    p["w1"], p["b1"] = w(ks[0], (3, C_IN, C1), 3 * C_IN), b(ks[1], C1)
    p["w2"], p["b2"] = w(ks[2], (3, C1, C2), 3 * C1),     b(ks[3], C2)
    p["w3"], p["b3"] = w(ks[4], (3, C2, C3), 3 * C2),     b(ks[5], C3)
    p["wm"], p["bm"] = w(ks[6], (L_IN, C3, LATENT), L_IN * C3), b(ks[7], LATENT)
    p["wv"], p["bv"] = w(ks[8], (L_IN, C3, LATENT), L_IN * C3), b(ks[9], LATENT)
    p["wd"], p["bd"] = w(ks[10], (LATENT, C3), LATENT), b(ks[11], C3)
    p["wt1"], p["bt1"] = w(ks[12], (3, C3, D1), 3 * C3), b(ks[13], D1)
    p["wt2"], p["bt2"] = w(ks[14], (3, D1, D2), 3 * D1), b(ks[15], D2)
    p["wt3"], p["bt3"] = w(ks[16], (3, D2, D3), 3 * D2), b(ks[17], D3)
    # Note: the module's nn.Dropout(p=0.2) is never applied in forward(); no params.
    return p


# --------------------------- pure-JAX reference -------------------------------

def _reference_forward(x_ncl, params, eps):
    """Non-Pallas f32 reference implementing the same forward math."""
    hp = jax.lax.Precision.HIGHEST
    x = jnp.transpose(x_ncl, (0, 2, 1)).astype(jnp.float32)          # (B, L, C)

    def conv(h, w, b):
        h_m1 = jnp.pad(h, ((0, 0), (1, 0), (0, 0)))[:, :-1]
        h_p1 = jnp.pad(h, ((0, 0), (0, 1), (0, 0)))[:, 1:]
        y = (jnp.einsum("blc,co->blo", h_m1, w[0], precision=hp)
             + jnp.einsum("blc,co->blo", h, w[1], precision=hp)
             + jnp.einsum("blc,co->blo", h_p1, w[2], precision=hp))
        return y + b

    h = jax.nn.relu(conv(x, params["w1"], params["b1"]))
    h = jax.nn.relu(conv(h, params["w2"], params["b2"]))
    h = jax.nn.relu(conv(h, params["w3"], params["b3"]))
    mu = jnp.einsum("blc,lco->bo", h, params["wm"], precision=hp) + params["bm"]
    lv = jnp.einsum("blc,lco->bo", h, params["wv"], precision=hp) + params["bv"]
    z = mu + eps * jnp.exp(0.5 * lv)

    d = (jnp.einsum("bi,ic->bc", z, params["wd"], precision=hp)
         + params["bd"])[:, None, :]                                 # (B, 1, 256)

    def tconv(h, w, b):
        even = jnp.einsum("blc,co->blo", h, w[1], precision=hp)
        odd = jnp.einsum("blc,co->blo", h, w[2], precision=hp)
        h_p1 = jnp.pad(h, ((0, 0), (0, 1), (0, 0)))[:, 1:]
        odd = odd + jnp.einsum("blc,co->blo", h_p1, w[0], precision=hp)
        out = jnp.stack([even, odd], axis=2).reshape(h.shape[0], -1, w.shape[2])
        return out + b

    d = jax.nn.relu(tconv(d, params["wt1"], params["bt1"]))
    d = jax.nn.relu(tconv(d, params["wt2"], params["bt2"]))
    d = jax.nn.sigmoid(tconv(d, params["wt3"], params["bt3"]))
    return jnp.transpose(d, (0, 2, 1)), mu, lv


# ----------------------------------- main -------------------------------------

if __name__ == "__main__":
    key = jax.random.PRNGKey(0)
    k_x, k_eps, k_p = jax.random.split(key, 3)

    B = 2
    # PyTorch-style input: (B, channels=4, length=32)  (8192 = 256 * 32)
    x = jax.random.normal(k_x, (B, C_IN, L_IN), jnp.float32)
    eps = jax.random.normal(k_eps, (B, LATENT), jnp.float32)
    params = init_params(k_p)

    fwd = jax.jit(beta_vae_forward)
    recon, mu, log_var = fwd(x, params, eps)
    jax.block_until_ready((recon, mu, log_var))

    assert recon.shape == (B, D3, L_OUT), recon.shape
    assert mu.shape == (B, LATENT), mu.shape
    assert log_var.shape == (B, LATENT), log_var.shape
    assert bool(jnp.all(jnp.isfinite(recon)))
    assert bool(jnp.all((recon >= 0.0) & (recon <= 1.0)))   # sigmoid output range

    # Correctness vs. f32 pure-JAX reference.  The kernel runs every matmul with
    # bf16 operands / f32 accumulation (MXU-native), hence the bf16-level tol.
    r_recon, r_mu, r_lv = _reference_forward(x, params, eps)
    tol = dict(rtol=5e-2, atol=5e-2)
    assert bool(jnp.allclose(mu, r_mu, **tol)), float(jnp.max(jnp.abs(mu - r_mu)))
    assert bool(jnp.allclose(log_var, r_lv, **tol)), float(jnp.max(jnp.abs(log_var - r_lv)))
    assert bool(jnp.allclose(recon, r_recon, **tol)), float(jnp.max(jnp.abs(recon - r_recon)))

    print("KERNEL_OK")
</pallas_src>

<mosaic_0001>
module attributes {stable_mosaic.version = 11 : i64} {
  func.func @kernel(%arg0: i32, %arg1: memref<1x256x12xbf16, #tpu.memory_space<vmem>>, %arg2: memref<12x64xbf16, #tpu.memory_space<vmem>>, %arg3: memref<3x64x128xbf16, #tpu.memory_space<vmem>>, %arg4: memref<3x128x256xbf16, #tpu.memory_space<vmem>>, %arg5: memref<32x256x32xbf16, #tpu.memory_space<vmem>>, %arg6: memref<16x256xbf16, #tpu.memory_space<vmem>>, %arg7: memref<3x256x128xbf16, #tpu.memory_space<vmem>>, %arg8: memref<3x128x64xbf16, #tpu.memory_space<vmem>>, %arg9: memref<3x64x32xbf16, #tpu.memory_space<vmem>>, %arg10: memref<8x256xf32, #tpu.memory_space<vmem>>, %arg11: memref<1x8x16xf32, #tpu.memory_space<vmem>>, %arg12: memref<1x24x128xf32, #tpu.memory_space<vmem>>) attributes {dimension_semantics = [#tpu.dimension_semantics<parallel>], iteration_bounds = array<i64: 1>, scalar_prefetch = 0 : i64, scratch_operands = 0 : i64, tpu.core_type = #tpu.core_type<tc>, window_params = [{transform_indices = @transform_0, window_bounds = array<i64: 1, 256, 12>}, {pipeline_mode = #tpu.pipeline_mode<synchronous>, transform_indices = @transform_1, window_bounds = array<i64: 12, 64>}, {pipeline_mode = #tpu.pipeline_mode<synchronous>, transform_indices = @transform_2, window_bounds = array<i64: 3, 64, 128>}, {pipeline_mode = #tpu.pipeline_mode<synchronous>, transform_indices = @transform_3, window_bounds = array<i64: 3, 128, 256>}, {pipeline_mode = #tpu.pipeline_mode<synchronous>, transform_indices = @transform_4, window_bounds = array<i64: 32, 256, 32>}, {pipeline_mode = #tpu.pipeline_mode<synchronous>, transform_indices = @transform_5, window_bounds = array<i64: 16, 256>}, {pipeline_mode = #tpu.pipeline_mode<synchronous>, transform_indices = @transform_6, window_bounds = array<i64: 3, 256, 128>}, {pipeline_mode = #tpu.pipeline_mode<synchronous>, transform_indices = @transform_7, window_bounds = array<i64: 3, 128, 64>}, {pipeline_mode = #tpu.pipeline_mode<synchronous>, transform_indices = @transform_8, window_bounds = array<i64: 3, 64, 32>}, {pipeline_mode = #tpu.pipeline_mode<synchronous>, transform_indices = @transform_9, window_bounds = array<i64: 8, 256>}, {transform_indices = @transform_10, window_bounds = array<i64: 1, 8, 16>}, {transform_indices = @transform_11, window_bounds = array<i64: 1, 24, 128>}]} {
    %c0 = arith.constant 0 : index
    %c0_0 = arith.constant 0 : index
    %0 = vector.load %arg10[%c0, %c0_0] : memref<8x256xf32, #tpu.memory_space<vmem>>, vector<8x256xf32>
    %1 = vector.extract_strided_slice %0 {offsets = [0, 0], sizes = [1, 64], strides = [1, 1]} : vector<8x256xf32> to vector<1x64xf32>
    %2 = vector.extract_strided_slice %0 {offsets = [1, 0], sizes = [1, 128], strides = [1, 1]} : vector<8x256xf32> to vector<1x128xf32>
    %3 = vector.extract_strided_slice %0 {offsets = [2, 0], sizes = [1, 256], strides = [1, 1]} : vector<8x256xf32> to vector<1x256xf32>
    %4 = vector.extract_strided_slice %0 {offsets = [3, 0], sizes = [1, 32], strides = [1, 1]} : vector<8x256xf32> to vector<1x32xf32>
    %5 = vector.extract_strided_slice %0 {offsets = [4, 0], sizes = [1, 256], strides = [1, 1]} : vector<8x256xf32> to vector<1x256xf32>
    %6 = vector.extract_strided_slice %0 {offsets = [5, 0], sizes = [1, 128], strides = [1, 1]} : vector<8x256xf32> to vector<1x128xf32>
    %7 = vector.extract_strided_slice %0 {offsets = [6, 0], sizes = [1, 64], strides = [1, 1]} : vector<8x256xf32> to vector<1x64xf32>
    %8 = vector.extract_strided_slice %0 {offsets = [7, 0], sizes = [1, 32], strides = [1, 1]} : vector<8x256xf32> to vector<1x32xf32>
    %c0_1 = arith.constant 0 : index
    %c0_2 = arith.constant 0 : index
    %c0_3 = arith.constant 0 : index
    %9 = vector.load %arg1[%c0_1, %c0_2, %c0_3] : memref<1x256x12xbf16, #tpu.memory_space<vmem>>, vector<1x256x12xbf16>
    %10 = vector.shape_cast %9 : vector<1x256x12xbf16> to vector<256x12xbf16>
    %c0_4 = arith.constant 0 : index
    %c0_5 = arith.constant 0 : index
    %11 = vector.load %arg2[%c0_4, %c0_5] : memref<12x64xbf16, #tpu.memory_space<vmem>>, vector<12x64xbf16>
    %cst = arith.constant dense<0.000000e+00> : vector<256x64xf32>
    %12 = tpu.matmul %10, %11, %cst {dimension_numbers = #tpu.dot_dimension_numbers<[1], [0], [0], [1], [0, 0, 1, 1], [], []>} : vector<256x12xbf16>, vector<12x64xbf16>, vector<256x64xf32> -> vector<256x64xf32>
    %13 = vector.broadcast %1 : vector<1x64xf32> to vector<256x64xf32>
    %14 = arith.addf %12, %13 : vector<256x64xf32>
    %cst_6 = arith.constant 0.000000e+00 : f32
    %15 = vector.broadcast %cst_6 : f32 to vector<256x64xf32>
    %16 = arith.maximumf %14, %15 : vector<256x64xf32>
    %17 = arith.truncf %16 : vector<256x64xf32> to vector<256x64xbf16>
    %c0_7 = arith.constant 0 : index
    %c0_8 = arith.constant 0 : index
    %c0_9 = arith.constant 0 : index
    %18 = vector.load %arg3[%c0_7, %c0_8, %c0_9] : memref<3x64x128xbf16, #tpu.memory_space<vmem>>, vector<3x64x128xbf16>
    %cst_10 = arith.constant 0.000000e+00 : bf16
    %19 = vector.broadcast %cst_10 : bf16 to vector<8x64xbf16>
    %20 = vector.extract_strided_slice %17 {offsets = [0, 0], sizes = [248, 64], strides = [1, 1]} : vector<256x64xbf16> to vector<248x64xbf16>
    %21 = tpu.concatenate %19, %20 in 0 : vector<8x64xbf16>, vector<248x64xbf16> -> vector<256x64xbf16>
    %22 = vector.extract_strided_slice %18 {offsets = [0, 0, 0], sizes = [1, 64, 128], strides = [1, 1, 1]} : vector<3x64x128xbf16> to vector<1x64x128xbf16>
    %23 = vector.shape_cast %22 : vector<1x64x128xbf16> to vector<64x128xbf16>
    %cst_11 = arith.constant dense<0.000000e+00> : vector<256x128xf32>
    %24 = tpu.matmul %21, %23, %cst_11 {dimension_numbers = #tpu.dot_dimension_numbers<[1], [0], [0], [1], [0, 0, 1, 1], [], []>} : vector<256x64xbf16>, vector<64x128xbf16>, vector<256x128xf32> -> vector<256x128xf32>
    %25 = vector.extract_strided_slice %18 {offsets = [1, 0, 0], sizes = [1, 64, 128], strides = [1, 1, 1]} : vector<3x64x128xbf16> to vector<1x64x128xbf16>
    %26 = vector.shape_cast %25 : vector<1x64x128xbf16> to vector<64x128xbf16>
    %cst_12 = arith.constant dense<0.000000e+00> : vector<256x128xf32>
    %27 = tpu.matmul %17, %26, %cst_12 {dimension_numbers = #tpu.dot_dimension_numbers<[1], [0], [0], [1], [0, 0, 1, 1], [], []>} : vector<256x64xbf16>, vector<64x128xbf16>, vector<256x128xf32> -> vector<256x128xf32>
    %28 = arith.addf %24, %27 : vector<256x128xf32>
    %29 = vector.extract_strided_slice %17 {offsets = [8, 0], sizes = [248, 64], strides = [1, 1]} : vector<256x64xbf16> to vector<248x64xbf16>
    %cst_13 = arith.constant 0.000000e+00 : bf16
    %30 = vector.broadcast %cst_13 : bf16 to vector<8x64xbf16>
    %31 = tpu.concatenate %29, %30 in 0 : vector<248x64xbf16>, vector<8x64xbf16> -> vector<256x64xbf16>
    %32 = vector.extract_strided_slice %18 {offsets = [2, 0, 0], sizes = [1, 64, 128], strides = [1, 1, 1]} : vector<3x64x128xbf16> to vector<1x64x128xbf16>
    %33 = vector.shape_cast %32 : vector<1x64x128xbf16> to vector<64x128xbf16>
    %cst_14 = arith.constant dense<0.000000e+00> : vector<256x128xf32>
    %34 = tpu.matmul %31, %33, %cst_14 {dimension_numbers = #tpu.dot_dimension_numbers<[1], [0], [0], [1], [0, 0, 1, 1], [], []>} : vector<256x64xbf16>, vector<64x128xbf16>, vector<256x128xf32> -> vector<256x128xf32>
    %35 = arith.addf %28, %34 : vector<256x128xf32>
    %36 = vector.broadcast %2 : vector<1x128xf32> to vector<256x128xf32>
    %37 = arith.addf %35, %36 : vector<256x128xf32>
    %cst_15 = arith.constant 0.000000e+00 : f32
    %38 = vector.broadcast %cst_15 : f32 to vector<256x128xf32>
    %39 = arith.maximumf %37, %38 : vector<256x128xf32>
    %40 = arith.truncf %39 : vector<256x128xf32> to vector<256x128xbf16>
    %c0_16 = arith.constant 0 : index
    %c0_17 = arith.constant 0 : index
    %c0_18 = arith.constant 0 : index
    %41 = vector.load %arg4[%c0_16, %c0_17, %c0_18] : memref<3x128x256xbf16, #tpu.memory_space<vmem>>, vector<3x128x256xbf16>
    %cst_19 = arith.constant 0.000000e+00 : bf16
    %42 = vector.broadcast %cst_19 : bf16 to vector<8x128xbf16>
    %43 = vector.extract_strided_slice %40 {offsets = [0, 0], sizes = [248, 128], strides = [1, 1]} : vector<256x128xbf16> to vector<248x128xbf16>
    %44 = tpu.concatenate %42, %43 in 0 : vector<8x128xbf16>, vector<248x128xbf16> -> vector<256x128xbf16>
    %45 = vector.extract_strided_slice %41 {offsets = [0, 0, 0], sizes = [1, 128, 256], strides = [1, 1, 1]} : vector<3x128x256xbf16> to vector<1x128x256xbf16>
    %46 = vector.shape_cast %45 : vector<1x128x256xbf16> to vector<128x256xbf16>
    %cst_20 = arith.constant dense<0.000000e+00> : vector<256x256xf32>
    %47 = tpu.matmul %44, %46, %cst_20 {dimension_numbers = #tpu.dot_dimension_numbers<[1], [0], [0], [1], [0, 0, 1, 1], [], []>} : vector<256x128xbf16>, vector<128x256xbf16>, vector<256x256xf32> -> vector<256x256xf32>
    %48 = vector.extract_strided_slice %41 {offsets = [1, 0, 0], sizes = [1, 128, 256], strides = [1, 1, 1]} : vector<3x128x256xbf16> to vector<1x128x256xbf16>
    %49 = vector.shape_cast %48 : vector<1x128x256xbf16> to vector<128x256xbf16>
    %cst_21 = arith.constant dense<0.000000e+00> : vector<256x256xf32>
    %50 = tpu.matmul %40, %49, %cst_21 {dimension_numbers = #tpu.dot_dimension_numbers<[1], [0], [0], [1], [0, 0, 1, 1], [], []>} : vector<256x128xbf16>, vector<128x256xbf16>, vector<256x256xf32> -> vector<256x256xf32>
    %51 = arith.addf %47, %50 : vector<256x256xf32>
    %52 = vector.extract_strided_slice %40 {offsets = [8, 0], sizes = [248, 128], strides = [1, 1]} : vector<256x128xbf16> to vector<248x128xbf16>
    %cst_22 = arith.constant 0.000000e+00 : bf16
    %53 = vector.broadcast %cst_22 : bf16 to vector<8x128xbf16>
    %54 = tpu.concatenate %52, %53 in 0 : vector<248x128xbf16>, vector<8x128xbf16> -> vector<256x128xbf16>
    %55 = vector.extract_strided_slice %41 {offsets = [2, 0, 0], sizes = [1, 128, 256], strides = [1, 1, 1]} : vector<3x128x256xbf16> to vector<1x128x256xbf16>
    %56 = vector.shape_cast %55 : vector<1x128x256xbf16> to vector<128x256xbf16>
    %cst_23 = arith.constant dense<0.000000e+00> : vector<256x256xf32>
    %57 = tpu.matmul %54, %56, %cst_23 {dimension_numbers = #tpu.dot_dimension_numbers<[1], [0], [0], [1], [0, 0, 1, 1], [], []>} : vector<256x128xbf16>, vector<128x256xbf16>, vector<256x256xf32> -> vector<256x256xf32>
    %58 = arith.addf %51, %57 : vector<256x256xf32>
    %59 = vector.broadcast %3 : vector<1x256xf32> to vector<256x256xf32>
    %60 = arith.addf %58, %59 : vector<256x256xf32>
    %cst_24 = arith.constant 0.000000e+00 : f32
    %61 = vector.broadcast %cst_24 : f32 to vector<256x256xf32>
    %62 = arith.maximumf %60, %61 : vector<256x256xf32>
    %63 = arith.truncf %62 : vector<256x256xf32> to vector<256x256xbf16>
    %64 = vector.shape_cast %63 : vector<256x256xbf16> to vector<32x8x256xbf16>
    %c0_25 = arith.constant 0 : index
    %c0_26 = arith.constant 0 : index
    %c0_27 = arith.constant 0 : index
    %65 = vector.load %arg5[%c0_25, %c0_26, %c0_27] : memref<32x256x32xbf16, #tpu.memory_space<vmem>>, vector<32x256x32xbf16>
    %cst_28 = arith.constant dense<0.000000e+00> : vector<32x8x32xf32>
    %66 = tpu.matmul %64, %65, %cst_28 {dimension_numbers = #tpu.dot_dimension_numbers<[2], [1], [1], [2], [0, 0, 0, 1, 1, 2], [0], [0]>} : vector<32x8x256xbf16>, vector<32x256x32xbf16>, vector<32x8x32xf32> -> vector<32x8x32xf32>
    %cst_29 = arith.constant dense<0.000000e+00> : vector<8x32xf32>
    %67 = vector.multi_reduction <add>, %66, %cst_29 [0] : vector<32x8x32xf32> to vector<8x32xf32>
    %68 = vector.broadcast %4 : vector<1x32xf32> to vector<8x32xf32>
    %69 = arith.addf %67, %68 : vector<8x32xf32>
    %70 = vector.extract_strided_slice %69 {offsets = [0, 0], sizes = [8, 16], strides = [1, 1]} : vector<8x32xf32> to vector<8x16xf32>
    %71 = vector.extract_strided_slice %69 {offsets = [0, 16], sizes = [8, 16], strides = [1, 1]} : vector<8x32xf32> to vector<8x16xf32>
    %c0_30 = arith.constant 0 : index
    %c0_31 = arith.constant 0 : index
    %c0_32 = arith.constant 0 : index
    %72 = vector.load %arg11[%c0_30, %c0_31, %c0_32] : memref<1x8x16xf32, #tpu.memory_space<vmem>>, vector<1x8x16xf32>
    %73 = vector.shape_cast %72 : vector<1x8x16xf32> to vector<8x16xf32>
    %cst_33 = arith.constant 5.000000e-01 : f32
    %74 = vector.broadcast %cst_33 : f32 to vector<8x16xf32>
    %75 = arith.mulf %74, %71 : vector<8x16xf32>
    %76 = math.exp %75 : vector<8x16xf32>
    %77 = arith.mulf %73, %76 : vector<8x16xf32>
    %78 = arith.addf %70, %77 : vector<8x16xf32>
    %79 = arith.truncf %78 : vector<8x16xf32> to vector<8x16xbf16>
    %c0_34 = arith.constant 0 : index
    %c0_35 = arith.constant 0 : index
    %80 = vector.load %arg6[%c0_34, %c0_35] : memref<16x256xbf16, #tpu.memory_space<vmem>>, vector<16x256xbf16>
    %cst_36 = arith.constant dense<0.000000e+00> : vector<8x256xf32>
    %81 = tpu.matmul %79, %80, %cst_36 {dimension_numbers = #tpu.dot_dimension_numbers<[1], [0], [0], [1], [0, 0, 1, 1], [], []>} : vector<8x16xbf16>, vector<16x256xbf16>, vector<8x256xf32> -> vector<8x256xf32>
    %82 = vector.broadcast %5 : vector<1x256xf32> to vector<8x256xf32>
    %83 = arith.addf %81, %82 : vector<8x256xf32>
    %84 = arith.truncf %83 : vector<8x256xf32> to vector<8x256xbf16>
    %c0_37 = arith.constant 0 : index
    %c0_38 = arith.constant 0 : index
    %c0_39 = arith.constant 0 : index
    %85 = vector.load %arg7[%c0_37, %c0_38, %c0_39] : memref<3x256x128xbf16, #tpu.memory_space<vmem>>, vector<3x256x128xbf16>
    %86 = vector.extract_strided_slice %85 {offsets = [1, 0, 0], sizes = [1, 256, 128], strides = [1, 1, 1]} : vector<3x256x128xbf16> to vector<1x256x128xbf16>
    %87 = vector.shape_cast %86 : vector<1x256x128xbf16> to vector<256x128xbf16>
    %cst_40 = arith.constant dense<0.000000e+00> : vector<8x128xf32>
    %88 = tpu.matmul %84, %87, %cst_40 {dimension_numbers = #tpu.dot_dimension_numbers<[1], [0], [0], [1], [0, 0, 1, 1], [], []>} : vector<8x256xbf16>, vector<256x128xbf16>, vector<8x128xf32> -> vector<8x128xf32>
    %89 = vector.extract_strided_slice %85 {offsets = [2, 0, 0], sizes = [1, 256, 128], strides = [1, 1, 1]} : vector<3x256x128xbf16> to vector<1x256x128xbf16>
    %90 = vector.shape_cast %89 : vector<1x256x128xbf16> to vector<256x128xbf16>
    %cst_41 = arith.constant dense<0.000000e+00> : vector<8x128xf32>
    %91 = tpu.matmul %84, %90, %cst_41 {dimension_numbers = #tpu.dot_dimension_numbers<[1], [0], [0], [1], [0, 0, 1, 1], [], []>} : vector<8x256xbf16>, vector<256x128xbf16>, vector<8x128xf32> -> vector<8x128xf32>
    %92 = vector.shape_cast %88 : vector<8x128xf32> to vector<1x8x128xf32>
    %93 = vector.shape_cast %91 : vector<8x128xf32> to vector<1x8x128xf32>
    %94 = tpu.concatenate %92, %93 in 1 : vector<1x8x128xf32>, vector<1x8x128xf32> -> vector<1x16x128xf32>
    %95 = vector.shape_cast %94 : vector<1x16x128xf32> to vector<16x128xf32>
    %96 = vector.broadcast %6 : vector<1x128xf32> to vector<16x128xf32>
    %97 = arith.addf %95, %96 : vector<16x128xf32>
    %cst_42 = arith.constant 0.000000e+00 : f32
    %98 = vector.broadcast %cst_42 : f32 to vector<16x128xf32>
    %99 = arith.maximumf %97, %98 : vector<16x128xf32>
    %100 = arith.truncf %99 : vector<16x128xf32> to vector<16x128xbf16>
    %c0_43 = arith.constant 0 : index
    %c0_44 = arith.constant 0 : index
    %c0_45 = arith.constant 0 : index
    %101 = vector.load %arg8[%c0_43, %c0_44, %c0_45] : memref<3x128x64xbf16, #tpu.memory_space<vmem>>, vector<3x128x64xbf16>
    %102 = vector.extract_strided_slice %101 {offsets = [1, 0, 0], sizes = [1, 128, 64], strides = [1, 1, 1]} : vector<3x128x64xbf16> to vector<1x128x64xbf16>
    %103 = vector.shape_cast %102 : vector<1x128x64xbf16> to vector<128x64xbf16>
    %cst_46 = arith.constant dense<0.000000e+00> : vector<16x64xf32>
    %104 = tpu.matmul %100, %103, %cst_46 {dimension_numbers = #tpu.dot_dimension_numbers<[1], [0], [0], [1], [0, 0, 1, 1], [], []>} : vector<16x128xbf16>, vector<128x64xbf16>, vector<16x64xf32> -> vector<16x64xf32>
    %105 = vector.extract_strided_slice %101 {offsets = [2, 0, 0], sizes = [1, 128, 64], strides = [1, 1, 1]} : vector<3x128x64xbf16> to vector<1x128x64xbf16>
    %106 = vector.shape_cast %105 : vector<1x128x64xbf16> to vector<128x64xbf16>
    %cst_47 = arith.constant dense<0.000000e+00> : vector<16x64xf32>
    %107 = tpu.matmul %100, %106, %cst_47 {dimension_numbers = #tpu.dot_dimension_numbers<[1], [0], [0], [1], [0, 0, 1, 1], [], []>} : vector<16x128xbf16>, vector<128x64xbf16>, vector<16x64xf32> -> vector<16x64xf32>
    %108 = vector.extract_strided_slice %100 {offsets = [8, 0], sizes = [8, 128], strides = [1, 1]} : vector<16x128xbf16> to vector<8x128xbf16>
    %cst_48 = arith.constant 0.000000e+00 : bf16
    %109 = vector.broadcast %cst_48 : bf16 to vector<8x128xbf16>
    %110 = tpu.concatenate %108, %109 in 0 : vector<8x128xbf16>, vector<8x128xbf16> -> vector<16x128xbf16>
    %111 = vector.extract_strided_slice %101 {offsets = [0, 0, 0], sizes = [1, 128, 64], strides = [1, 1, 1]} : vector<3x128x64xbf16> to vector<1x128x64xbf16>
    %112 = vector.shape_cast %111 : vector<1x128x64xbf16> to vector<128x64xbf16>
    %cst_49 = arith.constant dense<0.000000e+00> : vector<16x64xf32>
    %113 = tpu.matmul %110, %112, %cst_49 {dimension_numbers = #tpu.dot_dimension_numbers<[1], [0], [0], [1], [0, 0, 1, 1], [], []>} : vector<16x128xbf16>, vector<128x64xbf16>, vector<16x64xf32> -> vector<16x64xf32>
    %114 = arith.addf %107, %113 : vector<16x64xf32>
    %115 = vector.shape_cast %104 : vector<16x64xf32> to vector<2x8x64xf32>
    %116 = vector.shape_cast %114 : vector<16x64xf32> to vector<2x8x64xf32>
    %117 = tpu.concatenate %115, %116 in 1 : vector<2x8x64xf32>, vector<2x8x64xf32> -> vector<2x16x64xf32>
    %118 = vector.shape_cast %117 : vector<2x16x64xf32> to vector<32x64xf32>
    %119 = vector.broadcast %7 : vector<1x64xf32> to vector<32x64xf32>
    %120 = arith.addf %118, %119 : vector<32x64xf32>
    %cst_50 = arith.constant 0.000000e+00 : f32
    %121 = vector.broadcast %cst_50 : f32 to vector<32x64xf32>
    %122 = arith.maximumf %120, %121 : vector<32x64xf32>
    %123 = arith.truncf %122 : vector<32x64xf32> to vector<32x64xbf16>
    %c0_51 = arith.constant 0 : index
    %c0_52 = arith.constant 0 : index
    %c0_53 = arith.constant 0 : index
    %124 = vector.load %arg9[%c0_51, %c0_52, %c0_53] : memref<3x64x32xbf16, #tpu.memory_space<vmem>>, vector<3x64x32xbf16>
    %125 = vector.extract_strided_slice %124 {offsets = [1, 0, 0], sizes = [1, 64, 32], strides = [1, 1, 1]} : vector<3x64x32xbf16> to vector<1x64x32xbf16>
    %126 = vector.shape_cast %125 : vector<1x64x32xbf16> to vector<64x32xbf16>
    %cst_54 = arith.constant dense<0.000000e+00> : vector<32x32xf32>
    %127 = tpu.matmul %123, %126, %cst_54 {dimension_numbers = #tpu.dot_dimension_numbers<[1], [0], [0], [1], [0, 0, 1, 1], [], []>} : vector<32x64xbf16>, vector<64x32xbf16>, vector<32x32xf32> -> vector<32x32xf32>
    %128 = vector.extract_strided_slice %124 {offsets = [2, 0, 0], sizes = [1, 64, 32], strides = [1, 1, 1]} : vector<3x64x32xbf16> to vector<1x64x32xbf16>
    %129 = vector.shape_cast %128 : vector<1x64x32xbf16> to vector<64x32xbf16>
    %cst_55 = arith.constant dense<0.000000e+00> : vector<32x32xf32>
    %130 = tpu.matmul %123, %129, %cst_55 {dimension_numbers = #tpu.dot_dimension_numbers<[1], [0], [0], [1], [0, 0, 1, 1], [], []>} : vector<32x64xbf16>, vector<64x32xbf16>, vector<32x32xf32> -> vector<32x32xf32>
    %131 = vector.extract_strided_slice %123 {offsets = [8, 0], sizes = [24, 64], strides = [1, 1]} : vector<32x64xbf16> to vector<24x64xbf16>
    %cst_56 = arith.constant 0.000000e+00 : bf16
    %132 = vector.broadcast %cst_56 : bf16 to vector<8x64xbf16>
    %133 = tpu.concatenate %131, %132 in 0 : vector<24x64xbf16>, vector<8x64xbf16> -> vector<32x64xbf16>
    %134 = vector.extract_strided_slice %124 {offsets = [0, 0, 0], sizes = [1, 64, 32], strides = [1, 1, 1]} : vector<3x64x32xbf16> to vector<1x64x32xbf16>
    %135 = vector.shape_cast %134 : vector<1x64x32xbf16> to vector<64x32xbf16>
    %cst_57 = arith.constant dense<0.000000e+00> : vector<32x32xf32>
    %136 = tpu.matmul %133, %135, %cst_57 {dimension_numbers = #tpu.dot_dimension_numbers<[1], [0], [0], [1], [0, 0, 1, 1], [], []>} : vector<32x64xbf16>, vector<64x32xbf16>, vector<32x32xf32> -> vector<32x32xf32>
    %137 = arith.addf %130, %136 : vector<32x32xf32>
    %138 = vector.shape_cast %127 : vector<32x32xf32> to vector<4x8x32xf32>
    %139 = vector.shape_cast %137 : vector<32x32xf32> to vector<4x8x32xf32>
    %140 = tpu.concatenate %138, %139 in 1 : vector<4x8x32xf32>, vector<4x8x32xf32> -> vector<4x16x32xf32>
    %141 = vector.shape_cast %140 : vector<4x16x32xf32> to vector<64x32xf32>
    %142 = vector.broadcast %8 : vector<1x32xf32> to vector<64x32xf32>
    %143 = arith.addf %141, %142 : vector<64x32xf32>
    %144 = arith.negf %143 : vector<64x32xf32>
    %145 = math.exp %144 : vector<64x32xf32>
    %cst_58 = arith.constant 1.000000e+00 : f32
    %146 = vector.broadcast %cst_58 : f32 to vector<64x32xf32>
    %147 = arith.addf %146, %145 : vector<64x32xf32>
    %148 = arith.divf %146, %147 : vector<64x32xf32>
    %149 = vector.extract_strided_slice %148 {offsets = [0, 0], sizes = [8, 32], strides = [1, 1]} : vector<64x32xf32> to vector<8x32xf32>
    %c0_59 = arith.constant 0 : index
    %c0_60 = arith.constant 0 : index
    %c0_61 = arith.constant 0 : index
    %150 = vector.load %arg12[%c0_59, %c0_60, %c0_61] : memref<1x24x128xf32, #tpu.memory_space<vmem>>, vector<1x8x32xf32>
    %151 = vector.shape_cast %150 : vector<1x8x32xf32> to vector<8x32xf32>
    %152 = vector.shape_cast %149 : vector<8x32xf32> to vector<1x8x32xf32>
    tpu.vector_store %arg12[%c0_59, %c0_60, %c0_61], %152 {strides = array<i32>} : memref<1x24x128xf32, #tpu.memory_space<vmem>>, vector<1x8x32xf32>,
    %153 = vector.extract_strided_slice %148 {offsets = [8, 0], sizes = [8, 32], strides = [1, 1]} : vector<64x32xf32> to vector<8x32xf32>
    %c0_62 = arith.constant 0 : index
    %c0_63 = arith.constant 0 : index
    %c32 = arith.constant 32 : index
    %154 = vector.load %arg12[%c0_62, %c0_63, %c32] : memref<1x24x128xf32, #tpu.memory_space<vmem>>, vector<1x8x32xf32>
    %155 = vector.shape_cast %154 : vector<1x8x32xf32> to vector<8x32xf32>
    %156 = vector.shape_cast %153 : vector<8x32xf32> to vector<1x8x32xf32>
    tpu.vector_store %arg12[%c0_62, %c0_63, %c32], %156 {strides = array<i32>} : memref<1x24x128xf32, #tpu.memory_space<vmem>>, vector<1x8x32xf32>,
    %157 = vector.extract_strided_slice %148 {offsets = [16, 0], sizes = [8, 32], strides = [1, 1]} : vector<64x32xf32> to vector<8x32xf32>
    %c0_64 = arith.constant 0 : index
    %c0_65 = arith.constant 0 : index
    %c64 = arith.constant 64 : index
    %158 = vector.load %arg12[%c0_64, %c0_65, %c64] : memref<1x24x128xf32, #tpu.memory_space<vmem>>, vector<1x8x32xf32>
    %159 = vector.shape_cast %158 : vector<1x8x32xf32> to vector<8x32xf32>
    %160 = vector.shape_cast %157 : vector<8x32xf32> to vector<1x8x32xf32>
    tpu.vector_store %arg12[%c0_64, %c0_65, %c64], %160 {strides = array<i32>} : memref<1x24x128xf32, #tpu.memory_space<vmem>>, vector<1x8x32xf32>,
    %161 = vector.extract_strided_slice %148 {offsets = [24, 0], sizes = [8, 32], strides = [1, 1]} : vector<64x32xf32> to vector<8x32xf32>
    %c0_66 = arith.constant 0 : index
    %c0_67 = arith.constant 0 : index
    %c96 = arith.constant 96 : index
    %162 = vector.load %arg12[%c0_66, %c0_67, %c96] : memref<1x24x128xf32, #tpu.memory_space<vmem>>, vector<1x8x32xf32>
    %163 = vector.shape_cast %162 : vector<1x8x32xf32> to vector<8x32xf32>
    %164 = vector.shape_cast %161 : vector<8x32xf32> to vector<1x8x32xf32>
    tpu.vector_store %arg12[%c0_66, %c0_67, %c96], %164 {strides = array<i32>} : memref<1x24x128xf32, #tpu.memory_space<vmem>>, vector<1x8x32xf32>,
    %165 = vector.extract_strided_slice %148 {offsets = [32, 0], sizes = [8, 32], strides = [1, 1]} : vector<64x32xf32> to vector<8x32xf32>
    %c0_68 = arith.constant 0 : index
    %c8 = arith.constant 8 : index
    %c0_69 = arith.constant 0 : index
    %166 = vector.load %arg12[%c0_68, %c8, %c0_69] : memref<1x24x128xf32, #tpu.memory_space<vmem>>, vector<1x8x32xf32>
    %167 = vector.shape_cast %166 : vector<1x8x32xf32> to vector<8x32xf32>
    %168 = vector.shape_cast %165 : vector<8x32xf32> to vector<1x8x32xf32>
    tpu.vector_store %arg12[%c0_68, %c8, %c0_69], %168 {strides = array<i32>} : memref<1x24x128xf32, #tpu.memory_space<vmem>>, vector<1x8x32xf32>,
    %169 = vector.extract_strided_slice %148 {offsets = [40, 0], sizes = [8, 32], strides = [1, 1]} : vector<64x32xf32> to vector<8x32xf32>
    %c0_70 = arith.constant 0 : index
    %c8_71 = arith.constant 8 : index
    %c32_72 = arith.constant 32 : index
    %170 = vector.load %arg12[%c0_70, %c8_71, %c32_72] : memref<1x24x128xf32, #tpu.memory_space<vmem>>, vector<1x8x32xf32>
    %171 = vector.shape_cast %170 : vector<1x8x32xf32> to vector<8x32xf32>
    %172 = vector.shape_cast %169 : vector<8x32xf32> to vector<1x8x32xf32>
    tpu.vector_store %arg12[%c0_70, %c8_71, %c32_72], %172 {strides = array<i32>} : memref<1x24x128xf32, #tpu.memory_space<vmem>>, vector<1x8x32xf32>,
    %173 = vector.extract_strided_slice %148 {offsets = [48, 0], sizes = [8, 32], strides = [1, 1]} : vector<64x32xf32> to vector<8x32xf32>
    %c0_73 = arith.constant 0 : index
    %c8_74 = arith.constant 8 : index
    %c64_75 = arith.constant 64 : index
    %174 = vector.load %arg12[%c0_73, %c8_74, %c64_75] : memref<1x24x128xf32, #tpu.memory_space<vmem>>, vector<1x8x32xf32>
    %175 = vector.shape_cast %174 : vector<1x8x32xf32> to vector<8x32xf32>
    %176 = vector.shape_cast %173 : vector<8x32xf32> to vector<1x8x32xf32>
    tpu.vector_store %arg12[%c0_73, %c8_74, %c64_75], %176 {strides = array<i32>} : memref<1x24x128xf32, #tpu.memory_space<vmem>>, vector<1x8x32xf32>,
    %177 = vector.extract_strided_slice %148 {offsets = [56, 0], sizes = [8, 32], strides = [1, 1]} : vector<64x32xf32> to vector<8x32xf32>
    %c0_76 = arith.constant 0 : index
    %c8_77 = arith.constant 8 : index
    %c96_78 = arith.constant 96 : index
    %178 = vector.load %arg12[%c0_76, %c8_77, %c96_78] : memref<1x24x128xf32, #tpu.memory_space<vmem>>, vector<1x8x32xf32>
    %179 = vector.shape_cast %178 : vector<1x8x32xf32> to vector<8x32xf32>
    %180 = vector.shape_cast %177 : vector<8x32xf32> to vector<1x8x32xf32>
    tpu.vector_store %arg12[%c0_76, %c8_77, %c96_78], %180 {strides = array<i32>} : memref<1x24x128xf32, #tpu.memory_space<vmem>>, vector<1x8x32xf32>,
    %c0_79 = arith.constant 0 : index
    %c16 = arith.constant 16 : index
    %c0_80 = arith.constant 0 : index
    %181 = vector.load %arg12[%c0_79, %c16, %c0_80] : memref<1x24x128xf32, #tpu.memory_space<vmem>>, vector<1x8x32xf32>
    %182 = vector.shape_cast %181 : vector<1x8x32xf32> to vector<8x32xf32>
    %183 = vector.shape_cast %69 : vector<8x32xf32> to vector<1x8x32xf32>
    tpu.vector_store %arg12[%c0_79, %c16, %c0_80], %183 {strides = array<i32>} : memref<1x24x128xf32, #tpu.memory_space<vmem>>, vector<1x8x32xf32>,
    %cst_81 = arith.constant 0.000000e+00 : f32
    %184 = vector.broadcast %cst_81 : f32 to vector<8x96xf32>
    %c0_82 = arith.constant 0 : index
    %c16_83 = arith.constant 16 : index
    %c32_84 = arith.constant 32 : index
    %185 = vector.load %arg12[%c0_82, %c16_83, %c32_84] : memref<1x24x128xf32, #tpu.memory_space<vmem>>, vector<1x8x96xf32>
    %186 = vector.shape_cast %185 : vector<1x8x96xf32> to vector<8x96xf32>
    %187 = vector.shape_cast %184 : vector<8x96xf32> to vector<1x8x96xf32>
    tpu.vector_store %arg12[%c0_82, %c16_83, %c32_84], %187 {strides = array<i32>} : memref<1x24x128xf32, #tpu.memory_space<vmem>>, vector<1x8x96xf32>,
    return
  }
  func.func @transform_0(%arg0: i32) -> (i32, i32, i32) {
    %c0_i32 = arith.constant 0 : i32
    %c0_i32_0 = arith.constant 0 : i32
    %c0_i32_1 = arith.constant 0 : i32
    return %arg0, %c0_i32, %c0_i32_0 : i32, i32, i32
  }
  func.func @transform_1(%arg0: i32) -> (i32, i32) {
    %c0_i32 = arith.constant 0 : i32
    %c0_i32_0 = arith.constant 0 : i32
    %c0_i32_1 = arith.constant 0 : i32
    return %c0_i32, %c0_i32_0 : i32, i32
  }
  func.func @transform_2(%arg0: i32) -> (i32, i32, i32) {
    %c0_i32 = arith.constant 0 : i32
    %c0_i32_0 = arith.constant 0 : i32
    %c0_i32_1 = arith.constant 0 : i32
    %c0_i32_2 = arith.constant 0 : i32
    return %c0_i32, %c0_i32_0, %c0_i32_1 : i32, i32, i32
  }
  func.func @transform_3(%arg0: i32) -> (i32, i32, i32) {
    %c0_i32 = arith.constant 0 : i32
    %c0_i32_0 = arith.constant 0 : i32
    %c0_i32_1 = arith.constant 0 : i32
    %c0_i32_2 = arith.constant 0 : i32
    return %c0_i32, %c0_i32_0, %c0_i32_1 : i32, i32, i32
  }
  func.func @transform_4(%arg0: i32) -> (i32, i32, i32) {
    %c0_i32 = arith.constant 0 : i32
    %c0_i32_0 = arith.constant 0 : i32
    %c0_i32_1 = arith.constant 0 : i32
    %c0_i32_2 = arith.constant 0 : i32
    return %c0_i32, %c0_i32_0, %c0_i32_1 : i32, i32, i32
  }
  func.func @transform_5(%arg0: i32) -> (i32, i32) {
    %c0_i32 = arith.constant 0 : i32
    %c0_i32_0 = arith.constant 0 : i32
    %c0_i32_1 = arith.constant 0 : i32
    return %c0_i32, %c0_i32_0 : i32, i32
  }
  func.func @transform_6(%arg0: i32) -> (i32, i32, i32) {
    %c0_i32 = arith.constant 0 : i32
    %c0_i32_0 = arith.constant 0 : i32
    %c0_i32_1 = arith.constant 0 : i32
    %c0_i32_2 = arith.constant 0 : i32
    return %c0_i32, %c0_i32_0, %c0_i32_1 : i32, i32, i32
  }
  func.func @transform_7(%arg0: i32) -> (i32, i32, i32) {
    %c0_i32 = arith.constant 0 : i32
    %c0_i32_0 = arith.constant 0 : i32
    %c0_i32_1 = arith.constant 0 : i32
    %c0_i32_2 = arith.constant 0 : i32
    return %c0_i32, %c0_i32_0, %c0_i32_1 : i32, i32, i32
  }
  func.func @transform_8(%arg0: i32) -> (i32, i32, i32) {
    %c0_i32 = arith.constant 0 : i32
    %c0_i32_0 = arith.constant 0 : i32
    %c0_i32_1 = arith.constant 0 : i32
    %c0_i32_2 = arith.constant 0 : i32
    return %c0_i32, %c0_i32_0, %c0_i32_1 : i32, i32, i32
  }
  func.func @transform_9(%arg0: i32) -> (i32, i32) {
    %c0_i32 = arith.constant 0 : i32
    %c0_i32_0 = arith.constant 0 : i32
    %c0_i32_1 = arith.constant 0 : i32
    return %c0_i32, %c0_i32_0 : i32, i32
  }
  func.func @transform_10(%arg0: i32) -> (i32, i32, i32) {
    %c0_i32 = arith.constant 0 : i32
    %c0_i32_0 = arith.constant 0 : i32
    %c0_i32_1 = arith.constant 0 : i32
    return %arg0, %c0_i32, %c0_i32_0 : i32, i32, i32
  }
  func.func @transform_11(%arg0: i32) -> (i32, i32, i32) {
    %c0_i32 = arith.constant 0 : i32
    %c0_i32_0 = arith.constant 0 : i32
    %c0_i32_1 = arith.constant 0 : i32
    return %arg0, %c0_i32, %c0_i32_0 : i32, i32, i32
  }
}

</mosaic_0001>

<bundles_post_ra>
// kernel: beta_vae_forward.1
= control target key start
LH: loop header
LB: loop body
LE: loop exit
PB: predicated region body
PF: predicated region fallthrough
CT: control target
= control target key end

     0   :  { %vm213_vm0 = vcmask 1045504   ;;  %vm164_vm1 = vcmask 97280   ;;  %v75_v27 = vlaneseq  ;;  %vm526_vm2 = vcmask 523264   ;;  %s11950_s29 = smov 112   ;;  %s11953_s30 = smov 32   ;;  %s15214_s1 = inlined_call_operand.vmem [shape: bf16[12,64], index: 1, kind: input, shape index: {}]   ;;  %s15215_s0 = inlined_call_operand.vmem [shape: bf16[1,256,12], index: 0, kind: input, shape index: {}]   ;;  %s15216_s2 = inlined_call_operand.vmem [shape: bf16[3,64,128], index: 2, kind: input, shape index: {}]   ;;  %s15217_s9 = inlined_call_operand.vmem [shape: f32[8,256], index: 9, kind: input, shape index: {}]   ;;  %s15218_s3 = inlined_call_operand.vmem [shape: bf16[3,128,256], index: 3, kind: input, shape index: {}]   ;;  %s15219_s4 = inlined_call_operand.vmem [shape: bf16[32,256,32], index: 4, kind: input, shape index: {}]   ;;  %s15220_s5 = inlined_call_operand.vmem [shape: bf16[16,256], index: 5, kind: input, shape index: {}]   ;;  %s15221_s11 = inlined_call_operand.vmem [shape: f32[1,24,128], index: 11, kind: output, shape index: {}]   ;;  %s15222_s6 = inlined_call_operand.vmem [shape: bf16[3,256,128], index: 6, kind: input, shape index: {}]   ;;  %s15223_s10 = inlined_call_operand.vmem [shape: f32[1,8,16], index: 10, kind: input, shape index: {}]   ;;  %s15224_s7 = inlined_call_operand.vmem [shape: bf16[3,128,64], index: 7, kind: input, shape index: {}]   ;;  %s15225_s8 = inlined_call_operand.vmem [shape: bf16[3,64,32], index: 8, kind: input, shape index: {}]  }
   0x1   :  { %v11227_v0 = vld [vmem:[%s15214_s1] sm:$0x3f]   ;;  %v11229_v3 = vld [vmem:[%s15215_s0 + $0x8] sm:$0xff]   ;;  %v11230_v4 = vld [vmem:[%s15215_s0 + $0x10] sm:$0xff]   ;;  %vm466_vm3 = vcmask 1043456   ;;  %vm8040_vm5 = vcmask 261120  }
   0x2   :  { %v11228_v1 = vld [vmem:[%s15215_s0] sm:$0xff]   ;;  %11219 = vmatprep.subr.msk.bf16.mxu0 %vm213_vm0, %v11227_v0  ;;  %v215_v2 = vsel %vm213_vm0, %v11227_v0, 0  ;;  %v11231_v5 = vld [vmem:[%s15215_s0 + $0x18] sm:$0xff]   ;;  %v11233_v7 = vld [vmem:[%s15215_s0 + $0x28] sm:$0xff]   ;;  %v12109_v28 = vshrl.u32 %v75_v27, 7  ;;  %vm9223_vm6 = vcmask 1047808  }
   0x3   :  { %10970 = vmatpush3.bf16.msra.mxu0 %v215_v2  ;;  %10971 = vmatprep.mubr.msk.bf16.mxu0 %vm164_vm1, %v11228_v1  ;;  %v11232_v6 = vld [vmem:[%s15215_s0 + $0x20] sm:$0xff]   ;;  %v11244_v8 = vld [vmem:[%s15216_s2 + $0x38] sm:$0xff]   ;;  %v11234_v9 = vld [vmem:[%s15215_s0 + $0x30] sm:$0xff]   ;;  %vm8140_vm7 = vcmask 130048   ;;  %vm11951_vm8 = vmmov 0   ;;  %vm9192_vm9 = vcmask 523520  }
   0x4   :  { %11003 = vmatprep.subr.bf16.mxu1 %v11244_v8  ;;  %v11235_v10 = vld [vmem:[%s15215_s0 + $0x38] sm:$0xff]   ;;  %v11236_v11 = vld [vmem:[%s15215_s0 + $0x40] sm:$0xff]   ;;  %v11237_v12 = vld [vmem:[%s15215_s0 + $0x48] sm:$0xff]   ;;  %15231 = vst [vmem:[#allocation2_spill] sm:$0xff] %v12109_v28  ;;  %v77_v29 = vsub.s32 0, %v12109_v28  ;;  %vm9198_vm10 = vcmask 785920  }
   0x5   :  { %11004 = vmatpush3.bf16.msra.mxu1 %v11244_v8  ;;  %v11238_v13 = vld [vmem:[%s15215_s0 + $0x50] sm:$0xff]   ;;  %v11239_v14 = vld [vmem:[%s15215_s0 + $0x58] sm:$0xff]   ;;  %v11240_v15 = vld [vmem:[%s15215_s0 + $0x60] sm:$0xff]   ;;  %vm9204_vm11 = vcmask 1048320  }
   0x6   :  { %10972 = vmatmul.mubr.msk.bf16.vlgmr.msra.gmra.mxu0 %vm164_vm1, %v11229_v3  ;;  %v11241_v16 = vld [vmem:[%s15215_s0 + $0x68] sm:$0xff]   ;;  %v11242_v17 = vld [vmem:[%s15215_s0 + $0x70] sm:$0xff]   ;;  %v11243_v18 = vld [vmem:[%s15215_s0 + $0x78] sm:$0xff]  }
   0x7   :  { %10975 = vmatprep.mubr.msk.bf16.mxu0 %vm164_vm1, %v11230_v4  ;;  %v11246_v19 = vld [vmem:[%s15216_s2 + $0x18] sm:$0xff]   ;;  %v11245_v20 = vld [vmem:[%s15216_s2 + $0x30] sm:$0xff]   ;;  %v11247_v22 = vld [vmem:[%s15216_s2 + $0x28] sm:$0xff]  }
   0x8   :  { %11043 = vmatprep.subr.bf16.mxu0 %v11246_v19  ;;  %11005 = vmatprep.subr.bf16.mxu1 %v11245_v20  ;;  %v11248_v21 = vld [vmem:[%s15216_s2 + $0x10] sm:$0xff]   ;;  %v11250_v23 = vld [vmem:[%s15216_s2 + $0x8] sm:$0xff]   ;;  %v11249_v24 = vld [vmem:[%s15216_s2 + $0x20] sm:$0xff]  }
   0x9   :  { %11044 = vmatpush3.bf16.msra.mxu0 %v11246_v19  ;;  %11006 = vmatpush3.bf16.msra.mxu1 %v11245_v20  ;;  %v11251_v25 = vld [vmem:[%s15216_s2] sm:$0xff]   ;;  %v11252_v26 = vld [vmem:[%s15216_s2 + $0x58] sm:$0xff]   ;;  %v11253_v50 = vld [vmem:[%s15216_s2 + $0x50] sm:$0xff]  }
   0xa   :  { %11045 = vmatprep.subr.bf16.mxu0 %v11248_v21  ;;  %11007 = vmatprep.subr.bf16.mxu1 %v11247_v22  ;;  %v12115_v30 = vld [vmem:[%s15217_s9] sm:$0xff]  ;;  %v11254_v62 = vld [vmem:[%s15216_s2 + $0x48] sm:$0xff]   ;;  %vm9354_vm4 = vmneg %vm466_vm3 }
   0xb   :  { %v12118_v31 = vrot.slane %v12115_v30, %v77_v29 }
   0xd   :  { %11046 = vmatpush3.bf16.msra.mxu0 %v11248_v21  ;;  %11008 = vmatpush3.bf16.msra.mxu1 %v11247_v22 }
   0xe   :  { %10976 = vmatmul.mubr.msk.bf16.gmra.mxu0 %vm164_vm1, %v11231_v5  ;;  %11047 = vmatprep.subr.bf16.mxu0 %v11250_v23 }
   0xf   :  { %10979 = vmatprep.mubr.msk.bf16.mxu0 %vm164_vm1, %v11232_v6  ;;  %11009 = vmatprep.subr.bf16.mxu1 %v11249_v24  ;;  %v11255_v6 = vld [vmem:[%s15216_s2 + $0x40] sm:$0xff]  }
  0x11   :  { %11048 = vmatpush3.bf16.msra.mxu0 %v11250_v23  ;;  %11010 = vmatpush3.bf16.msra.mxu1 %v11249_v24 }
  0x12   :  { %11049 = vmatprep.subr.bf16.mxu0 %v11251_v25  ;;  %11083 = vmatprep.subr.bf16.mxu1 %v11252_v26 }
  0x15   :  { %11050 = vmatpush3.bf16.msra.mxu0 %v11251_v25 }
  0x16   :  { %10980 = vmatmul.mubr.msk.bf16.gmra.mxu0 %vm164_vm1, %v11233_v7 }
  0x17   :  { %10983 = vmatprep.mubr.msk.bf16.mxu0 %vm164_vm1, %v11234_v9 }
  0x1e   :  { %10984 = vmatmul.mubr.msk.bf16.gmra.mxu0 %vm164_vm1, %v11235_v10 }
  0x1f   :  { %10987 = vmatprep.mubr.msk.bf16.mxu0 %vm164_vm1, %v11236_v11 }
  0x26   :  { %10988 = vmatmul.mubr.msk.bf16.gmra.mxu0 %vm164_vm1, %v11237_v12 }
  0x27   :  { %10991 = vmatprep.mubr.msk.bf16.mxu0 %vm164_vm1, %v11238_v13 }
  0x2e   :  { %10992 = vmatmul.mubr.msk.bf16.gmra.mxu0 %vm164_vm1, %v11239_v14 }
  0x2f   :  { %10995 = vmatprep.mubr.msk.bf16.mxu0 %vm164_vm1, %v11240_v15 }
  0x36   :  { %10996 = vmatmul.mubr.msk.bf16.gmra.mxu0 %vm164_vm1, %v11241_v16 }
  0x37   :  { %10999 = vmatprep.mubr.msk.bf16.mxu0 %vm164_vm1, %v11242_v17 }
  0x3e   :  { %11000 = vmatmul.mubr.msk.bf16.gmra.mxu0 %vm164_vm1, %v11243_v18 }
  0xc6   :  { %v10973_v32 = vpop.f32.mrf.mxu0 }
  0xc7   :  { %v260_v34 = vadd.f32 %v10973_v32, %v12118_v31 }
  0xc8   :  { %v251_v33 = vpop.f32.mrf.mxu0 }
  0xc9   :  { %v252_v36 = vadd.f32 %v251_v33, %v12118_v31  ;;  %v380_v39 = vmax.f32 %v260_v34, 0.0 }
  0xca   :  { %v10974_v35 = vpop.f32.mrf.mxu0 }
  0xcb   :  { %v263_v37 = vadd.f32 %v10974_v35, %v12118_v31  ;;  %v378_v43 = vmax.f32 %v252_v36, 0.0 }
  0xcc   :  { %v254_v38 = vpop.f32.mrf.mxu0 }
  0xcd   :  { %v381_v40 = vmax.f32 %v263_v37, 0.0  ;;  %v255_v41 = vadd.f32 %v254_v38, %v12118_v31 }
  0xce   :  { %v10977_v42 = vpop.f32.mrf.mxu0 }
  0xcf   :  { %v411_v44 = vpack.c.bf16 %v381_v40, %v380_v39  ;;  %v379_v45 = vmax.f32 %v255_v41, 0.0  ;;  %v276_v46 = vadd.f32 %v10977_v42, %v12118_v31 }
  0xd0   :  { %v267_v47 = vpop.f32.mrf.mxu0 }
  0xd1   :  { %v410_v48 = vpack.c.bf16 %v379_v45, %v378_v43  ;;  %v468_v51 = vrot.slane %v411_v44, 4  ;;  %v268_v52 = vadd.f32 %v267_v47, %v12118_v31  ;;  %v384_v55 = vmax.f32 %v276_v46, 0.0 }
  0xd2   :  { %v10978_v49 = vpop.f32.mrf.mxu0 }
  0xd3   :  { %v279_v53 = vadd.f32 %v10978_v49, %v12118_v31  ;;  %v467_v54 = vrot.slane %v410_v48, 4  ;;  %11011 = vmatprep.mubr.msk.bf16.mxu1 %vm526_vm2, %v410_v48  ;;  %v382_v63 = vmax.f32 %v268_v52, 0.0 }
  0xd4   :  { %v270_v56 = vpop.f32.mrf.mxu0  ;;  %11012 = vmatmul.mubr.msk.bf16.vlgmr.msra.gmra.mxu1 %vm526_vm2, %v411_v44 }
  0xd5   :  { %v385_v57 = vmax.f32 %v279_v53, 0.0  ;;  %v12133_v58 = vsel %vm466_vm3, %v467_v54, %v468_v51  ;;  %v271_v59 = vadd.f32 %v270_v56, %v12118_v31  ;;  %11084 = vmatpush3.bf16.msra.mxu1 %v11252_v26  ;;  %v501_v60 = vsel %vm466_vm3, 0, %v467_v54 }
  0xd6   :  { %v10981_v61 = vpop.f32.mrf.mxu0  ;;  %11051 = vmatprep.mubr.msk.bf16.mxu0 %vm526_vm2, %v501_v60  ;;  %11085 = vmatprep.subr.bf16.mxu1 %v11253_v50 }
  0xd7   :  { %v413_v0 = vpack.c.bf16 %v385_v57, %v384_v55  ;;  %v383_v1 = vmax.f32 %v271_v59, 0.0  ;;  %11052 = vmatmul.mubr.msk.bf16.vlgmr.msra.gmra.mxu0 %vm526_vm2, %v12133_v58  ;;  %v292_v2 = vadd.f32 %v10981_v61, %v12118_v31 }
  0xd8   :  { %v283_v3 = vpop.f32.mrf.mxu0 }
  0xd9   :  { %v412_v4 = vpack.c.bf16 %v383_v1, %v382_v63  ;;  %11086 = vmatpush3.bf16.msra.mxu1 %v11253_v50  ;;  %v472_v7 = vrot.slane %v413_v0, 4  ;;  %v284_v9 = vadd.f32 %v283_v3, %v12118_v31  ;;  %v388_v11 = vmax.f32 %v292_v2, 0.0 }
  0xda   :  { %v10982_v5 = vpop.f32.mrf.mxu0  ;;  %11087 = vmatprep.subr.bf16.mxu1 %v11254_v62 }
  0xdb   :  { %v470_v8 = vrot.slane %v412_v4, 4  ;;  %v295_v10 = vadd.f32 %v10982_v5, %v12118_v31  ;;  %11015 = vmatprep.mubr.msk.bf16.mxu1 %vm526_vm2, %v412_v4  ;;  %v386_v18 = vmax.f32 %v284_v9, 0.0 }
  0xdc   :  { %v286_v12 = vpop.f32.mrf.mxu0  ;;  %11016 = vmatmul.mubr.msk.bf16.gmra.mxu1 %vm526_vm2, %v413_v0 }
  0xdd   :  { %v389_v13 = vmax.f32 %v295_v10, 0.0  ;;  %v287_v14 = vadd.f32 %v286_v12, %v12118_v31  ;;  %v12153_v15 = vsel %vm466_vm3, %v468_v51, %v470_v8  ;;  %v12156_v16 = vsel %vm466_vm3, %v470_v8, %v472_v7  ;;  %11088 = vmatpush3.bf16.msra.mxu1 %v11254_v62 }
  0xde   :  { %v10985_v17 = vpop.f32.mrf.mxu0  ;;  %11055 = vmatprep.mubr.msk.bf16.mxu0 %vm526_vm2, %v12153_v15  ;;  %11089 = vmatprep.subr.bf16.mxu1 %v11255_v6 }
  0xdf   :  { %v415_v19 = vpack.c.bf16 %v389_v13, %v388_v11  ;;  %v387_v20 = vmax.f32 %v287_v14, 0.0  ;;  %11056 = vmatmul.mubr.msk.bf16.gmra.mxu0 %vm526_vm2, %v12156_v16  ;;  %v308_v21 = vadd.f32 %v10985_v17, %v12118_v31 }
  0xe0   :  { %v299_v22 = vpop.f32.mrf.mxu0 }
  0xe1   :  { %v414_v23 = vpack.c.bf16 %v387_v20, %v386_v18  ;;  %11090 = vmatpush3.bf16.msra.mxu1 %v11255_v6  ;;  %v476_v25 = vrot.slane %v415_v19, 4  ;;  %v300_v27 = vadd.f32 %v299_v22, %v12118_v31  ;;  %v392_v32 = vmax.f32 %v308_v21, 0.0 }
  0xe2   :  { %v10986_v24 = vpop.f32.mrf.mxu0 }
  0xe3   :  { %v474_v26 = vrot.slane %v414_v23, 4  ;;  %v311_v29 = vadd.f32 %v10986_v24, %v12118_v31  ;;  %11019 = vmatprep.mubr.msk.bf16.mxu1 %vm526_vm2, %v414_v23  ;;  %v390_v39 = vmax.f32 %v300_v27, 0.0 }
  0xe4   :  { %v302_v33 = vpop.f32.mrf.mxu0  ;;  %11020 = vmatmul.mubr.msk.bf16.gmra.mxu1 %vm526_vm2, %v415_v19 }
  0xe5   :  { %v393_v34 = vmax.f32 %v311_v29, 0.0  ;;  %v303_v35 = vadd.f32 %v302_v33, %v12118_v31  ;;  %v12169_v36 = vsel %vm466_vm3, %v472_v7, %v474_v26  ;;  %v12172_v37 = vsel %vm466_vm3, %v474_v26, %v476_v25 }
  0xe6   :  { %v10989_v38 = vpop.f32.mrf.mxu0  ;;  %11059 = vmatprep.mubr.msk.bf16.mxu0 %vm526_vm2, %v12169_v36 }
  0xe7   :  { %v417_v40 = vpack.c.bf16 %v393_v34, %v392_v32  ;;  %v391_v41 = vmax.f32 %v303_v35, 0.0  ;;  %11060 = vmatmul.mubr.msk.bf16.gmra.mxu0 %vm526_vm2, %v12172_v37  ;;  %v324_v42 = vadd.f32 %v10989_v38, %v12118_v31 }
  0xe8   :  { %v315_v43 = vpop.f32.mrf.mxu0 }
  0xe9   :  { %v416_v44 = vpack.c.bf16 %v391_v41, %v390_v39  ;;  %v480_v46 = vrot.slane %v417_v40, 4  ;;  %v316_v48 = vadd.f32 %v315_v43, %v12118_v31  ;;  %v396_v50 = vmax.f32 %v324_v42, 0.0 }
  0xea   :  { %v10990_v45 = vpop.f32.mrf.mxu0 }
  0xeb   :  { %v478_v47 = vrot.slane %v416_v44, 4  ;;  %v327_v49 = vadd.f32 %v10990_v45, %v12118_v31  ;;  %11023 = vmatprep.mubr.msk.bf16.mxu1 %vm526_vm2, %v416_v44  ;;  %v394_v57 = vmax.f32 %v316_v48, 0.0 }
  0xec   :  { %v318_v51 = vpop.f32.mrf.mxu0  ;;  %11024 = vmatmul.mubr.msk.bf16.gmra.mxu1 %vm526_vm2, %v417_v40 }
  0xed   :  { %v397_v52 = vmax.f32 %v327_v49, 0.0  ;;  %v319_v53 = vadd.f32 %v318_v51, %v12118_v31  ;;  %v12185_v54 = vsel %vm466_vm3, %v476_v25, %v478_v47  ;;  %v12188_v55 = vsel %vm466_vm3, %v478_v47, %v480_v46 }
  0xee   :  { %v10993_v56 = vpop.f32.mrf.mxu0  ;;  %11063 = vmatprep.mubr.msk.bf16.mxu0 %vm526_vm2, %v12185_v54 }
  0xef   :  { %v419_v59 = vpack.c.bf16 %v397_v52, %v396_v50  ;;  %v395_v60 = vmax.f32 %v319_v53, 0.0  ;;  %11064 = vmatmul.mubr.msk.bf16.gmra.mxu0 %vm526_vm2, %v12188_v55  ;;  %v340_v61 = vadd.f32 %v10993_v56, %v12118_v31 }
  0xf0   :  { %v331_v62 = vpop.f32.mrf.mxu0 }
  0xf1   :  { %v418_v63 = vpack.c.bf16 %v395_v60, %v394_v57  ;;  %v484_v1 = vrot.slane %v419_v59, 4  ;;  %v332_v3 = vadd.f32 %v331_v62, %v12118_v31  ;;  %v400_v5 = vmax.f32 %v340_v61, 0.0 }
  0xf2   :  { %v10994_v0 = vpop.f32.mrf.mxu0 }
  0xf3   :  { %v482_v2 = vrot.slane %v418_v63, 4  ;;  %v343_v4 = vadd.f32 %v10994_v0, %v12118_v31  ;;  %11027 = vmatprep.mubr.msk.bf16.mxu1 %vm526_vm2, %v418_v63  ;;  %v398_v12 = vmax.f32 %v332_v3, 0.0  ;;  %v11267_v0 = vld [vmem:[%s15218_s3 + $0xc4] ss:$8 sps:$4 sm:$0xff]   ;;  %v11273_v3 = vld [vmem:[%s15218_s3 + $0x74] ss:$8 sps:$4 sm:$0xff]  }
  0xf4   :  { %v334_v6 = vpop.f32.mrf.mxu0  ;;  %11028 = vmatmul.mubr.msk.bf16.gmra.mxu1 %vm526_vm2, %v419_v59  ;;  %1739 = vmatprep.subr.bf16.mxu1 %v11273_v3 }
  0xf5   :  { %v401_v7 = vmax.f32 %v343_v4, 0.0  ;;  %v335_v8 = vadd.f32 %v334_v6, %v12118_v31  ;;  %v12201_v9 = vsel %vm466_vm3, %v480_v46, %v482_v2  ;;  %v12204_v10 = vsel %vm466_vm3, %v482_v2, %v484_v1  ;;  %v11270_v2 = vld [vmem:[%s15218_s3 + $0xb4] ss:$8 sps:$4 sm:$0xff]   ;;  %v11271_v4 = vld [vmem:[%s15218_s3 + $0x70] ss:$8 sps:$4 sm:$0xff]  }
  0xf6   :  { %v10997_v11 = vpop.f32.mrf.mxu0  ;;  %11067 = vmatprep.mubr.msk.bf16.mxu0 %vm526_vm2, %v12201_v9  ;;  %v11274_v6 = vld [vmem:[%s15218_s3 + $0x60] ss:$8 sps:$4 sm:$0xff]  }
  0xf7   :  { %v421_v13 = vpack.c.bf16 %v401_v7, %v400_v5  ;;  %v399_v14 = vmax.f32 %v335_v8, 0.0  ;;  %11068 = vmatmul.mubr.msk.bf16.gmra.mxu0 %vm526_vm2, %v12204_v10  ;;  %v356_v17 = vadd.f32 %v10997_v11, %v12118_v31  ;;  %v11276_v5 = vld [vmem:[%s15218_s3 + $0x64] ss:$8 sps:$4 sm:$0xff]   ;;  %v11277_v7 = vld [vmem:[%s15218_s3 + $0xa0] ss:$8 sps:$4 sm:$0xff]  }
  0xf8   :  { %v347_v18 = vpop.f32.mrf.mxu0  ;;  %v11279_v8 = vld [vmem:[%s15218_s3 + $0xa4] ss:$8 sps:$4 sm:$0xff]   ;;  %v11280_v11 = vld [vmem:[%s15218_s3 + $0x50] ss:$8 sps:$4 sm:$0xff]  }
  0xf9   :  { %v420_v19 = vpack.c.bf16 %v399_v14, %v398_v12  ;;  %v488_v21 = vrot.slane %v421_v13, 4  ;;  %v348_v23 = vadd.f32 %v347_v18, %v12118_v31  ;;  %v404_v25 = vmax.f32 %v356_v17, 0.0  ;;  %v11285_v12 = vld [vmem:[%s15218_s3 + $0x44] ss:$8 sps:$4 sm:$0xff]   ;;  %v11286_v14 = vld [vmem:[%s15218_s3 + $0x90] ss:$8 sps:$4 sm:$0xff]  }
  0xfa   :  { %v10998_v20 = vpop.f32.mrf.mxu0  ;;  %v11288_v17 = vld [vmem:[%s15218_s3 + $0x94] ss:$8 sps:$4 sm:$0xff]  }
  0xfb   :  { %v486_v22 = vrot.slane %v420_v19, 4  ;;  %v359_v24 = vadd.f32 %v10998_v20, %v12118_v31  ;;  %11031 = vmatprep.mubr.msk.bf16.mxu1 %vm526_vm2, %v420_v19  ;;  %v402_v35 = vmax.f32 %v348_v23, 0.0  ;;  %v11291_v18 = vld [vmem:[%s15218_s3 + $0x34] ss:$8 sps:$4 sm:$0xff]   ;;  %v11289_v19 = vld [vmem:[%s15218_s3 + $0x30] ss:$8 sps:$4 sm:$0xff]  }
  0xfc   :  { %v350_v26 = vpop.f32.mrf.mxu0  ;;  %11032 = vmatmul.mubr.msk.bf16.gmra.mxu1 %vm526_vm2, %v421_v13  ;;  %v11283_v13 = vld [vmem:[%s15218_s3 + $0x40] ss:$8 sps:$4 sm:$0xff]   ;;  %v11294_v20 = vld [vmem:[%s15218_s3 + $0x24] ss:$8 sps:$4 sm:$0xff]   ;;  %v11298_v23 = vld [vmem:[%s15218_s3 + $0x10] ss:$8 sps:$4 sm:$0xff]  }
  0xfd   :  { %v405_v27 = vmax.f32 %v359_v24, 0.0  ;;  %v351_v29 = vadd.f32 %v350_v26, %v12118_v31  ;;  %v487_v32 = vsel %vm466_vm3, %v484_v1, %v486_v22  ;;  %v489_v33 = vsel %vm466_vm3, %v486_v22, %v488_v21  ;;  %v11268_v1 = vld [vmem:[%s15218_s3 + $0xb0] ss:$8 sps:$4 sm:$0xff]   ;;  %v11300_v22 = vld [vmem:[%s15218_s3 + $0x14] ss:$8 sps:$4 sm:$0xff]  }
  0xfe   :  { %v11001_v34 = vpop.f32.mrf.mxu0  ;;  %11071 = vmatprep.mubr.msk.bf16.mxu0 %vm526_vm2, %v487_v32  ;;  %v11297_v24 = vld [vmem:[%s15218_s3 + $0x84] ss:$8 sps:$4 sm:$0xff]  }
  0xff   :  { %v423_v38 = vpack.c.bf16 %v405_v27, %v404_v25  ;;  %v403_v39 = vmax.f32 %v351_v29, 0.0  ;;  %11072 = vmatmul.mubr.msk.bf16.gmra.mxu0 %vm526_vm2, %v489_v33  ;;  %v372_v40 = vadd.f32 %v11001_v34, %v12118_v31  ;;  %v11295_v25 = vld [vmem:[%s15218_s3 + $0x80] ss:$8 sps:$4 sm:$0xff]   ;;  %v11303_v26 = vld [vmem:[%s15218_s3 + $0x4] ss:$8 sps:$4 sm:$0xff]   ;;  %v15226_v29 = vmov 0  }
 0x100   :  { %v363_v41 = vpop.f32.mrf.mxu0  ;;  %v11301_v27 = vld [vmem:[%s15218_s3] ss:$8 sps:$4 sm:$0xff]  }
 0x101   :  { %v422_v42 = vpack.c.bf16 %v403_v39, %v402_v35  ;;  %v492_v44 = vrot.slane %v423_v38, 4  ;;  %v364_v46 = vadd.f32 %v363_v41, %v12118_v31  ;;  %v408_v48 = vmax.f32 %v372_v40, 0.0 }
 0x102   :  { %v11002_v43 = vpop.f32.mrf.mxu0 }
 0x103   :  { %v490_v45 = vrot.slane %v422_v42, 4  ;;  %v375_v47 = vadd.f32 %v11002_v43, %v12118_v31  ;;  %11035 = vmatprep.mubr.msk.bf16.mxu1 %vm526_vm2, %v422_v42  ;;  %v406_v56 = vmax.f32 %v364_v46, 0.0 }
 0x104   :  { %v366_v49 = vpop.f32.mrf.mxu0  ;;  %11036 = vmatmul.mubr.msk.bf16.gmra.mxu1 %vm526_vm2, %v423_v38 }
 0x105   :  { %v409_v50 = vmax.f32 %v375_v47, 0.0  ;;  %v367_v51 = vadd.f32 %v366_v49, %v12118_v31  ;;  %v491_v52 = vsel %vm466_vm3, %v488_v21, %v490_v45  ;;  %v493_v53 = vsel %vm466_vm3, %v490_v45, %v492_v44  ;;  %v11292_v21 = vld [vmem:[%s15218_s3 + $0x20] ss:$8 sps:$4 sm:$0xff]  }
 0x106   :  { %11075 = vmatprep.mubr.msk.bf16.mxu0 %vm526_vm2, %v491_v52 }
 0x107   :  { %v425_v57 = vpack.c.bf16 %v409_v50, %v408_v48  ;;  %v407_v59 = vmax.f32 %v367_v51, 0.0  ;;  %11076 = vmatmul.mubr.msk.bf16.gmra.mxu0 %vm526_vm2, %v493_v53 }
 0x109   :  { %v424_v60 = vpack.c.bf16 %v407_v59, %v406_v56  ;;  %v496_v61 = vrot.slane %v425_v57, 4 }
 0x10b   :  { %v494_v62 = vrot.slane %v424_v60, 4  ;;  %11039 = vmatprep.mubr.msk.bf16.mxu1 %vm526_vm2, %v424_v60 }
 0x10c   :  { %11040 = vmatmul.mubr.msk.bf16.gmra.mxu1 %vm526_vm2, %v425_v57 }
 0x10d   :  { %11091 = vmatprep.mubr.msk.bf16.mxu1 %vm526_vm2, %v12133_v58  ;;  %v495_v31 = vsel %vm466_vm3, %v492_v44, %v494_v62  ;;  %v497_v63 = vsel %vm466_vm3, %v494_v62, %v496_v61  ;;  %v11256_v58 = vld [vmem:[%s15218_s3 + $0xf0] ss:$8 sps:$4 sm:$0xff]  }
 0x10e   :  { %11079 = vmatprep.mubr.msk.bf16.mxu0 %vm526_vm2, %v495_v31 }
 0x10f   :  { %11080 = vmatmul.mubr.msk.bf16.gmra.mxu0 %vm526_vm2, %v497_v63 }
 0x110   :  { %1498 = vmatprep.mubr.bf16.mxu0 %v15226_v29 }
 0x114   :  { %11092 = vmatmul.mubr.msk.bf16.vlgmr.msra.gmra.mxu1 %vm526_vm2, %v12153_v15  ;;  %v11258_v15 = vld [vmem:[%s15218_s3 + $0xf4] ss:$8 sps:$4 sm:$0xff]  }
 0x115   :  { %11095 = vmatprep.mubr.msk.bf16.mxu1 %vm526_vm2, %v12156_v16  ;;  %1466 = vmatprep.subr.bf16.mxu0 %v11258_v15  ;;  %v11259_v16 = vld [vmem:[%s15218_s3 + $0xe0] ss:$8 sps:$4 sm:$0xff]  }
 0x116   :  { %1467 = vmatpush1.bf16.msra.mxu0 %v11256_v58  ;;  %1740 = vmatpush1.bf16.msra.mxu1 %v11271_v4 }
 0x117   :  { %1741 = vmatprep.subr.bf16.mxu1 %v11276_v5 }
 0x11a   :  { %1742 = vmatpush1.bf16.msra.mxu1 %v11274_v6 }
 0x11c   :  { %11096 = vmatmul.mubr.msk.bf16.gmra.mxu1 %vm526_vm2, %v12169_v36  ;;  %v11261_v36 = vld [vmem:[%s15218_s3 + $0xe4] ss:$8 sps:$4 sm:$0xff]  }
 0x11d   :  { %11099 = vmatprep.mubr.msk.bf16.mxu1 %vm526_vm2, %v12172_v37  ;;  %1468 = vmatprep.subr.bf16.mxu0 %v11261_v36  ;;  %v11262_v37 = vld [vmem:[%s15218_s3 + $0xd0] ss:$8 sps:$4 sm:$0xff]  }
 0x11e   :  { %1469 = vmatpush1.bf16.msra.mxu0 %v11259_v16 }
 0x124   :  { %11100 = vmatmul.mubr.msk.bf16.gmra.mxu1 %vm526_vm2, %v12185_v54  ;;  %v11264_v54 = vld [vmem:[%s15218_s3 + $0xd4] ss:$8 sps:$4 sm:$0xff]  }
 0x125   :  { %11103 = vmatprep.mubr.msk.bf16.mxu1 %vm526_vm2, %v12188_v55  ;;  %1470 = vmatprep.subr.bf16.mxu0 %v11264_v54  ;;  %v11265_v55 = vld [vmem:[%s15218_s3 + $0xc0] ss:$8 sps:$4 sm:$0xff]  }
 0x126   :  { %1471 = vmatpush1.bf16.msra.mxu0 %v11262_v37 }
 0x127   :  { %1472 = vmatprep.subr.bf16.mxu0 %v11267_v0 }
 0x12a   :  { %1473 = vmatpush1.bf16.msra.mxu0 %v11265_v55 }
 0x12b   :  { %1474 = vmatprep.subr.bf16.mxu0 %v11270_v2 }
 0x12c   :  { %11104 = vmatmul.mubr.msk.bf16.gmra.mxu1 %vm526_vm2, %v12201_v9  ;;  %v969_v9 = vsel %vm466_vm3, %v496_v61, 0 }
 0x12d   :  { %11107 = vmatprep.mubr.msk.bf16.mxu1 %vm526_vm2, %v12204_v10  ;;  %v11282_v10 = vld [vmem:[%s15218_s3 + $0x54] ss:$8 sps:$4 sm:$0xff]  }
 0x12e   :  { %1475 = vmatpush1.bf16.msra.mxu0 %v11268_v1  ;;  %1743 = vmatprep.subr.bf16.mxu1 %v11282_v10 }
 0x12f   :  { %1476 = vmatprep.subr.bf16.mxu0 %v11279_v8  ;;  %1744 = vmatpush1.bf16.msra.mxu1 %v11280_v11 }
 0x130   :  { %1745 = vmatprep.subr.bf16.mxu1 %v11285_v12 }
 0x132   :  { %1477 = vmatpush1.bf16.msra.mxu0 %v11277_v7 }
 0x133   :  { %1746 = vmatpush1.bf16.msra.mxu1 %v11283_v13  ;;  %1478 = vmatprep.subr.bf16.mxu0 %v11288_v17  ;;  %v1191_v13 = vsub.s32 1, %v12109_v28 }
 0x134   :  { %11108 = vmatmul.mubr.msk.bf16.gmra.mxu1 %vm526_vm2, %v487_v32  ;;  %1747 = vmatprep.subr.bf16.mxu1 %v11291_v18  ;;  %v11306_v32 = vld [vmem:[%s15218_s3 + $0x174] ss:$8 sps:$4 sm:$0xff]  }
 0x135   :  { %11111 = vmatprep.mubr.msk.bf16.mxu1 %vm526_vm2, %v489_v33 }
 0x136   :  { %1479 = vmatpush1.bf16.msra.mxu0 %v11286_v14 }
 0x137   :  { %1748 = vmatpush1.bf16.msra.mxu1 %v11289_v19  ;;  %1480 = vmatprep.subr.bf16.mxu0 %v11297_v24 }
 0x138   :  { %1749 = vmatprep.subr.bf16.mxu1 %v11294_v20 }
 0x13a   :  { %1481 = vmatpush1.bf16.msra.mxu0 %v11295_v25 }
 0x13b   :  { %1750 = vmatpush1.bf16.msra.mxu1 %v11292_v21  ;;  %2015 = vmatprep.subr.bf16.mxu0 %v11306_v32 }
 0x13c   :  { %11112 = vmatmul.mubr.msk.bf16.gmra.mxu1 %vm526_vm2, %v491_v52  ;;  %1751 = vmatprep.subr.bf16.mxu1 %v11300_v22  ;;  %v12437_v22 = vrot.slane %v12115_v30, %v1191_v13 }
 0x13d   :  { %11115 = vmatprep.mubr.msk.bf16.mxu1 %vm526_vm2, %v493_v53 }
 0x13f   :  { %1752 = vmatpush1.bf16.msra.mxu1 %v11298_v23 }
 0x140   :  { %1753 = vmatprep.subr.bf16.mxu1 %v11303_v26 }
 0x143   :  { %1754 = vmatpush1.bf16.msra.mxu1 %v11301_v27 }
 0x144   :  { %11116 = vmatmul.mubr.msk.bf16.gmra.mxu1 %vm526_vm2, %v495_v31 }
 0x145   :  { %11119 = vmatprep.mubr.msk.bf16.mxu1 %vm526_vm2, %v497_v63 }
 0x14c   :  { %11120 = vmatmul.mubr.msk.bf16.gmra.mxu1 %vm526_vm2, %v969_v9 }
 0x14d   :  { %1771 = vmatprep.mubr.bf16.mxu1 %v15226_v29 }
 0x194   :  { %v11013_v33 = vpop.f32.mrf.mxu1 }
 0x196   :  { %v609_v34 = vpop.f32.mrf.mxu1 }
 0x197   :  { %v11053_v35 = vpop.f32.mrf.mxu0 }
 0x198   :  { %v11014_v38 = vpop.f32.mrf.mxu1  ;;  %v850_v18 = vadd.f32 %v11053_v35, %v11013_v33 }
 0x199   :  { %v841_v39 = vpop.f32.mrf.mxu0 }
 0x19a   :  { %v612_v40 = vpop.f32.mrf.mxu1  ;;  %v842_v20 = vadd.f32 %v841_v39, %v609_v34 }
 0x19b   :  { %v11054_v41 = vpop.f32.mrf.mxu0 }
 0x19c   :  { %v11017_v42 = vpop.f32.mrf.mxu1  ;;  %v853_v25 = vadd.f32 %v11054_v41, %v11014_v38 }
 0x19d   :  { %v844_v43 = vpop.f32.mrf.mxu0 }
 0x19e   :  { %v625_v44 = vpop.f32.mrf.mxu1  ;;  %v845_v32 = vadd.f32 %v844_v43, %v612_v40 }
 0x19f   :  { %v11057_v46 = vpop.f32.mrf.mxu0 }
 0x1a0   :  { %v12363_v45 = vpop.f32.mrf.mxu1  ;;  %v866_v33 = vadd.f32 %v11057_v46, %v11017_v42 }
 0x1a1   :  { %v857_v49 = vpop.f32.mrf.mxu0 }
 0x1a2   :  { %v12365_v47 = vpop.f32.mrf.mxu1  ;;  %v858_v39 = vadd.f32 %v857_v49, %v625_v44 }
 0x1a3   :  { %v11058_v52 = vpop.f32.mrf.mxu0 }
 0x1a4   :  { %v12367_v48 = vpop.f32.mrf.mxu1  ;;  %v869_v40 = vadd.f32 %v11058_v52, %v12363_v45  ;;  %v11309_v52 = vld [vmem:[%s15218_s3 + $0x164] ss:$8 sps:$4 sm:$0xff]  }
 0x1a5   :  { %v12377_v57 = vpop.f32.mrf.mxu0 }
 0x1a6   :  { %v12369_v50 = vpop.f32.mrf.mxu1  ;;  %v861_v44 = vadd.f32 %v12377_v57, %v12365_v47 }
 0x1a7   :  { %v12383_v61 = vpop.f32.mrf.mxu0 }
 0x1a8   :  { %v12371_v51 = vpop.f32.mrf.mxu1 }
 0x1a9   :  { %v12389_v63 = vpop.f32.mrf.mxu0 }
 0x1aa   :  { %v12373_v53 = vpop.f32.mrf.mxu1 }
 0x1ab   :  { %v12395_v16 = vpop.f32.mrf.mxu0 }
 0x1ac   :  { %v12375_v56 = vpop.f32.mrf.mxu1 }
 0x1ad   :  { %v12401_v54 = vpop.f32.mrf.mxu0 }
 0x1ae   :  { %v12379_v59 = vpop.f32.mrf.mxu1 }
 0x1af   :  { %v12407_v1 = vpop.f32.mrf.mxu0 }
 0x1b0   :  { %v12381_v60 = vpop.f32.mrf.mxu1 }
 0x1b1   :  { %v12413_v4 = vpop.f32.mrf.mxu0 }
 0x1b2   :  { %v12385_v62 = vpop.f32.mrf.mxu1 }
 0x1b3   :  { %v12419_v7 = vpop.f32.mrf.mxu0 }
 0x1b4   :  { %v12387_v31 = vpop.f32.mrf.mxu1 }
 0x1b5   :  { %v12425_v10 = vpop.f32.mrf.mxu0 }
 0x1b6   :  { %v12391_v58 = vpop.f32.mrf.mxu1 }
 0x1b7   :  { %v12432_v14 = vpop.f32.mrf.mxu0 }
 0x1b8   :  { %v12393_v15 = vpop.f32.mrf.mxu1 }
 0x1b9   :  { %v12439_v23 = vpop.f32.mrf.mxu0 }
 0x1ba   :  { %v12397_v36 = vpop.f32.mrf.mxu1 }
 0x1bc   :  { %v12399_v37 = vpop.f32.mrf.mxu1 }
 0x1be   :  { %v12403_v55 = vpop.f32.mrf.mxu1 }
 0x1c0   :  { %v12405_v0 = vpop.f32.mrf.mxu1 }
 0x1c2   :  { %v12409_v2 = vpop.f32.mrf.mxu1 }
 0x1c4   :  { %v12411_v3 = vpop.f32.mrf.mxu1 }
 0x1c6   :  { %v12415_v5 = vpop.f32.mrf.mxu1 }
 0x1c8   :  { %v12417_v6 = vpop.f32.mrf.mxu1 }
 0x1ca   :  { %v12421_v8 = vpop.f32.mrf.mxu1 }
 0x1cc   :  { %v12423_v9 = vpop.f32.mrf.mxu1 }
 0x1ce   :  { %v12427_v11 = vpop.f32.mrf.mxu1 }
 0x1d0   :  { %v12429_v12 = vpop.f32.mrf.mxu1 }
 0x1d1   :  { %15232 = vst [vmem:[#allocation3_spill] sm:$0xff] %v12429_v12  ;;  %v12442_v12 = vpop.f32.mrf.mxu0 }
 0x1d2   :  { %v12434_v17 = vpop.f32.mrf.mxu1 }
 0x1d3   :  { %15233 = vst [vmem:[#allocation4_spill] sm:$0xff] %v12434_v17  ;;  %v12448_v43 = vpop.f32.mrf.mxu0 }
 0x1d4   :  { %v11093_v19 = vpop.f32.mrf.mxu1 }
 0x1d5   :  { %v1159_v21 = vadd.f32 %v11093_v19, %v850_v18 }
 0x1d6   :  { %v1030_v24 = vpop.f32.mrf.mxu1 }
 0x1d7   :  { %v1157_v26 = vadd.f32 %v1030_v24, %v842_v20  ;;  %v1195_v29 = vadd.f32 %v12437_v22, %v1159_v21 }
 0x1d8   :  { %v11094_v27 = vpop.f32.mrf.mxu1 }
 0x1d9   :  { %v1160_v28 = vadd.f32 %v11094_v27, %v853_v25  ;;  %v1193_v34 = vadd.f32 %v12437_v22, %v1157_v26  ;;  %v1227_v18 = vmax.f32 %v1195_v29, 0.0  ;;  %v11304_v29 = vld [vmem:[%s15218_s3 + $0x170] ss:$8 sps:$4 sm:$0xff]   ;;  %v882_v25 = vadd.f32 %v12383_v61, %v12367_v48  ;;  %v12463_v26 = vpop.f32.mrf.mxu0 }
 0x1da   :  { %v1033_v17 = vpop.f32.mrf.mxu1  ;;  %v15234_v61 = vmov 0  }
 0x1db   :  { %v1196_v35 = vadd.f32 %v12437_v22, %v1160_v28  ;;  %v1158_v30 = vadd.f32 %v1033_v17, %v845_v32  ;;  %v1225_v21 = vmax.f32 %v1193_v34, 0.0 }
 0x1dc   :  { %v11097_v13 = vpop.f32.mrf.mxu1 }
 0x1dd   :  { %v1228_v19 = vmax.f32 %v1196_v35, 0.0  ;;  %v1194_v38 = vadd.f32 %v12437_v22, %v1158_v30  ;;  %v1163_v41 = vadd.f32 %v11097_v13, %v866_v33  ;;  %v874_v35 = vadd.f32 %v12389_v63, %v12369_v50  ;;  %v11312_v50 = vld [vmem:[%s15218_s3 + $0x154] ss:$8 sps:$4 sm:$0xff]  }
 0x1de   :  { %v1046_v20 = vpop.f32.mrf.mxu1  ;;  %v885_v63 = vadd.f32 %v12395_v16, %v12371_v51  ;;  %v877_v51 = vadd.f32 %v12401_v54, %v12373_v53  ;;  %v890_v54 = vadd.f32 %v12413_v4, %v12379_v59  ;;  %v11318_v59 = vld [vmem:[%s15218_s3 + $0x134] ss:$8 sps:$4 sm:$0xff]   ;;  %v901_v4 = vadd.f32 %v12419_v7, %v12381_v60  ;;  %v11316_v60 = vld [vmem:[%s15218_s3 + $0x130] ss:$8 sps:$4 sm:$0xff]  }
 0x1df   :  { %v1226_v24 = vmax.f32 %v1194_v38, 0.0  ;;  %v1161_v42 = vadd.f32 %v1046_v20, %v858_v39  ;;  %v12450_v46 = vpack.c.bf16 %v1228_v19, %v1227_v18  ;;  %v1199_v28 = vadd.f32 %v12437_v22, %v1163_v41  ;;  %v11307_v39 = vld [vmem:[%s15218_s3 + $0x160] ss:$8 sps:$4 sm:$0xff]   ;;  %v12484_v41 = vpop.f32.mrf.mxu0 }
 0x1e0   :  { %v11098_v17 = vpop.f32.mrf.mxu1  ;;  %v893_v7 = vadd.f32 %v12425_v10, %v12385_v62  ;;  %v906_v10 = vadd.f32 %v12439_v23, %v12391_v58  ;;  %v11324_v58 = vld [vmem:[%s15218_s3 + $0x114] ss:$8 sps:$4 sm:$0xff]   ;;  %v917_v23 = vadd.f32 %v12442_v12, %v12393_v15  ;;  %v11322_v15 = vld [vmem:[%s15218_s3 + $0x110] ss:$8 sps:$4 sm:$0xff]   ;;  %v909_v12 = vadd.f32 %v12448_v43, %v12397_v36 }
 0x1e1   :  { %v1257_v49 = vpack.c.bf16 %v1226_v24, %v1225_v21  ;;  %v1164_v45 = vadd.f32 %v11098_v17, %v869_v40  ;;  %v1197_v27 = vadd.f32 %v12437_v22, %v1161_v42  ;;  %v1338_v57 = vrot.slane %v12450_v46, 4 }
 0x1e2   :  { %v1049_v32 = vpop.f32.mrf.mxu1  ;;  %v1231_v30 = vmax.f32 %v1199_v28, 0.0  ;;  %v922_v43 = vadd.f32 %v12484_v41, %v12403_v55 }
 0x1e3   :  { %v1337_v33 = vrot.slane %v1257_v49, 4  ;;  %v1200_v34 = vadd.f32 %v12437_v22, %v1164_v45  ;;  %v1162_v47 = vadd.f32 %v1049_v32, %v861_v44  ;;  %1499 = vmatmul.mubr.bf16.vlgmr.msra.gmra.mxu0 %v1257_v49  ;;  %v1229_v20 = vmax.f32 %v1197_v27, 0.0  ;;  %v11315_v49 = vld [vmem:[%s15218_s3 + $0x144] ss:$8 sps:$4 sm:$0xff]  }
 0x1e4   :  { %2016 = vmatpush1.bf16.msra.mxu0 %v11304_v29  ;;  %v11101_v48 = vpop.f32.mrf.mxu1  ;;  %1508 = vmatprep.mubr.bf16.mxu0 %v15234_v61  ;;  %v11310_v29 = vld [vmem:[%s15218_s3 + $0x150] ss:$8 sps:$4 sm:$0xff]   ;;  %v898_v45 = vadd.f32 %v12407_v1, %v12375_v56  ;;  %v11313_v1 = vld [vmem:[%s15218_s3 + $0x140] ss:$8 sps:$4 sm:$0xff]  }
 0x1e5   :  { %v1232_v13 = vmax.f32 %v1200_v34, 0.0  ;;  %v1198_v18 = vadd.f32 %v12437_v22, %v1162_v47  ;;  %v1167_v19 = vadd.f32 %v11101_v48, %v882_v25  ;;  %9355 = vmatmul.mubr.msk.bf16.vlgmr.msra.gmra.mxu1 %vm9354_vm4, %v1337_v33  ;;  %v12477_v38 = vsel %vm466_vm3, %v1337_v33, %v1338_v57  ;;  %2017 = vmatprep.subr.bf16.mxu0 %v11309_v52  ;;  %v12500_v52 = vpop.f32.mrf.mxu0 }
 0x1e6   :  { %v1062_v40 = vpop.f32.mrf.mxu1  ;;  %1781 = vmatprep.mubr.bf16.mxu1 %v15234_v61  ;;  %v933_v55 = vadd.f32 %v12500_v52, %v12405_v0 }
 0x1e7   :  { %v1230_v21 = vmax.f32 %v1198_v18, 0.0  ;;  %v1165_v24 = vadd.f32 %v1062_v40, %v874_v35  ;;  %v12487_v42 = vpack.c.bf16 %v1232_v13, %v1231_v30  ;;  %v1203_v28 = vadd.f32 %v12437_v22, %v1167_v19 }
 0x1e8   :  { %v11102_v17 = vpop.f32.mrf.mxu1  ;;  %2018 = vmatpush1.bf16.msra.mxu0 %v11307_v39  ;;  %v12522_v39 = vpop.f32.mrf.mxu0 }
 0x1e9   :  { %v1168_v16 = vadd.f32 %v11102_v17, %v885_v63  ;;  %v1259_v44 = vpack.c.bf16 %v1230_v21, %v1229_v20  ;;  %2019 = vmatprep.subr.bf16.mxu0 %v11312_v50  ;;  %v1201_v27 = vadd.f32 %v12437_v22, %v1165_v24  ;;  %v1235_v34 = vmax.f32 %v1203_v28, 0.0  ;;  %v11321_v28 = vld [vmem:[%s15218_s3 + $0x124] ss:$8 sps:$4 sm:$0xff]  }
 0x1ea   :  { %v1065_v25 = vpop.f32.mrf.mxu1  ;;  %v1342_v56 = vrot.slane %v12487_v42, 4  ;;  %v12541_v17 = vpop.f32.mrf.mxu0 }
 0x1eb   :  { %v1204_v32 = vadd.f32 %v12437_v22, %v1168_v16  ;;  %v1166_v33 = vadd.f32 %v1065_v25, %v877_v51  ;;  %1509 = vmatmul.mubr.bf16.gmra.mxu0 %v12450_v46  ;;  %v1340_v53 = vrot.slane %v1259_v44, 4  ;;  %v1233_v19 = vmax.f32 %v1201_v27, 0.0 }
 0x1ec   :  { %v11105_v47 = vpop.f32.mrf.mxu1  ;;  %1518 = vmatprep.mubr.bf16.mxu0 %v15234_v61  ;;  %2020 = vmatpush1.bf16.msra.mxu0 %v11310_v29  ;;  %v914_v16 = vadd.f32 %v12432_v14, %v12387_v31  ;;  %v11319_v31 = vld [vmem:[%s15218_s3 + $0x120] ss:$8 sps:$4 sm:$0xff]  }
 0x1ed   :  { %v1236_v35 = vmax.f32 %v1204_v32, 0.0  ;;  %v1202_v30 = vadd.f32 %v12437_v22, %v1166_v33  ;;  %v1171_v48 = vadd.f32 %v11105_v47, %v898_v45  ;;  %1782 = vmatmul.mubr.bf16.gmra.mxu1 %v12477_v38  ;;  %v12515_v46 = vsel %vm466_vm3, %v1338_v57, %v1340_v53  ;;  %2021 = vmatprep.subr.bf16.mxu0 %v11315_v49 }
 0x1ee   :  { %v1078_v13 = vpop.f32.mrf.mxu1  ;;  %1791 = vmatprep.mubr.bf16.mxu1 %v15234_v61  ;;  %v12526_v18 = vsel %vm466_vm3, %v1340_v53, %v1342_v56 }
 0x1ef   :  { %v1234_v50 = vmax.f32 %v1202_v30, 0.0  ;;  %v1169_v57 = vadd.f32 %v1078_v13, %v890_v54  ;;  %v12528_v63 = vpack.c.bf16 %v1236_v35, %v1235_v34  ;;  %v1207_v40 = vadd.f32 %v12437_v22, %v1171_v48  ;;  %v937_v54 = vpop.f32.mrf.mxu0 }
 0x1f0   :  { %v11106_v20 = vpop.f32.mrf.mxu1  ;;  %2022 = vmatpush1.bf16.msra.mxu0 %v11313_v1 }
 0x1f1   :  { %v1172_v21 = vadd.f32 %v11106_v20, %v901_v4  ;;  %v12536_v24 = vpack.c.bf16 %v1234_v50, %v1233_v19  ;;  %2023 = vmatprep.subr.bf16.mxu0 %v11318_v59  ;;  %v1205_v29 = vadd.f32 %v12437_v22, %v1169_v57  ;;  %v1239_v25 = vmax.f32 %v1207_v40, 0.0  ;;  %v11327_v50 = vld [vmem:[%s15218_s3 + $0x104] ss:$8 sps:$4 sm:$0xff]   ;;  %v11078_v57 = vpop.f32.mrf.mxu0 }
 0x1f2   :  { %v1081_v51 = vpop.f32.mrf.mxu1  ;;  %v1346_v32 = vrot.slane %v12528_v63, 4  ;;  %v930_v20 = vadd.f32 %v12463_v26, %v12399_v37  ;;  %v11325_v37 = vld [vmem:[%s15218_s3 + $0x100] ss:$8 sps:$4 sm:$0xff]  }
 0x1f3   :  { %v1208_v49 = vadd.f32 %v12437_v22, %v1172_v21  ;;  %v1170_v45 = vadd.f32 %v1081_v51, %v893_v7  ;;  %1519 = vmatmul.mubr.bf16.gmra.mxu0 %v1259_v44  ;;  %v1344_v62 = vrot.slane %v12536_v24, 4  ;;  %v1237_v34 = vmax.f32 %v1205_v29, 0.0  ;;  %v940_v41 = vpop.f32.mrf.mxu0 }
 0x1f4   :  { %v11109_v27 = vpop.f32.mrf.mxu1  ;;  %1528 = vmatprep.mubr.bf16.mxu0 %v15234_v61  ;;  %2024 = vmatpush1.bf16.msra.mxu0 %v11316_v60 }
 0x1f5   :  { %v1240_v14 = vmax.f32 %v1208_v49, 0.0  ;;  %v1206_v33 = vadd.f32 %v12437_v22, %v1170_v45  ;;  %v1175_v44 = vadd.f32 %v11109_v27, %v914_v16  ;;  %1792 = vmatmul.mubr.bf16.gmra.mxu1 %v12515_v46  ;;  %v12558_v53 = vsel %vm466_vm3, %v1342_v56, %v1344_v62  ;;  %2025 = vmatprep.subr.bf16.mxu0 %v11321_v28 }
 0x1f6   :  { %v1094_v47 = vpop.f32.mrf.mxu1  ;;  %1801 = vmatprep.mubr.bf16.mxu1 %v15234_v61  ;;  %v12567_v1 = vsel %vm466_vm3, %v1344_v62, %v1346_v32 }
 0x1f7   :  { %v1238_v35 = vmax.f32 %v1206_v33, 0.0  ;;  %v1211_v56 = vadd.f32 %v12437_v22, %v1175_v44  ;;  %v1173_v30 = vadd.f32 %v1094_v47, %v906_v10  ;;  %v12570_v48 = vpack.c.bf16 %v1240_v14, %v1239_v25  ;;  %v11081_v44 = vpop.f32.mrf.mxu0 }
 0x1f8   :  { %v11110_v59 = vpop.f32.mrf.mxu1  ;;  %2026 = vmatpush1.bf16.msra.mxu0 %v11319_v31  ;;  %v925_v14 = vadd.f32 %v12522_v39, %v12409_v2 }
 0x1f9   :  { %v1209_v4 = vadd.f32 %v12437_v22, %v1173_v30  ;;  %v1176_v13 = vadd.f32 %v11110_v59, %v917_v23  ;;  %v12578_v19 = vpack.c.bf16 %v1238_v35, %v1237_v34  ;;  %2027 = vmatprep.subr.bf16.mxu0 %v11324_v58  ;;  %v1243_v21 = vmax.f32 %v1211_v56, 0.0 }
 0x1fa   :  { %v1097_v40 = vpop.f32.mrf.mxu1  ;;  %v1350_v29 = vrot.slane %v12570_v48, 4  ;;  %v946_v23 = vadd.f32 %v12541_v17, %v12411_v3  ;;  %v938_v56 = vadd.f32 %v937_v54, %v12415_v5  ;;  %v953_v17 = vpop.f32.mrf.mxu0 }
 0x1fb   :  { %v1212_v60 = vadd.f32 %v12437_v22, %v1176_v13  ;;  %v1174_v7 = vadd.f32 %v1097_v40, %v909_v12  ;;  %1529 = vmatmul.mubr.bf16.gmra.mxu0 %v12487_v42  ;;  %v1348_v36 = vrot.slane %v12578_v19, 4  ;;  %v1241_v49 = vmax.f32 %v1209_v4, 0.0 }
 0x1fc   :  { %v11113_v28 = vpop.f32.mrf.mxu1  ;;  %1538 = vmatprep.mubr.bf16.mxu0 %v15234_v61  ;;  %2028 = vmatpush1.bf16.msra.mxu0 %v11322_v15 }
 0x1fd   :  { %v1244_v26 = vmax.f32 %v1212_v60, 0.0  ;;  %v1210_v51 = vadd.f32 %v12437_v22, %v1174_v7  ;;  %v1179_v42 = vadd.f32 %v11113_v28, %v930_v20  ;;  %1802 = vmatmul.mubr.bf16.gmra.mxu1 %v12526_v18  ;;  %v12598_v16 = vsel %vm466_vm3, %v1346_v32, %v1348_v36  ;;  %2029 = vmatprep.subr.bf16.mxu0 %v11327_v50 }
 0x1fe   :  { %v1110_v45 = vpop.f32.mrf.mxu1  ;;  %1811 = vmatprep.mubr.bf16.mxu1 %v15234_v61  ;;  %v12604_v62 = vsel %vm466_vm3, %v1348_v36, %v1350_v29  ;;  %v941_v7 = vadd.f32 %v940_v41, %v12421_v8  ;;  %v962_v28 = vadd.f32 %v11081_v44, %v12423_v9 }
 0x1ff   :  { %v1242_v10 = vmax.f32 %v1210_v51, 0.0  ;;  %v1215_v25 = vadd.f32 %v12437_v22, %v1179_v42  ;;  %v1177_v27 = vadd.f32 %v1110_v45, %v922_v43  ;;  %v12607_v31 = vpack.c.bf16 %v1244_v26, %v1243_v21  ;;  %v11082_v43 = vpop.f32.mrf.mxu0 }
 0x200   :  { %v11114_v32 = vpop.f32.mrf.mxu1  ;;  %2030 = vmatpush1.bf16.msra.mxu0 %v11325_v37  ;;  %v954_v51 = vadd.f32 %v953_v17, %v12427_v11 }
 0x201   :  { %v1213_v0 = vadd.f32 %v12437_v22, %v1177_v27  ;;  %v1180_v52 = vadd.f32 %v11114_v32, %v933_v55  ;;  %v12612_v33 = vpack.c.bf16 %v1242_v10, %v1241_v49  ;;  %v1247_v2 = vmax.f32 %v1215_v25, 0.0 }
 0x202   :  { %v1113_v58 = vpop.f32.mrf.mxu1  ;;  %v1354_v30 = vrot.slane %v12607_v31, 4 }
 0x203   :  { %v1216_v34 = vadd.f32 %v12437_v22, %v1180_v52  ;;  %v1178_v47 = vadd.f32 %v1113_v58, %v925_v14  ;;  %1539 = vmatmul.mubr.bf16.gmra.mxu0 %v12536_v24  ;;  %v1352_v35 = vrot.slane %v12612_v33, 4  ;;  %v949_v24 = vadd.f32 %v11078_v57, %v12417_v6  ;;  %v15235_v52 = vld [vmem:[#allocation3_spill] sm:$0xff] }
 0x204   :  { %v11117_v39 = vpop.f32.mrf.mxu1  ;;  %1548 = vmatprep.mubr.bf16.mxu0 %v15234_v61  ;;  %v1245_v4 = vmax.f32 %v1213_v0, 0.0  ;;  %v965_v44 = vadd.f32 %v11082_v43, %v15235_v52  ;;  %v11334_v43 = vld [vmem:[%s15219_s4 + $0x60] sm:$0xff]   ;;  %v11352_v52 = vld [vmem:[%s15219_s4 + $0xf8] sm:$0xff]  }
 0x205   :  { %v1248_v59 = vmax.f32 %v1216_v34, 0.0  ;;  %v1214_v15 = vadd.f32 %v12437_v22, %v1178_v47  ;;  %v1183_v12 = vadd.f32 %v11117_v39, %v946_v23  ;;  %1812 = vmatmul.mubr.bf16.gmra.mxu1 %v12558_v53  ;;  %v12625_v3 = vsel %vm466_vm3, %v1350_v29, %v1352_v35  ;;  %v15236_v23 = vld [vmem:[#allocation4_spill] sm:$0xff] }
 0x206   :  { %v1126_v5 = vpop.f32.mrf.mxu1  ;;  %1821 = vmatprep.mubr.bf16.mxu1 %v15234_v61  ;;  %v12630_v54 = vsel %vm466_vm3, %v1352_v35, %v1354_v30 }
 0x207   :  { %v1246_v13 = vmax.f32 %v1214_v15, 0.0  ;;  %v1219_v50 = vadd.f32 %v12437_v22, %v1183_v12  ;;  %v1181_v40 = vadd.f32 %v1126_v5, %v938_v56  ;;  %v12633_v20 = vpack.c.bf16 %v1248_v59, %v1247_v2 }
 0x208   :  { %v11118_v60 = vpop.f32.mrf.mxu1 }
 0x209   :  { %v1217_v36 = vadd.f32 %v12437_v22, %v1181_v40  ;;  %v1184_v6 = vadd.f32 %v11118_v60, %v949_v24  ;;  %v12637_v57 = vpack.c.bf16 %v1246_v13, %v1245_v4  ;;  %v1251_v42 = vmax.f32 %v1219_v50, 0.0 }
 0x20a   :  { %v1129_v21 = vpop.f32.mrf.mxu1  ;;  %v1358_v55 = vrot.slane %v12633_v20, 4 }
 0x20b   :  { %v1220_v29 = vadd.f32 %v12437_v22, %v1184_v6  ;;  %v1182_v37 = vadd.f32 %v1129_v21, %v941_v7  ;;  %1549 = vmatmul.mubr.bf16.gmra.mxu0 %v12528_v63  ;;  %v1356_v26 = vrot.slane %v12637_v57, 4  ;;  %v956_v63 = vpop.f32.mrf.mxu0  ;;  %v1249_v10 = vmax.f32 %v1217_v36, 0.0  ;;  %v11331_v7 = vld [vmem:[%s15219_s4 + $0x30] sm:$0xff]   ;;  %v11333_v6 = vld [vmem:[%s15219_s4 + $0x28] sm:$0xff]   ;;  %v11335_v21 = vld [vmem:[%s15219_s4 + $0x20] sm:$0xff]  }
 0x20c   :  { %v11121_v8 = vpop.f32.mrf.mxu1  ;;  %1558 = vmatprep.mubr.bf16.mxu0 %v15234_v61  ;;  %v957_v34 = vadd.f32 %v956_v63, %v15236_v23 }
 0x20d   :  { %v1252_v41 = vmax.f32 %v1220_v29, 0.0  ;;  %v1218_v49 = vadd.f32 %v12437_v22, %v1182_v37  ;;  %v1187_v45 = vadd.f32 %v11121_v8, %v962_v28  ;;  %1822 = vmatmul.mubr.bf16.gmra.mxu1 %v12567_v1  ;;  %v12649_v9 = vsel %vm466_vm3, %v1354_v30, %v1356_v26  ;;  %v11336_v28 = vld [vmem:[%s15219_s4 + $0x58] sm:$0xff]  }
 0x20e   :  { %v1142_v25 = vpop.f32.mrf.mxu1  ;;  %1831 = vmatprep.mubr.bf16.mxu1 %v15234_v61  ;;  %v12653_v11 = vsel %vm466_vm3, %v1356_v26, %v1358_v55  ;;  %v11337_v29 = vld [vmem:[%s15219_s4 + $0x18] sm:$0xff]   ;;  %v11347_v26 = vld [vmem:[%s15219_s4 + $0x230] sm:$0xff]  }
 0x20f   :  { %v1270_v27 = vpack.c.bf16 %v1252_v41, %v1251_v42  ;;  %v1250_v32 = vmax.f32 %v1218_v49, 0.0  ;;  %v1223_v14 = vadd.f32 %v12437_v22, %v1187_v45  ;;  %v1185_v0 = vadd.f32 %v1142_v25, %v954_v51  ;;  %v11345_v37 = vld [vmem:[%s15219_s4 + $0x238] sm:$0xff]   ;;  %v11349_v41 = vld [vmem:[%s15219_s4 + $0x228] sm:$0xff]   ;;  %v11351_v25 = vld [vmem:[%s15219_s4 + $0x220] sm:$0xff]  }
 0x210   :  { %v11122_v58 = vpop.f32.mrf.mxu1 }
 0x211   :  { %v1269_v47 = vpack.c.bf16 %v1250_v32, %v1249_v10  ;;  %v1221_v35 = vadd.f32 %v12437_v22, %v1185_v0  ;;  %v1188_v56 = vadd.f32 %v11122_v58, %v965_v44  ;;  %v1362_v39 = vrot.slane %v1270_v27, 4  ;;  %v11350_v10 = vld [vmem:[%s15219_s4 + $0x260] sm:$0xff]   ;;  %v11353_v44 = vld [vmem:[%s15219_s4 + $0x258] sm:$0xff]  }
 0x212   :  { %v1145_v2 = vpop.f32.mrf.mxu1  ;;  %v1255_v4 = vmax.f32 %v1223_v14, 0.0 }
 0x213   :  { %v1186_v30 = vadd.f32 %v1145_v2, %v957_v34  ;;  %1559 = vmatmul.mubr.bf16.gmra.mxu0 %v12578_v19  ;;  %v1360_v59 = vrot.slane %v1269_v47, 4  ;;  %v1224_v15 = vadd.f32 %v12437_v22, %v1188_v56  ;;  %v1253_v19 = vmax.f32 %v1221_v35, 0.0  ;;  %v11357_v35 = vld [vmem:[%s15219_s4 + $0x250] sm:$0xff]  }
 0x214   :  { %1568 = vmatprep.mubr.bf16.mxu0 %v15234_v61  ;;  %v11359_v2 = vld [vmem:[%s15219_s4 + $0x210] sm:$0xff]  }
 0x215   :  { %v1222_v12 = vadd.f32 %v12437_v22, %v1186_v30  ;;  %1832 = vmatmul.mubr.bf16.gmra.mxu1 %v12598_v16  ;;  %v12665_v24 = vsel %vm466_vm3, %v1358_v55, %v1360_v59  ;;  %v12668_v17 = vsel %vm466_vm3, %v1360_v59, %v1362_v39  ;;  %v1256_v5 = vmax.f32 %v1224_v15, 0.0  ;;  %v11348_v55 = vld [vmem:[%s15219_s4 + $0x268] sm:$0xff]  }
 0x216   :  { %1841 = vmatprep.mubr.bf16.mxu1 %v15234_v61 }
 0x217   :  { %v1254_v13 = vmax.f32 %v1222_v12, 0.0  ;;  %v12671_v50 = vpack.c.bf16 %v1256_v5, %v1255_v4  ;;  %v11361_v12 = vld [vmem:[%s15219_s4 + $0x248] sm:$0xff]  }
 0x218   :  { %v11363_v4 = vld [vmem:[%s15219_s4 + $0x208] sm:$0xff]  }
 0x219   :  { %v1271_v40 = vpack.c.bf16 %v1254_v13, %v1253_v19  ;;  %v1366_v36 = vrot.slane %v12671_v50, 4 }
 0x21b   :  { %1569 = vmatmul.mubr.bf16.gmra.mxu0 %v12570_v48  ;;  %v1364_v22 = vrot.slane %v1271_v40, 4  ;;  %v11328_v48 = vld [vmem:[%s15219_s4 + $0x78] sm:$0xff]  }
 0x21c   :  { %1578 = vmatprep.mubr.bf16.mxu0 %v15234_v61  ;;  %10176 = vmatprep.subr.bf16.mxu1 %v11328_v48  ;;  %v11367_v48 = vld [vmem:[%s15219_s4 + $0x200] sm:$0xff]  }
 0x21d   :  { %1842 = vmatmul.mubr.bf16.gmra.mxu1 %v12604_v62  ;;  %v12677_v60 = vsel %vm466_vm3, %v1362_v39, %v1364_v22 }
 0x21e   :  { %1851 = vmatprep.mubr.bf16.mxu1 %v15234_v61 }
 0x223   :  { %1579 = vmatmul.mubr.bf16.gmra.mxu0 %v12612_v33  ;;  %v11329_v33 = vld [vmem:[%s15219_s4 + $0x38] sm:$0xff]  }
 0x224   :  { %1588 = vmatprep.mubr.bf16.mxu0 %v15234_v61  ;;  %10177 = vmatpush3.bf16.msra.mxu1 %v11329_v33 }
 0x225   :  { %1852 = vmatmul.mubr.bf16.gmra.mxu1 %v12625_v3 }
 0x226   :  { %1861 = vmatprep.mubr.bf16.mxu1 %v15234_v61 }
 0x22b   :  { %1589 = vmatmul.mubr.bf16.gmra.mxu0 %v12607_v31  ;;  %v11330_v31 = vld [vmem:[%s15219_s4 + $0x70] sm:$0xff]  }
 0x22c   :  { %1598 = vmatprep.mubr.bf16.mxu0 %v15234_v61  ;;  %10178 = vmatprep.subr.bf16.mxu1 %v11330_v31 }
 0x22d   :  { %1862 = vmatmul.mubr.bf16.gmra.mxu1 %v12630_v54 }
 0x22e   :  { %1871 = vmatprep.mubr.bf16.mxu1 %v15234_v61  ;;  %10179 = vmatpush3.bf16.msra.mxu1 %v11331_v7 }
 0x233   :  { %1599 = vmatmul.mubr.bf16.gmra.mxu0 %v12637_v57  ;;  %v12728_v57 = vsel %vm466_vm3, %v1364_v22, %v1366_v36 }
 0x234   :  { %1608 = vmatprep.mubr.bf16.mxu0 %v15234_v61 }
 0x235   :  { %1872 = vmatmul.mubr.bf16.gmra.mxu1 %v12649_v9 }
 0x236   :  { %1881 = vmatprep.mubr.bf16.mxu1 %v15234_v61 }
 0x23b   :  { %1609 = vmatmul.mubr.bf16.gmra.mxu0 %v12633_v20  ;;  %v11332_v20 = vld [vmem:[%s15219_s4 + $0x68] sm:$0xff]  }
 0x23c   :  { %1618 = vmatprep.mubr.bf16.mxu0 %v15234_v61  ;;  %10180 = vmatprep.subr.bf16.mxu1 %v11332_v20 }
 0x23d   :  { %1882 = vmatmul.mubr.bf16.gmra.mxu1 %v12653_v11 }
 0x23e   :  { %1891 = vmatprep.mubr.bf16.mxu1 %v15234_v61  ;;  %10181 = vmatpush3.bf16.msra.mxu1 %v11333_v6  ;;  %v11369_v6 = vld [vmem:[%s15219_s4 + $0x378] sm:$0xff]  }
 0x23f   :  { %10182 = vmatprep.subr.bf16.mxu1 %v11334_v43 }
 0x242   :  { %10183 = vmatpush3.bf16.msra.mxu1 %v11335_v21 }
 0x243   :  { %1619 = vmatmul.mubr.bf16.gmra.mxu0 %v1269_v47  ;;  %10184 = vmatprep.subr.bf16.mxu1 %v11336_v28 }
 0x244   :  { %1628 = vmatprep.mubr.bf16.mxu0 %v15234_v61 }
 0x245   :  { %1892 = vmatmul.mubr.bf16.gmra.mxu1 %v12665_v24 }
 0x246   :  { %1901 = vmatprep.mubr.bf16.mxu1 %v15234_v61  ;;  %10185 = vmatpush3.bf16.msra.mxu1 %v11337_v29 }
 0x24b   :  { %1629 = vmatmul.mubr.bf16.gmra.mxu0 %v1270_v27 }
 0x24c   :  { %1638 = vmatprep.mubr.bf16.mxu0 %v15234_v61 }
 0x24d   :  { %1902 = vmatmul.mubr.bf16.gmra.mxu1 %v12668_v17 }
 0x24e   :  { %1911 = vmatprep.mubr.bf16.mxu1 %v15234_v61 }
 0x253   :  { %1639 = vmatmul.mubr.bf16.gmra.mxu0 %v1271_v40  ;;  %v11365_v40 = vld [vmem:[%s15219_s4 + $0x240] sm:$0xff]  }
 0x254   :  { %1648 = vmatprep.mubr.bf16.mxu0 %v15234_v61 }
 0x255   :  { %1912 = vmatmul.mubr.bf16.gmra.mxu1 %v12677_v60 }
 0x256   :  { %1921 = vmatprep.mubr.bf16.mxu1 %v15234_v61 }
 0x25b   :  { %1649 = vmatmul.mubr.bf16.gmra.mxu0 %v12671_v50 }
 0x25c   :  { %2047 = vmatprep.mubr.bf16.mxu0 %v15234_v61 }
 0x25d   :  { %1922 = vmatmul.mubr.bf16.gmra.mxu1 %v12728_v57 }
 0x263   :  { %2048 = vmatmul.mubr.bf16.vlgmr.msra.gmra.mxu0 %v12477_v38  ;;  %v11338_v38 = vld [vmem:[%s15219_s4 + $0x50] sm:$0xff]  }
 0x264   :  { %2057 = vmatprep.mubr.bf16.mxu0 %v15234_v61  ;;  %10186 = vmatprep.subr.bf16.mxu1 %v11338_v38 }
 0x26b   :  { %2058 = vmatmul.mubr.bf16.gmra.mxu0 %v12515_v46  ;;  %v11339_v46 = vld [vmem:[%s15219_s4 + $0x10] sm:$0xff]  }
 0x26c   :  { %2067 = vmatprep.mubr.bf16.mxu0 %v15234_v61  ;;  %10187 = vmatpush3.bf16.msra.mxu1 %v11339_v46 }
 0x273   :  { %2068 = vmatmul.mubr.bf16.gmra.mxu0 %v12526_v18  ;;  %v11340_v18 = vld [vmem:[%s15219_s4 + $0x48] sm:$0xff]  }
 0x274   :  { %2077 = vmatprep.mubr.bf16.mxu0 %v15234_v61  ;;  %10188 = vmatprep.subr.bf16.mxu1 %v11340_v18 }
 0x27b   :  { %2078 = vmatmul.mubr.bf16.gmra.mxu0 %v12558_v53  ;;  %v11341_v53 = vld [vmem:[%s15219_s4 + $0x8] sm:$0xff]  }
 0x27c   :  { %2087 = vmatprep.mubr.bf16.mxu0 %v15234_v61  ;;  %10189 = vmatpush3.bf16.msra.mxu1 %v11341_v53 }
 0x283   :  { %2088 = vmatmul.mubr.bf16.gmra.mxu0 %v12567_v1  ;;  %v11343_v1 = vld [vmem:[%s15219_s4 + $0x278] sm:$0xff]  }
 0x284   :  { %2097 = vmatprep.mubr.bf16.mxu0 %v15234_v61  ;;  %10264 = vmatprep.subr.bf16.mxu0 %v11343_v1 }
 0x285   :  { %10265 = vmatpush3.bf16.msra.mxu0 %v11345_v37 }
 0x28b   :  { %2098 = vmatmul.mubr.bf16.gmra.mxu0 %v12598_v16  ;;  %v11342_v16 = vld [vmem:[%s15219_s4 + $0x40] sm:$0xff]  }
 0x28c   :  { %2107 = vmatprep.mubr.bf16.mxu0 %v15234_v61  ;;  %10190 = vmatprep.subr.bf16.mxu1 %v11342_v16 }
 0x293   :  { %2108 = vmatmul.mubr.bf16.gmra.mxu0 %v12604_v62  ;;  %v11344_v62 = vld [vmem:[%s15219_s4] sm:$0xff]  }
 0x294   :  { %2117 = vmatprep.mubr.bf16.mxu0 %v15234_v61  ;;  %10191 = vmatpush3.bf16.msra.mxu1 %v11344_v62 }
 0x295   :  { %10198 = vmatprep.subr.bf16.mxu1 %v11352_v52 }
 0x29b   :  { %2118 = vmatmul.mubr.bf16.gmra.mxu0 %v12625_v3  ;;  %v11346_v3 = vld [vmem:[%s15219_s4 + $0x270] sm:$0xff]  }
 0x29c   :  { %2127 = vmatprep.mubr.bf16.mxu0 %v15234_v61  ;;  %10266 = vmatprep.subr.bf16.mxu0 %v11346_v3 }
 0x29d   :  { %10267 = vmatpush3.bf16.msra.mxu0 %v11347_v26 }
 0x29e   :  { %10268 = vmatprep.subr.bf16.mxu0 %v11348_v55 }
 0x2a1   :  { %10269 = vmatpush3.bf16.msra.mxu0 %v11349_v41 }
 0x2a2   :  { %10270 = vmatprep.subr.bf16.mxu0 %v11350_v10 }
 0x2a3   :  { %v12790_v51 = vpop.f32.mrf.mxu0  ;;  %2128 = vmatmul.mubr.bf16.gmra.mxu0 %v12630_v54 }
 0x2a4   :  { %2137 = vmatprep.mubr.bf16.mxu0 %v15234_v61 }
 0x2a5   :  { %v12794_v42 = vpop.f32.mrf.mxu0  ;;  %v12796_v8 = vpop.f32.mrf.mxu1  ;;  %10271 = vmatpush3.bf16.msra.mxu0 %v11351_v25 }
 0x2a6   :  { %10272 = vmatprep.subr.bf16.mxu0 %v11353_v44 }
 0x2a7   :  { %v12804_v49 = vpop.f32.mrf.mxu0  ;;  %v12806_v45 = vpop.f32.mrf.mxu1 }
 0x2a9   :  { %v12808_v54 = vpop.f32.mrf.mxu0  ;;  %v12810_v63 = vpop.f32.mrf.mxu1 }
 0x2ab   :  { %v12818_v27 = vpop.f32.mrf.mxu0  ;;  %v12820_v32 = vpop.f32.mrf.mxu1  ;;  %2138 = vmatmul.mubr.bf16.gmra.mxu0 %v12649_v9  ;;  %v11355_v9 = vld [vmem:[%s15219_s4 + $0x218] sm:$0xff]  }
 0x2ac   :  { %2147 = vmatprep.mubr.bf16.mxu0 %v15234_v61  ;;  %10273 = vmatpush3.bf16.msra.mxu0 %v11355_v9 }
 0x2ad   :  { %v12824_v14 = vpop.f32.mrf.mxu0  ;;  %v12826_v0 = vpop.f32.mrf.mxu1  ;;  %10274 = vmatprep.subr.bf16.mxu0 %v11357_v35 }
 0x2af   :  { %v1514_v58 = vpop.f32.mrf.mxu0  ;;  %v12837_v23 = vpop.f32.mrf.mxu1 }
 0x2b0   :  { %10275 = vmatpush3.bf16.msra.mxu0 %v11359_v2 }
 0x2b1   :  { %v12839_v34 = vpop.f32.mrf.mxu0  ;;  %v1787_v47 = vpop.f32.mrf.mxu1  ;;  %10276 = vmatprep.subr.bf16.mxu0 %v11361_v12 }
 0x2b2   :  { %v12844_v56 = vadd.f32 %v1787_v47, %v1514_v58 }
 0x2b3   :  { %v12849_v39 = vpop.f32.mrf.mxu0  ;;  %v12851_v30 = vpop.f32.mrf.mxu1  ;;  %2148 = vmatmul.mubr.bf16.gmra.mxu0 %v12653_v11 }
 0x2b4   :  { %2157 = vmatprep.mubr.bf16.mxu0 %v15234_v61  ;;  %10277 = vmatpush3.bf16.msra.mxu0 %v11363_v4 }
 0x2b5   :  { %v12855_v59 = vpop.f32.mrf.mxu0  ;;  %v12857_v15 = vpop.f32.mrf.mxu1  ;;  %10278 = vmatprep.subr.bf16.mxu0 %v11365_v40 }
 0x2b7   :  { %v1524_v5 = vpop.f32.mrf.mxu0  ;;  %v12865_v19 = vpop.f32.mrf.mxu1 }
 0x2b8   :  { %10279 = vmatpush3.bf16.msra.mxu0 %v11367_v48 }
 0x2b9   :  { %v12867_v11 = vpop.f32.mrf.mxu0  ;;  %v1797_v13 = vpop.f32.mrf.mxu1  ;;  %10308 = vmatprep.subr.bf16.mxu0 %v11369_v6 }
 0x2ba   :  { %v12872_v22 = vadd.f32 %v1797_v13, %v1524_v5 }
 0x2bb   :  { %v12877_v33 = vpop.f32.mrf.mxu0  ;;  %v12879_v31 = vpop.f32.mrf.mxu1  ;;  %2158 = vmatmul.mubr.bf16.gmra.mxu0 %v12665_v24 }
 0x2bc   :  { %2167 = vmatprep.mubr.bf16.mxu0 %v15234_v61 }
 0x2bd   :  { %v12883_v7 = vpop.f32.mrf.mxu0  ;;  %v12885_v20 = vpop.f32.mrf.mxu1 }
 0x2bf   :  { %v1534_v43 = vpop.f32.mrf.mxu0  ;;  %v12890_v21 = vpop.f32.mrf.mxu1 }
 0x2c1   :  { %v12892_v28 = vpop.f32.mrf.mxu0  ;;  %v1807_v29 = vpop.f32.mrf.mxu1 }
 0x2c2   :  { %15237 = vst [vmem:[#allocation3_spill] sm:$0xff] %v12892_v28  ;;  %v12894_v24 = vadd.f32 %v1807_v29, %v1534_v43 }
 0x2c3   :  { %v12896_v38 = vpop.f32.mrf.mxu0  ;;  %v12898_v46 = vpop.f32.mrf.mxu1  ;;  %2168 = vmatmul.mubr.bf16.gmra.mxu0 %v12668_v17 }
 0x2c4   :  { %15238 = vst [vmem:[#allocation4_spill] sm:$0xff] %v12898_v46  ;;  %2177 = vmatprep.mubr.bf16.mxu0 %v15234_v61 }
 0x2c5   :  { %v12902_v18 = vpop.f32.mrf.mxu0  ;;  %v12904_v53 = vpop.f32.mrf.mxu1 }
 0x2c7   :  { %v1544_v1 = vpop.f32.mrf.mxu0  ;;  %v12906_v16 = vpop.f32.mrf.mxu1 }
 0x2c9   :  { %v12908_v37 = vpop.f32.mrf.mxu0  ;;  %v1817_v62 = vpop.f32.mrf.mxu1 }
 0x2ca   :  { %15239 = vst [vmem:[#allocation5_spill] sm:$0xff] %v12908_v37  ;;  %v12910_v3 = vadd.f32 %v1817_v62, %v1544_v1 }
 0x2cb   :  { %v12912_v26 = vpop.f32.mrf.mxu0  ;;  %v12914_v55 = vpop.f32.mrf.mxu1  ;;  %2178 = vmatmul.mubr.bf16.gmra.mxu0 %v12677_v60 }
 0x2cc   :  { %15240 = vst [vmem:[#allocation6_spill] sm:$0xff] %v12912_v26  ;;  %15241 = vst [vmem:[#allocation7_spill] sm:$0xff] %v12914_v55  ;;  %2187 = vmatprep.mubr.bf16.mxu0 %v15234_v61 }
 0x2cd   :  { %v12918_v17 = vpop.f32.mrf.mxu0  ;;  %v12920_v41 = vpop.f32.mrf.mxu1 }
 0x2ce   :  { %15242 = vst [vmem:[#allocation8_spill] sm:$0xff] %v12920_v41 }
 0x2cf   :  { %v1554_v10 = vpop.f32.mrf.mxu0  ;;  %v12922_v25 = vpop.f32.mrf.mxu1 }
 0x2d1   :  { %v12924_v52 = vpop.f32.mrf.mxu0  ;;  %v1827_v44 = vpop.f32.mrf.mxu1 }
 0x2d2   :  { %15243 = vst [vmem:[#allocation9_spill] sm:$0xff] %v12924_v52  ;;  %v12926_v9 = vadd.f32 %v1827_v44, %v1554_v10 }
 0x2d3   :  { %v12928_v58 = vpop.f32.mrf.mxu0  ;;  %v12930_v47 = vpop.f32.mrf.mxu1  ;;  %2188 = vmatmul.mubr.bf16.gmra.mxu0 %v12728_v57 }
 0x2d4   :  { %15244 = vst [vmem:[#allocation10_spill] sm:$0xff] %v12928_v58  ;;  %15245 = vst [vmem:[#allocation11_spill] sm:$0xff] %v12930_v47  ;;  %2197 = vmatprep.mubr.bf16.mxu0 %v15234_v61 }
 0x2d5   :  { %v12934_v60 = vpop.f32.mrf.mxu0  ;;  %v12936_v35 = vpop.f32.mrf.mxu1 }
 0x2d6   :  { %15246 = vst [vmem:[#allocation12_spill] sm:$0xff] %v12934_v60  ;;  %15247 = vst [vmem:[#allocation13_spill] sm:$0xff] %v12936_v35 }
 0x2d7   :  { %v1564_v2 = vpop.f32.mrf.mxu0  ;;  %v12938_v12 = vpop.f32.mrf.mxu1 }
 0x2d8   :  { %15248 = vst [vmem:[#allocation14_spill] sm:$0xff] %v12938_v12 }
 0x2d9   :  { %v12940_v4 = vpop.f32.mrf.mxu0  ;;  %v1837_v5 = vpop.f32.mrf.mxu1 }
 0x2da   :  { %15249 = vst [vmem:[#allocation15_spill] sm:$0xff] %v12940_v4  ;;  %v12942_v13 = vadd.f32 %v1837_v5, %v1564_v2 }
 0x2db   :  { %v12944_v40 = vpop.f32.mrf.mxu0  ;;  %v12946_v48 = vpop.f32.mrf.mxu1  ;;  %9372 = vmatmul.mubr.msk.bf16.gmra.mxu0 %vm466_vm3, %v1366_v36 }
 0x2dc   :  { %15250 = vst [vmem:[#allocation16_spill] sm:$0xff] %v12944_v40  ;;  %15251 = vst [vmem:[#allocation17_spill] sm:$0xff] %v12946_v48 }
 0x2dd   :  { %v12951_v57 = vpop.f32.mrf.mxu0  ;;  %v12953_v6 = vpop.f32.mrf.mxu1 }
 0x2de   :  { %15252 = vst [vmem:[#allocation18_spill] sm:$0xff] %v12951_v57  ;;  %15253 = vst [vmem:[#allocation19_spill] sm:$0xff] %v12953_v6 }
 0x2df   :  { %v1574_v43 = vpop.f32.mrf.mxu0  ;;  %v12955_v29 = vpop.f32.mrf.mxu1 }
 0x2e0   :  { %15254 = vst [vmem:[#allocation20_spill] sm:$0xff] %v12955_v29 }
 0x2e1   :  { %v12957_v1 = vpop.f32.mrf.mxu0  ;;  %v1847_v62 = vpop.f32.mrf.mxu1 }
 0x2e2   :  { %15255 = vst [vmem:[#allocation21_spill] sm:$0xff] %v12957_v1  ;;  %v12959_v10 = vadd.f32 %v1847_v62, %v1574_v43 }
 0x2e3   :  { %v1580_v44 = vpop.f32.mrf.mxu0  ;;  %v12961_v2 = vpop.f32.mrf.mxu1 }
 0x2e4   :  { %15256 = vst [vmem:[#allocation22_spill] sm:$0xff] %v12961_v2 }
 0x2e5   :  { %v12963_v5 = vpop.f32.mrf.mxu0  ;;  %v1853_v50 = vpop.f32.mrf.mxu1 }
 0x2e6   :  { %15257 = vst [vmem:[#allocation23_spill] sm:$0xff] %v12963_v5  ;;  %v12965_v61 = vadd.f32 %v1853_v50, %v1580_v44 }
 0x2e7   :  { %v1584_v36 = vpop.f32.mrf.mxu0  ;;  %v12967_v48 = vpop.f32.mrf.mxu1 }
 0x2e8   :  { %15258 = vst [vmem:[#allocation24_spill] sm:$0xff] %v12965_v61  ;;  %15259 = vst [vmem:[#allocation25_spill] sm:$0xff] %v12967_v48 }
 0x2e9   :  { %v12969_v4 = vpop.f32.mrf.mxu0  ;;  %v1857_v47 = vpop.f32.mrf.mxu1 }
 0x2ea   :  { %15260 = vst [vmem:[#allocation26_spill] sm:$0xff] %v12969_v4  ;;  %v12971_v52 = vadd.f32 %v1857_v47, %v1584_v36 }
 0x2eb   :  { %v1590_v1 = vpop.f32.mrf.mxu0  ;;  %v12973_v6 = vpop.f32.mrf.mxu1 }
 0x2ec   :  { %15261 = vst [vmem:[#allocation27_spill] sm:$0xff] %v12973_v6 }
 0x2ed   :  { %v12975_v43 = vpop.f32.mrf.mxu0  ;;  %v1863_v62 = vpop.f32.mrf.mxu1 }
 0x2ee   :  { %15262 = vst [vmem:[#allocation28_spill] sm:$0xff] %v12975_v43  ;;  %v12977_v2 = vadd.f32 %v1863_v62, %v1590_v1 }
 0x2ef   :  { %v1594_v5 = vpop.f32.mrf.mxu0  ;;  %v12979_v40 = vpop.f32.mrf.mxu1 }
 0x2f0   :  { %15263 = vst [vmem:[#allocation29_spill] sm:$0xff] %v12979_v40 }
 0x2f1   :  { %v12981_v44 = vpop.f32.mrf.mxu0  ;;  %v1867_v50 = vpop.f32.mrf.mxu1 }
 0x2f2   :  { %15264 = vst [vmem:[#allocation30_spill] sm:$0xff] %v12981_v44  ;;  %v12983_v61 = vadd.f32 %v1867_v50, %v1594_v5 }
 0x2f3   :  { %v1600_v4 = vpop.f32.mrf.mxu0  ;;  %v12985_v48 = vpop.f32.mrf.mxu1 }
 0x2f4   :  { %15265 = vst [vmem:[#allocation31_spill] sm:$0xff] %v12985_v48 }
 0x2f5   :  { %v1602_v47 = vpop.f32.mrf.mxu0  ;;  %v1873_v36 = vpop.f32.mrf.mxu1 }
 0x2f6   :  { %v12987_v55 = vadd.f32 %v1873_v36, %v1600_v4 }
 0x2f7   :  { %v1604_v6 = vpop.f32.mrf.mxu0  ;;  %v1875_v43 = vpop.f32.mrf.mxu1 }
 0x2f8   :  { %v12989_v37 = vadd.f32 %v1875_v43, %v1602_v47 }
 0x2f9   :  { %v12991_v1 = vpop.f32.mrf.mxu0  ;;  %v1877_v62 = vpop.f32.mrf.mxu1 }
 0x2fa   :  { %15266 = vst [vmem:[#allocation32_spill] sm:$0xff] %v12991_v1  ;;  %v12993_v40 = vadd.f32 %v1877_v62, %v1604_v6 }
 0x2fb   :  { %v1610_v44 = vpop.f32.mrf.mxu0  ;;  %v12995_v29 = vpop.f32.mrf.mxu1 }
 0x2fc   :  { %15267 = vst [vmem:[#allocation33_spill] sm:$0xff] %v12995_v29 }
 0x2fd   :  { %v1612_v5 = vpop.f32.mrf.mxu0  ;;  %v1883_v50 = vpop.f32.mrf.mxu1 }
 0x2fe   :  { %v12997_v57 = vadd.f32 %v1883_v50, %v1610_v44 }
 0x2ff   :  { %v1614_v48 = vpop.f32.mrf.mxu0  ;;  %v1885_v35 = vpop.f32.mrf.mxu1 }
 0x300   :  { %v12999_v4 = vadd.f32 %v1885_v35, %v1612_v5 }
 0x301   :  { %v13001_v36 = vpop.f32.mrf.mxu0  ;;  %v1887_v43 = vpop.f32.mrf.mxu1 }
 0x302   :  { %v13003_v47 = vadd.f32 %v1887_v43, %v1614_v48 }
 0x303   :  { %v1620_v1 = vpop.f32.mrf.mxu0  ;;  %v13005_v58 = vpop.f32.mrf.mxu1 }
 0x304   :  { %15268 = vst [vmem:[#allocation34_spill] sm:$0xff] %v13003_v47 }
 0x305   :  { %v1622_v6 = vpop.f32.mrf.mxu0  ;;  %v1893_v62 = vpop.f32.mrf.mxu1 }
 0x306   :  { %v13007_v46 = vadd.f32 %v1893_v62, %v1620_v1 }
 0x307   :  { %v1624_v29 = vpop.f32.mrf.mxu0  ;;  %v1895_v28 = vpop.f32.mrf.mxu1 }
 0x308   :  { %15269 = vst [vmem:[#allocation35_spill] sm:$0xff] %v13007_v46  ;;  %v13009_v44 = vadd.f32 %v1895_v28, %v1622_v6 }
 0x309   :  { %v13011_v50 = vpop.f32.mrf.mxu0  ;;  %v1897_v35 = vpop.f32.mrf.mxu1 }
 0x30a   :  { %15270 = vst [vmem:[#allocation36_spill] sm:$0xff] %v13009_v44  ;;  %15271 = vst [vmem:[#allocation37_spill] sm:$0xff] %v13011_v50  ;;  %v13013_v5 = vadd.f32 %v1897_v35, %v1624_v29 }
 0x30b   :  { %v1630_v12 = vpop.f32.mrf.mxu0  ;;  %v13015_v60 = vpop.f32.mrf.mxu1 }
 0x30c   :  { %15272 = vst [vmem:[#allocation38_spill] sm:$0xff] %v13013_v5  ;;  %15273 = vst [vmem:[#allocation39_spill] sm:$0xff] %v13015_v60 }
 0x30d   :  { %v1632_v48 = vpop.f32.mrf.mxu0  ;;  %v1903_v43 = vpop.f32.mrf.mxu1 }
 0x30e   :  { %v13017_v41 = vadd.f32 %v1903_v43, %v1630_v12 }
 0x30f   :  { %v1634_v26 = vpop.f32.mrf.mxu0  ;;  %v1905_v47 = vpop.f32.mrf.mxu1 }
 0x310   :  { %15274 = vst [vmem:[#allocation40_spill] sm:$0xff] %v13017_v41  ;;  %v13019_v1 = vadd.f32 %v1905_v47, %v1632_v48 }
 0x311   :  { %v13021_v62 = vpop.f32.mrf.mxu0  ;;  %v1907_v28 = vpop.f32.mrf.mxu1 }
 0x312   :  { %15275 = vst [vmem:[#allocation41_spill] sm:$0xff] %v13019_v1  ;;  %15276 = vst [vmem:[#allocation42_spill] sm:$0xff] %v13021_v62  ;;  %v13023_v6 = vadd.f32 %v1907_v28, %v1634_v26 }
 0x313   :  { %v1640_v50 = vpop.f32.mrf.mxu0  ;;  %v13025_v44 = vpop.f32.mrf.mxu1 }
 0x314   :  { %15277 = vst [vmem:[#allocation43_spill] sm:$0xff] %v13023_v6  ;;  %15278 = vst [vmem:[#allocation44_spill] sm:$0xff] %v13025_v44  ;;  %v15285_v44 = vld [vmem:[#allocation2_spill] sm:$0xff] }
 0x315   :  { %v1642_v29 = vpop.f32.mrf.mxu0  ;;  %v1913_v35 = vpop.f32.mrf.mxu1  ;;  %v2274_v41 = vsub.s32 2, %v15285_v44 }
 0x316   :  { %v13027_v5 = vadd.f32 %v1913_v35, %v1640_v50 }
 0x317   :  { %v1644_v60 = vpop.f32.mrf.mxu0  ;;  %v1915_v46 = vpop.f32.mrf.mxu1 }
 0x318   :  { %15279 = vst [vmem:[#allocation45_spill] sm:$0xff] %v13027_v5  ;;  %v13029_v12 = vadd.f32 %v1915_v46, %v1642_v29  ;;  %v40_v46 = vld [vmem:[%s15217_s9 + $0x8] sm:$0xff] }
 0x319   :  { %v13031_v43 = vpop.f32.mrf.mxu0  ;;  %v1917_v47 = vpop.f32.mrf.mxu1 }
 0x31a   :  { %15280 = vst [vmem:[#allocation46_spill] sm:$0xff] %v13029_v12  ;;  %15281 = vst [vmem:[#allocation47_spill] sm:$0xff] %v13031_v43  ;;  %v13033_v48 = vadd.f32 %v1917_v47, %v1644_v60  ;;  %v1774_v47 = vadd.f32 %v12796_v8, %v12790_v51  ;;  %v1780_v8 = vadd.f32 %v12820_v32, %v12808_v54 }
 0x31b   :  { %v1650_v62 = vpop.f32.mrf.mxu0  ;;  %v13035_v1 = vpop.f32.mrf.mxu1 }
 0x31c   :  { %15282 = vst [vmem:[#allocation48_spill] sm:$0xff] %v13033_v48  ;;  %15283 = vst [vmem:[#allocation49_spill] sm:$0xff] %v13035_v1 }
 0x31d   :  { %v1652_v26 = vpop.f32.mrf.mxu0  ;;  %v1923_v28 = vpop.f32.mrf.mxu1 }
 0x31e   :  { %v13037_v6 = vadd.f32 %v1923_v28, %v1650_v62  ;;  %v11945_v62 = vld [vmem:[%s15217_s9] sm:$0xff] }
 0x31f   :  { %v1654_v50 = vpop.f32.mrf.mxu0  ;;  %v1925_v35 = vpop.f32.mrf.mxu1  ;;  %v13054_v28 = vrot.slane %v11945_v62, %v2274_v41 }
 0x320   :  { %15284 = vst [vmem:[#allocation50_spill] sm:$0xff] %v13037_v6  ;;  %v13043_v29 = vadd.f32 %v1925_v35, %v1652_v26  ;;  %v1776_v6 = vadd.f32 %v12806_v45, %v12794_v42  ;;  %v13058_v35 = vrot.slane %v40_v46, %v2274_v41  ;;  %v11354_v42 = vld [vmem:[%s15219_s4 + $0xb8] sm:$0xff]  }
 0x321   :  { %v13045_v43 = vpop.f32.mrf.mxu0  ;;  %v1927_v60 = vpop.f32.mrf.mxu1 }
 0x322   :  { %15286 = vst [vmem:[#allocation51_spill] sm:$0xff] %v13043_v29  ;;  %15287 = vst [vmem:[#allocation52_spill] sm:$0xff] %v13045_v43  ;;  %v13049_v48 = vadd.f32 %v1927_v60, %v1654_v50 }
 0x323   :  { %v2049_v44 = vpop.f32.mrf.mxu0 }
 0x324   :  { %15288 = vst [vmem:[#allocation53_spill] sm:$0xff] %v13049_v48  ;;  %v2208_v26 = vadd.f32 %v2049_v44, %v1774_v47  ;;  %v11356_v44 = vld [vmem:[%s15219_s4 + $0xf0] sm:$0xff]   ;;  %v1794_v47 = vadd.f32 %v12857_v15, %v12849_v39 }
 0x325   :  { %v2051_v43 = vpop.f32.mrf.mxu0 }
 0x326   :  { %v2280_v29 = vadd.f32 %v13054_v28, %v2208_v26  ;;  %v2209_v1 = vadd.f32 %v2051_v43, %v1776_v6 }
 0x327   :  { %v13061_v51 = vpop.f32.mrf.mxu0 }
 0x328   :  { %v2281_v50 = vadd.f32 %v13058_v35, %v2209_v1  ;;  %v2344_v60 = vmax.f32 %v2280_v29, 0.0  ;;  %v11360_v29 = vld [vmem:[%s15219_s4 + $0xe8] sm:$0xff]  }
 0x329   :  { %v2055_v62 = vpop.f32.mrf.mxu0 }
 0x32a   :  { %v2345_v48 = vmax.f32 %v2281_v50, 0.0  ;;  %v2211_v12 = vadd.f32 %v2055_v62, %v1780_v8  ;;  %v10035_v54 = vpack.c.bf16 %v2344_v60, %v2344_v60  ;;  %v11362_v50 = vld [vmem:[%s15219_s4 + $0xa8] sm:$0xff]   ;;  %v11364_v62 = vld [vmem:[%s15219_s4 + $0xe0] sm:$0xff]  }
 0x32b   :  { %v13066_v5 = vpop.f32.mrf.mxu0 }
 0x32c   :  { %v10036_v45 = vpack.c.bf16 %v2345_v48, %v2345_v48  ;;  %v2283_v41 = vadd.f32 %v13058_v35, %v2211_v12  ;;  %v11358_v12 = vld [vmem:[%s15219_s4 + $0xb0] sm:$0xff]  }
 0x32d   :  { %v13075_v32 = vpop.f32.mrf.mxu0 }
 0x32e   :  { %v2347_v1 = vmax.f32 %v2283_v41, 0.0  ;;  %3692 = vmatprep.mubr.bf16.mxu1 %v10036_v45 }
 0x32f   :  { %v2063_v6 = vpop.f32.mrf.mxu0  ;;  %3693 = vmatmul.mubr.bf16.vlgmr.msra.gmra.mxu1 %v10035_v54  ;;  %v11368_v54 = vld [vmem:[%s15219_s4 + $0xd8] sm:$0xff]  }
 0x330   :  { %v13078_v43 = vadd.f32 %v2063_v6, %v12844_v56  ;;  %10199 = vmatpush3.bf16.msra.mxu1 %v11354_v42  ;;  %v10038_v46 = vpack.c.bf16 %v2347_v1, %v2347_v1  ;;  %v1796_v56 = vadd.f32 %v12865_v19, %v12855_v59  ;;  %v11366_v19 = vld [vmem:[%s15219_s4 + $0xa0] sm:$0xff]   ;;  %v11370_v6 = vld [vmem:[%s15219_s4 + $0x98] sm:$0xff]  }
 0x331   :  { %v13083_v48 = vpop.f32.mrf.mxu0  ;;  %10200 = vmatprep.subr.bf16.mxu1 %v11356_v44 }
 0x332   :  { %3832 = vmatprep.mubr.bf16.mxu1 %v10038_v46  ;;  %v11371_v46 = vld [vmem:[%s15219_s4 + $0x338] sm:$0xff]  }
 0x333   :  { %v2069_v26 = vpop.f32.mrf.mxu0 }
 0x334   :  { %v2216_v8 = vadd.f32 %v2069_v26, %v1794_v47  ;;  %10201 = vmatpush3.bf16.msra.mxu1 %v11358_v12  ;;  %v1806_v12 = vadd.f32 %v12890_v21, %v12883_v7  ;;  %v11372_v47 = vld [vmem:[%s15219_s4 + $0xd0] sm:$0xff]  }
 0x335   :  { %v2071_v60 = vpop.f32.mrf.mxu0  ;;  %10202 = vmatprep.subr.bf16.mxu1 %v11360_v29  ;;  %v11374_v7 = vld [vmem:[%s15219_s4 + $0x90] sm:$0xff]  }
 0x336   :  { %v2288_v42 = vadd.f32 %v13054_v28, %v2216_v8  ;;  %v2217_v39 = vadd.f32 %v2071_v60, %v1796_v56  ;;  %v11373_v8 = vld [vmem:[%s15219_s4 + $0x370] sm:$0xff]   ;;  %v1778_v60 = vadd.f32 %v12810_v63, %v12804_v49  ;;  %v11376_v49 = vld [vmem:[%s15219_s4 + $0xc8] sm:$0xff]  }
 0x337   :  { %v2073_v15 = vpop.f32.mrf.mxu0  ;;  %v11375_v21 = vld [vmem:[%s15219_s4 + $0x330] sm:$0xff]  }
 0x338   :  { %v2289_v45 = vadd.f32 %v13058_v35, %v2217_v39  ;;  %v13101_v59 = vadd.f32 %v2073_v15, %v12872_v22  ;;  %10203 = vmatpush3.bf16.msra.mxu1 %v11362_v50  ;;  %v2352_v41 = vmax.f32 %v2288_v42, 0.0  ;;  %v1786_v42 = vadd.f32 %v12837_v23, %v12824_v14  ;;  %v11377_v14 = vld [vmem:[%s15219_s4 + $0x368] sm:$0xff]  }
 0x339   :  { %v13106_v44 = vpop.f32.mrf.mxu0  ;;  %10204 = vmatprep.subr.bf16.mxu1 %v11364_v62  ;;  %v2210_v63 = vadd.f32 %v13061_v51, %v1778_v60  ;;  %v11379_v51 = vld [vmem:[%s15219_s4 + $0x328] sm:$0xff]   ;;  %v11384_v60 = vld [vmem:[%s15219_s4 + $0x178] sm:$0xff]  }
 0x33a   :  { %v2353_v1 = vmax.f32 %v2289_v45, 0.0  ;;  %v10043_v26 = vpack.c.bf16 %v2352_v41, %v2352_v41  ;;  %v2213_v23 = vadd.f32 %v13075_v32, %v1786_v42  ;;  %v11378_v41 = vld [vmem:[%s15219_s4 + $0x88] sm:$0xff]   ;;  %v11380_v32 = vld [vmem:[%s15219_s4 + $0xc0] sm:$0xff]   ;;  %v11387_v42 = vld [vmem:[%s15219_s4 + $0x318] sm:$0xff]  }
 0x33b   :  { %v13114_v22 = vpop.f32.mrf.mxu0 }
 0x33c   :  { %v10044_v29 = vpack.c.bf16 %v2353_v1, %v2353_v1  ;;  %10205 = vmatpush3.bf16.msra.mxu1 %v11366_v19  ;;  %v2282_v1 = vadd.f32 %v13054_v28, %v2210_v63 }
 0x33d   :  { %v2081_v56 = vpop.f32.mrf.mxu0  ;;  %10206 = vmatprep.subr.bf16.mxu1 %v11368_v54 }
 0x33e   :  { %v2221_v50 = vadd.f32 %v2081_v56, %v1806_v12  ;;  %4252 = vmatprep.mubr.bf16.mxu0 %v10044_v29  ;;  %v2285_v12 = vadd.f32 %v13058_v35, %v2213_v23  ;;  %v11383_v56 = vld [vmem:[%s15219_s4 + $0x320] sm:$0xff]   ;;  %v11389_v23 = vld [vmem:[%s15219_s4 + $0x350] sm:$0xff]  }
 0x33f   :  { %v2083_v62 = vpop.f32.mrf.mxu0  ;;  %4253 = vmatmul.mubr.bf16.vlgmr.msra.gmra.mxu0 %v10043_v26 }
 0x340   :  { %v2293_v39 = vadd.f32 %v13058_v35, %v2221_v50  ;;  %v13139_v15 = vadd.f32 %v2083_v62, %v12894_v24  ;;  %10207 = vmatpush3.bf16.msra.mxu1 %v11370_v6  ;;  %10309 = vmatpush3.bf16.msra.mxu0 %v11371_v46  ;;  %v11381_v46 = vld [vmem:[%s15219_s4 + $0x360] sm:$0xff]   ;;  %v2349_v62 = vmax.f32 %v2285_v12, 0.0  ;;  %v11394_v12 = vld [vmem:[%s15219_s4 + $0x128] sm:$0xff]  }
 0x341   :  { %v13145_v45 = vpop.f32.mrf.mxu0  ;;  %10208 = vmatprep.subr.bf16.mxu1 %v11372_v47  ;;  %10310 = vmatprep.subr.bf16.mxu0 %v11373_v8  ;;  %v11382_v47 = vld [vmem:[%s15219_s4 + $0x80] sm:$0xff]   ;;  %v2346_v8 = vmax.f32 %v2282_v1, 0.0  ;;  %v1816_v1 = vadd.f32 %v12906_v16, %v12902_v18 }
 0x342   :  { %v2357_v24 = vmax.f32 %v2293_v39, 0.0  ;;  %v11388_v39 = vld [vmem:[%s15219_s4 + $0x170] sm:$0xff]  }
 0x343   :  { %v13151_v19 = vpop.f32.mrf.mxu0 }
 0x344   :  { %v10048_v54 = vpack.c.bf16 %v2357_v24, %v2357_v24  ;;  %10209 = vmatpush3.bf16.msra.mxu1 %v11374_v7  ;;  %10311 = vmatpush3.bf16.msra.mxu0 %v11375_v21  ;;  %v11386_v7 = vld [vmem:[%s15219_s4 + $0x138] sm:$0xff]  }
 0x345   :  { %v2091_v6 = vpop.f32.mrf.mxu0  ;;  %10210 = vmatprep.subr.bf16.mxu1 %v11376_v49  ;;  %10312 = vmatprep.subr.bf16.mxu0 %v11377_v14  ;;  %v10037_v49 = vpack.c.bf16 %v2346_v8, %v2346_v8  ;;  %v10040_v14 = vpack.c.bf16 %v2349_v62, %v2349_v62  ;;  %v11398_v62 = vld [vmem:[%s15219_s4 + $0x120] sm:$0xff]  }
 0x346   :  { %4532 = vmatprep.mubr.bf16.mxu0 %v10048_v54  ;;  %v2225_v18 = vadd.f32 %v2091_v6, %v1816_v1  ;;  %v11404_v1 = vld [vmem:[%s15219_s4 + $0x150] sm:$0xff]  }
 0x347   :  { %v2093_v29 = vpop.f32.mrf.mxu0 }
 0x348   :  { %v13171_v26 = vadd.f32 %v2093_v29, %v12910_v3  ;;  %10211 = vmatpush3.bf16.msra.mxu1 %v11378_v41  ;;  %10313 = vmatpush3.bf16.msra.mxu0 %v11379_v51  ;;  %v11385_v3 = vld [vmem:[%s15219_s4 + $0x358] sm:$0xff]   ;;  %v1804_v41 = vadd.f32 %v12885_v20, %v12877_v33  ;;  %v11390_v51 = vld [vmem:[%s15219_s4 + $0x130] sm:$0xff]   ;;  %v11392_v20 = vld [vmem:[%s15219_s4 + $0x168] sm:$0xff]   ;;  %v2297_v8 = vadd.f32 %v13058_v35, %v2225_v18 }
 0x349   :  { %v13176_v50 = vpop.f32.mrf.mxu0  ;;  %10212 = vmatprep.subr.bf16.mxu1 %v11380_v32  ;;  %10314 = vmatprep.subr.bf16.mxu0 %v11381_v46  ;;  %v11391_v33 = vld [vmem:[%s15219_s4 + $0x310] sm:$0xff]   ;;  %v11393_v46 = vld [vmem:[%s15219_s4 + $0x348] sm:$0xff]  }
 0x34b   :  { %v13187_v21 = vpop.f32.mrf.mxu0 }
 0x34c   :  { %10213 = vmatpush3.bf16.msra.mxu1 %v11382_v47  ;;  %10315 = vmatpush3.bf16.msra.mxu0 %v11383_v56  ;;  %v11396_v47 = vld [vmem:[%s15219_s4 + $0x160] sm:$0xff]  }
 0x34d   :  { %v13195_v63 = vpop.f32.mrf.mxu0  ;;  %10220 = vmatprep.subr.bf16.mxu1 %v11384_v60  ;;  %10316 = vmatprep.subr.bf16.mxu0 %v11385_v3  ;;  %v11397_v56 = vld [vmem:[%s15219_s4 + $0x340] sm:$0xff]  }
 0x34f   :  { %3833 = vmatmul.mubr.bf16.vlgmr.msra.gmra.mxu1 %v10037_v49  ;;  %v2103_v24 = vpop.f32.mrf.mxu0 }
 0x350   :  { %v13203_v54 = vadd.f32 %v2103_v24, %v12926_v9  ;;  %10221 = vmatpush3.bf16.msra.mxu1 %v11386_v7  ;;  %3972 = vmatprep.mubr.bf16.mxu1 %v10040_v14  ;;  %v2220_v9 = vadd.f32 %v13114_v22, %v1804_v41  ;;  %v11395_v22 = vld [vmem:[%s15219_s4 + $0x308] sm:$0xff]   ;;  %v2361_v14 = vmax.f32 %v2297_v8, 0.0  ;;  %v11402_v24 = vld [vmem:[%s15219_s4 + $0x118] sm:$0xff]  }
 0x351   :  { %10317 = vmatpush3.bf16.msra.mxu0 %v11387_v42  ;;  %v13210_v32 = vpop.f32.mrf.mxu0  ;;  %10222 = vmatprep.subr.bf16.mxu1 %v11388_v39  ;;  %v11399_v42 = vld [vmem:[%s15219_s4 + $0x300] sm:$0xff]   ;;  %v11400_v39 = vld [vmem:[%s15219_s4 + $0x158] sm:$0xff]  }
 0x352   :  { %10318 = vmatprep.subr.bf16.mxu0 %v11389_v23  ;;  %v2292_v6 = vadd.f32 %v13054_v28, %v2220_v9  ;;  %v11403_v41 = vld [vmem:[%s15219_s4 + $0x438] sm:$0xff]   ;;  %v1784_v9 = vadd.f32 %v12826_v0, %v12818_v27 }
 0x353   :  { %v13222_v16 = vpop.f32.mrf.mxu0 }
 0x354   :  { %10223 = vmatpush3.bf16.msra.mxu1 %v11390_v51  ;;  %v2356_v49 = vmax.f32 %v2292_v6, 0.0  ;;  %v11407_v6 = vld [vmem:[%s15219_s4 + $0x430] sm:$0xff]   ;;  %v2212_v27 = vadd.f32 %v13066_v5, %v1784_v9  ;;  %v11410_v5 = vld [vmem:[%s15219_s4 + $0x108] sm:$0xff]   ;;  %v11418_v9 = vld [vmem:[%s15219_s4 + $0x1b8] sm:$0xff]  }
 0x355   :  { %10319 = vmatpush3.bf16.msra.mxu0 %v11391_v33  ;;  %v13227_v29 = vpop.f32.mrf.mxu0  ;;  %10224 = vmatprep.subr.bf16.mxu1 %v11392_v20  ;;  %v11405_v20 = vld [vmem:[%s15219_s4 + $0x470] sm:$0xff]  }
 0x356   :  { %10320 = vmatprep.subr.bf16.mxu0 %v11393_v46  ;;  %v10047_v33 = vpack.c.bf16 %v2356_v49, %v2356_v49  ;;  %v10052_v46 = vpack.c.bf16 %v2361_v14, %v2361_v14  ;;  %v2284_v8 = vadd.f32 %v13054_v28, %v2212_v27 }
 0x357   :  { %v2113_v60 = vpop.f32.mrf.mxu0 }
 0x358   :  { %v13241_v3 = vadd.f32 %v2113_v60, %v12942_v13  ;;  %10225 = vmatpush3.bf16.msra.mxu1 %v11394_v12  ;;  %v11401_v13 = vld [vmem:[%s15219_s4 + $0x478] sm:$0xff]   ;;  %v11406_v12 = vld [vmem:[%s15219_s4 + $0x110] sm:$0xff]  }
 0x359   :  { %10321 = vmatpush3.bf16.msra.mxu0 %v11395_v22  ;;  %v13246_v7 = vpop.f32.mrf.mxu0  ;;  %10226 = vmatprep.subr.bf16.mxu1 %v11396_v47  ;;  %v1790_v22 = vadd.f32 %v12851_v30, %v12839_v34  ;;  %v11409_v30 = vld [vmem:[%s15219_s4 + $0x468] sm:$0xff]  }
 0x35a   :  { %10322 = vmatprep.subr.bf16.mxu0 %v11397_v56  ;;  %v11408_v56 = vld [vmem:[%s15219_s4 + $0x148] sm:$0xff]  }
 0x35b   :  { %v13257_v23 = vpop.f32.mrf.mxu0  ;;  %v2215_v34 = vadd.f32 %v13083_v48, %v1790_v22  ;;  %v11411_v48 = vld [vmem:[%s15219_s4 + $0x428] sm:$0xff]   ;;  %v11420_v22 = vld [vmem:[%s15219_s4 + $0x1f0] sm:$0xff]  }
 0x35c   :  { %10227 = vmatpush3.bf16.msra.mxu1 %v11398_v62  ;;  %v11412_v62 = vld [vmem:[%s15219_s4 + $0x140] sm:$0xff]  }
 0x35d   :  { %10323 = vmatpush3.bf16.msra.mxu0 %v11399_v42  ;;  %v13265_v51 = vpop.f32.mrf.mxu0  ;;  %10228 = vmatprep.subr.bf16.mxu1 %v11400_v39  ;;  %v2287_v42 = vadd.f32 %v13058_v35, %v2215_v34  ;;  %v11413_v39 = vld [vmem:[%s15219_s4 + $0x460] sm:$0xff]   ;;  %v11421_v34 = vld [vmem:[%s15219_s4 + $0x450] sm:$0xff]  }
 0x35e   :  { %10352 = vmatprep.subr.bf16.mxu0 %v11401_v13  ;;  %v11414_v13 = vld [vmem:[%s15219_s4 + $0x100] sm:$0xff]  }
 0x35f   :  { %v2123_v18 = vpop.f32.mrf.mxu0 }
 0x360   :  { %4533 = vmatmul.mubr.bf16.vlgmr.msra.gmra.mxu0 %v10047_v33  ;;  %v13281_v47 = vadd.f32 %v2123_v18, %v12959_v10  ;;  %10229 = vmatpush3.bf16.msra.mxu1 %v11402_v24  ;;  %v11415_v24 = vld [vmem:[%s15219_s4 + $0x420] sm:$0xff]   ;;  %v11416_v33 = vld [vmem:[%s15219_s4 + $0x1f8] sm:$0xff]  }
 0x361   :  { %10353 = vmatpush3.bf16.msra.mxu0 %v11403_v41  ;;  %4812 = vmatprep.mubr.bf16.mxu0 %v10052_v46  ;;  %v13287_v0 = vpop.f32.mrf.mxu0  ;;  %v2348_v41 = vmax.f32 %v2284_v8, 0.0  ;;  %v11419_v18 = vld [vmem:[%s15219_s4 + $0x418] sm:$0xff]   ;;  %v1814_v8 = vadd.f32 %v12904_v53, %v12896_v38 }
 0x362   :  { %10230 = vmatprep.subr.bf16.mxu1 %v11404_v1  ;;  %10354 = vmatprep.subr.bf16.mxu0 %v11405_v20  ;;  %v11417_v20 = vld [vmem:[%s15219_s4 + $0x458] sm:$0xff]  }
 0x363   :  { %v13296_v10 = vpop.f32.mrf.mxu0 }
 0x364   :  { %10231 = vmatpush3.bf16.msra.mxu1 %v11406_v12 }
 0x365   :  { %10355 = vmatpush3.bf16.msra.mxu0 %v11407_v6  ;;  %v13302_v60 = vpop.f32.mrf.mxu0  ;;  %10232 = vmatprep.subr.bf16.mxu1 %v11408_v56  ;;  %v10039_v6 = vpack.c.bf16 %v2348_v41, %v2348_v41  ;;  %v11429_v41 = vld [vmem:[%s15219_s4 + $0x440] sm:$0xff]  }
 0x366   :  { %10356 = vmatprep.subr.bf16.mxu0 %v11409_v30 }
 0x367   :  { %v2133_v49 = vpop.f32.mrf.mxu0 }
 0x368   :  { %v13318_v14 = vadd.f32 %v2133_v49, %v12971_v52  ;;  %10233 = vmatpush3.bf16.msra.mxu1 %v11410_v5  ;;  %v2351_v52 = vmax.f32 %v2287_v42, 0.0  ;;  %v11423_v5 = vld [vmem:[%s15219_s4 + $0x410] sm:$0xff]   ;;  %v1826_v42 = vadd.f32 %v12922_v25, %v12918_v17  ;;  %v2224_v49 = vadd.f32 %v13151_v19, %v1814_v8  ;;  %v11426_v17 = vld [vmem:[%s15219_s4 + $0x1a8] sm:$0xff]  }
 0x369   :  { %10357 = vmatpush3.bf16.msra.mxu0 %v11411_v48  ;;  %v13323_v1 = vpop.f32.mrf.mxu0  ;;  %10234 = vmatprep.subr.bf16.mxu1 %v11412_v62  ;;  %v11424_v62 = vld [vmem:[%s15219_s4 + $0x1e8] sm:$0xff]   ;;  %v11436_v8 = vld [vmem:[%s15219_s4 + $0x1d0] sm:$0xff]  }
 0x36a   :  { %10358 = vmatprep.subr.bf16.mxu0 %v11413_v39  ;;  %v10042_v56 = vpack.c.bf16 %v2351_v52, %v2351_v52  ;;  %v2229_v38 = vadd.f32 %v13195_v63, %v1826_v42  ;;  %v11427_v19 = vld [vmem:[%s15219_s4 + $0x408] sm:$0xff]   ;;  %v11428_v63 = vld [vmem:[%s15219_s4 + $0x1e0] sm:$0xff]  }
 0x36b   :  { %v2139_v46 = vpop.f32.mrf.mxu0 }
 0x36c   :  { %v13338_v12 = vadd.f32 %v2139_v46, %v12977_v2  ;;  %10235 = vmatpush3.bf16.msra.mxu1 %v11414_v13  ;;  %v11422_v2 = vld [vmem:[%s15219_s4 + $0x1b0] sm:$0xff]  }
 0x36d   :  { %10359 = vmatpush3.bf16.msra.mxu0 %v11415_v24  ;;  %v13343_v27 = vpop.f32.mrf.mxu0  ;;  %10242 = vmatprep.subr.bf16.mxu1 %v11416_v33  ;;  %v2296_v24 = vadd.f32 %v13054_v28, %v2224_v49  ;;  %v2301_v33 = vadd.f32 %v13058_v35, %v2229_v38  ;;  %v11438_v38 = vld [vmem:[%s15219_s4 + $0x190] sm:$0xff]  }
 0x36e   :  { %10360 = vmatprep.subr.bf16.mxu0 %v11417_v20 }
 0x36f   :  { %3973 = vmatmul.mubr.bf16.vlgmr.msra.gmra.mxu1 %v10039_v6  ;;  %v2143_v30 = vpop.f32.mrf.mxu0  ;;  %v2365_v6 = vmax.f32 %v2301_v33, 0.0 }
 0x370   :  { %v13357_v48 = vadd.f32 %v2143_v30, %v12983_v61  ;;  %10243 = vmatpush3.bf16.msra.mxu1 %v11418_v9  ;;  %4112 = vmatprep.mubr.bf16.mxu1 %v10042_v56  ;;  %v11425_v61 = vld [vmem:[%s15219_s4 + $0x448] sm:$0xff]   ;;  %v11430_v9 = vld [vmem:[%s15219_s4 + $0x1a0] sm:$0xff]  }
 0x371   :  { %10361 = vmatpush3.bf16.msra.mxu0 %v11419_v18  ;;  %v13364_v39 = vpop.f32.mrf.mxu0  ;;  %10244 = vmatprep.subr.bf16.mxu1 %v11420_v22  ;;  %v11432_v18 = vld [vmem:[%s15219_s4 + $0x1d8] sm:$0xff]   ;;  %v2360_v22 = vmax.f32 %v2296_v24, 0.0  ;;  %v10056_v49 = vpack.c.bf16 %v2365_v6, %v2365_v6 }
 0x372   :  { %10362 = vmatprep.subr.bf16.mxu0 %v11421_v34  ;;  %v11434_v34 = vld [vmem:[%s15219_s4 + $0x198] sm:$0xff]  }
 0x373   :  { %v2149_v53 = vpop.f32.mrf.mxu0 }
 0x374   :  { %v13372_v13 = vadd.f32 %v2149_v53, %v12987_v55  ;;  %10245 = vmatpush3.bf16.msra.mxu1 %v11422_v2  ;;  %v11435_v2 = vld [vmem:[%s15219_s4 + $0x538] sm:$0xff]   ;;  %v11439_v53 = vld [vmem:[%s15219_s4 + $0x530] sm:$0xff]  }
 0x375   :  { %10363 = vmatpush3.bf16.msra.mxu0 %v11423_v5  ;;  %v2151_v25 = vpop.f32.mrf.mxu0  ;;  %10246 = vmatprep.subr.bf16.mxu1 %v11424_v62  ;;  %v10051_v62 = vpack.c.bf16 %v2360_v22, %v2360_v22 }
 0x376   :  { %v13385_v55 = vadd.f32 %v2151_v25, %v12989_v37  ;;  %10364 = vmatprep.subr.bf16.mxu0 %v11425_v61  ;;  %v11431_v37 = vld [vmem:[%s15219_s4 + $0x400] sm:$0xff]  }
 0x377   :  { %v2153_v20 = vpop.f32.mrf.mxu0  ;;  %v15289_v25 = vld [vmem:[#allocation34_spill] sm:$0xff] }
 0x378   :  { %v13392_v52 = vadd.f32 %v2153_v20, %v12993_v40  ;;  %10247 = vmatpush3.bf16.msra.mxu1 %v11426_v17  ;;  %v11433_v40 = vld [vmem:[%s15219_s4 + $0x578] sm:$0xff]   ;;  %v1800_v17 = vadd.f32 %v12879_v31, %v12867_v11  ;;  %v11441_v11 = vld [vmem:[%s15219_s4 + $0x568] sm:$0xff]  }
 0x379   :  { %10365 = vmatpush3.bf16.msra.mxu0 %v11427_v19  ;;  %v13397_v46 = vpop.f32.mrf.mxu0  ;;  %10248 = vmatprep.subr.bf16.mxu1 %v11428_v63  ;;  %v11440_v63 = vld [vmem:[%s15219_s4 + $0x1c8] sm:$0xff]  }
 0x37a   :  { %10366 = vmatprep.subr.bf16.mxu0 %v11429_v41  ;;  %v2219_v41 = vadd.f32 %v13106_v44, %v1800_v17  ;;  %v11442_v20 = vld [vmem:[%s15219_s4 + $0x188] sm:$0xff]   ;;  %v2286_v44 = vadd.f32 %v13054_v28, %v13078_v43  ;;  %v11445_v43 = vld [vmem:[%s15219_s4 + $0x560] sm:$0xff]   ;;  %v11449_v17 = vld [vmem:[%s15219_s4 + $0x558] sm:$0xff]  }
 0x37b   :  { %v2159_v56 = vpop.f32.mrf.mxu0 }
 0x37c   :  { %v13412_v30 = vadd.f32 %v2159_v56, %v12997_v57  ;;  %10249 = vmatpush3.bf16.msra.mxu1 %v11430_v9  ;;  %v11437_v57 = vld [vmem:[%s15219_s4 + $0x570] sm:$0xff]   ;;  %v2291_v22 = vadd.f32 %v13058_v35, %v2219_v41  ;;  %v11451_v41 = vld [vmem:[%s15219_s4 + $0x518] sm:$0xff]  }
 0x37d   :  { %10367 = vmatpush3.bf16.msra.mxu0 %v11431_v37  ;;  %v2161_v5 = vpop.f32.mrf.mxu0  ;;  %10250 = vmatprep.subr.bf16.mxu1 %v11432_v18  ;;  %v11443_v37 = vld [vmem:[%s15219_s4 + $0x528] sm:$0xff]   ;;  %v11444_v18 = vld [vmem:[%s15219_s4 + $0x1c0] sm:$0xff]  }
 0x37e   :  { %v13421_v42 = vadd.f32 %v2161_v5, %v12999_v4  ;;  %10396 = vmatprep.subr.bf16.mxu0 %v11433_v40  ;;  %v1890_v4 = vadd.f32 %v13005_v58, %v13001_v36  ;;  %v15290_v58 = vld [vmem:[#allocation35_spill] sm:$0xff]  ;;  %v15291_v40 = vld [vmem:[#allocation36_spill] sm:$0xff] }
 0x37f   :  { %v2163_v61 = vpop.f32.mrf.mxu0  ;;  %v15293_v5 = vld [vmem:[#allocation39_spill] sm:$0xff] }
 0x380   :  { %4813 = vmatmul.mubr.bf16.vlgmr.msra.gmra.mxu0 %v10051_v62  ;;  %v13437_v19 = vadd.f32 %v2163_v61, %v15289_v25  ;;  %10251 = vmatpush3.bf16.msra.mxu1 %v11434_v34  ;;  %v11446_v34 = vld [vmem:[%s15219_s4 + $0x180] sm:$0xff]   ;;  %v2350_v61 = vmax.f32 %v2286_v44, 0.0 }
 0x381   :  { %10397 = vmatpush3.bf16.msra.mxu0 %v11435_v2  ;;  %5092 = vmatprep.mubr.bf16.mxu0 %v10056_v49  ;;  %v2165_v24 = vpop.f32.mrf.mxu0  ;;  %v15292_v2 = vld [vmem:[#allocation37_spill] sm:$0xff]  ;;  %v15294_v62 = vld [vmem:[#allocation38_spill] sm:$0xff] }
 0x382   :  { %v13443_v33 = vadd.f32 %v2165_v24, %v1890_v4  ;;  %10252 = vmatprep.subr.bf16.mxu1 %v11436_v8  ;;  %10398 = vmatprep.subr.bf16.mxu0 %v11437_v57  ;;  %v1900_v8 = vadd.f32 %v15293_v5, %v15292_v2  ;;  %v11447_v49 = vld [vmem:[%s15219_s4 + $0x520] sm:$0xff]   ;;  %v2355_v4 = vmax.f32 %v2291_v22, 0.0  ;;  %v11453_v22 = vld [vmem:[%s15219_s4 + $0x550] sm:$0xff]  }
 0x383   :  { %v2169_v31 = vpop.f32.mrf.mxu0  ;;  %v15298_v2 = vld [vmem:[#allocation8_spill] sm:$0xff] }
 0x384   :  { %v13449_v36 = vadd.f32 %v2169_v31, %v15290_v58  ;;  %10253 = vmatpush3.bf16.msra.mxu1 %v11438_v38  ;;  %v11452_v58 = vld [vmem:[%s15219_s4 + $0x2f0] sm:$0xff]  }
 0x385   :  { %10399 = vmatpush3.bf16.msra.mxu0 %v11439_v53  ;;  %v2171_v9 = vpop.f32.mrf.mxu0  ;;  %10254 = vmatprep.subr.bf16.mxu1 %v11440_v63  ;;  %v11448_v53 = vld [vmem:[%s15219_s4 + $0x2f8] sm:$0xff]  }
 0x386   :  { %v13464_v6 = vadd.f32 %v2171_v9, %v15291_v40  ;;  %10400 = vmatprep.subr.bf16.mxu0 %v11441_v11  ;;  %v11450_v63 = vld [vmem:[%s15219_s4 + $0x2b8] sm:$0xff]   ;;  %v15295_v11 = vld [vmem:[#allocation40_spill] sm:$0xff] }
 0x387   :  { %v2173_v56 = vpop.f32.mrf.mxu0  ;;  %v15296_v9 = vld [vmem:[#allocation41_spill] sm:$0xff] }
 0x388   :  { %v13475_v57 = vadd.f32 %v2173_v56, %v15294_v62  ;;  %10255 = vmatpush3.bf16.msra.mxu1 %v11442_v20  ;;  %v10041_v20 = vpack.c.bf16 %v2350_v61, %v2350_v61  ;;  %v11455_v56 = vld [vmem:[%s15219_s4 + $0x510] sm:$0xff]   ;;  %v15301_v61 = vld [vmem:[#allocation43_spill] sm:$0xff] }
 0x389   :  { %10401 = vmatpush3.bf16.msra.mxu0 %v11443_v37  ;;  %v2175_v38 = vpop.f32.mrf.mxu0  ;;  %10256 = vmatprep.subr.bf16.mxu1 %v11444_v18  ;;  %v10046_v18 = vpack.c.bf16 %v2355_v4, %v2355_v4  ;;  %v15300_v62 = vld [vmem:[#allocation44_spill] sm:$0xff]  ;;  %v15303_v4 = vld [vmem:[#allocation14_spill] sm:$0xff] }
 0x38a   :  { %v13486_v25 = vadd.f32 %v2175_v38, %v1900_v8  ;;  %10402 = vmatprep.subr.bf16.mxu0 %v11445_v43  ;;  %v11454_v43 = vld [vmem:[%s15219_s4 + $0x2b0] sm:$0xff]   ;;  %v15299_v8 = vld [vmem:[#allocation42_spill] sm:$0xff] }
 0x38b   :  { %v2179_v24 = vpop.f32.mrf.mxu0 }
 0x38c   :  { %v13495_v31 = vadd.f32 %v2179_v24, %v15295_v11  ;;  %10257 = vmatpush3.bf16.msra.mxu1 %v11446_v34  ;;  %v15297_v34 = vld [vmem:[#allocation6_spill] sm:$0xff] }
 0x38d   :  { %10403 = vmatpush3.bf16.msra.mxu0 %v11447_v49  ;;  %v2181_v44 = vpop.f32.mrf.mxu0  ;;  %10286 = vmatprep.subr.bf16.mxu1 %v11448_v53  ;;  %v1824_v5 = vadd.f32 %v15298_v2, %v15297_v34  ;;  %v1910_v49 = vadd.f32 %v15300_v62, %v15299_v8  ;;  %v11456_v53 = vld [vmem:[%s15219_s4 + $0x2e8] sm:$0xff]   ;;  %v15305_v2 = vld [vmem:[#allocation46_spill] sm:$0xff] }
 0x38e   :  { %v13501_v37 = vadd.f32 %v2181_v44, %v15296_v9  ;;  %10404 = vmatprep.subr.bf16.mxu0 %v11449_v17  ;;  %v15302_v17 = vld [vmem:[#allocation12_spill] sm:$0xff]  ;;  %v15306_v62 = vld [vmem:[#allocation47_spill] sm:$0xff] }
 0x38f   :  { %4113 = vmatmul.mubr.bf16.vlgmr.msra.gmra.mxu1 %v10041_v20  ;;  %v2183_v40 = vpop.f32.mrf.mxu0  ;;  %v1836_v24 = vadd.f32 %v15303_v4, %v15302_v17  ;;  %v2228_v20 = vadd.f32 %v13187_v21, %v1824_v5  ;;  %v11462_v4 = vld [vmem:[%s15219_s4 + $0x2a0] sm:$0xff]  }
 0x390   :  { %v13517_v38 = vadd.f32 %v2183_v40, %v15301_v61  ;;  %10287 = vmatpush3.bf16.msra.mxu1 %v11450_v63  ;;  %4392 = vmatprep.mubr.bf16.mxu1 %v10046_v18  ;;  %v11457_v63 = vld [vmem:[%s15219_s4 + $0x548] sm:$0xff]   ;;  %v15304_v40 = vld [vmem:[#allocation45_spill] sm:$0xff] }
 0x391   :  { %10405 = vmatpush3.bf16.msra.mxu0 %v11451_v41  ;;  %v2185_v11 = vpop.f32.mrf.mxu0  ;;  %10288 = vmatprep.subr.bf16.mxu1 %v11452_v58  ;;  %v2233_v9 = vadd.f32 %v13227_v29, %v1836_v24  ;;  %v11458_v41 = vld [vmem:[%s15219_s4 + $0x2a8] sm:$0xff]   ;;  %v11460_v29 = vld [vmem:[%s15219_s4 + $0x2e0] sm:$0xff]  }
 0x392   :  { %v13525_v44 = vadd.f32 %v2185_v11, %v1910_v49  ;;  %10406 = vmatprep.subr.bf16.mxu0 %v11453_v22  ;;  %v11459_v58 = vld [vmem:[%s15219_s4 + $0x508] sm:$0xff]   ;;  %v2300_v22 = vadd.f32 %v13054_v28, %v2228_v20  ;;  %v15307_v49 = vld [vmem:[#allocation49_spill] sm:$0xff]  ;;  %v11463_v11 = vld [vmem:[%s15219_s4 + $0x500] sm:$0xff]  }
 0x393   :  { %v2189_v18 = vpop.f32.mrf.mxu0  ;;  %v1920_v61 = vadd.f32 %v15307_v49, %v15306_v62  ;;  %v11464_v20 = vld [vmem:[%s15219_s4 + $0x2d8] sm:$0xff]   ;;  %v11469_v49 = vld [vmem:[%s15219_s4 + $0x670] sm:$0xff]  }
 0x394   :  { %v13532_v34 = vadd.f32 %v2189_v18, %v15304_v40  ;;  %10289 = vmatpush3.bf16.msra.mxu1 %v11454_v43  ;;  %v11461_v43 = vld [vmem:[%s15219_s4 + $0x540] sm:$0xff]   ;;  %v11465_v18 = vld [vmem:[%s15219_s4 + $0x678] sm:$0xff]  }
 0x395   :  { %10407 = vmatpush3.bf16.msra.mxu0 %v11455_v56  ;;  %v2191_v21 = vpop.f32.mrf.mxu0  ;;  %10290 = vmatprep.subr.bf16.mxu1 %v11456_v53  ;;  %v2305_v56 = vadd.f32 %v13058_v35, %v2233_v9  ;;  %v15308_v53 = vld [vmem:[#allocation48_spill] sm:$0xff] }
 0x396   :  { %v13545_v5 = vadd.f32 %v2191_v21, %v15305_v2  ;;  %10408 = vmatprep.subr.bf16.mxu0 %v11457_v63  ;;  %v2364_v63 = vmax.f32 %v2300_v22, 0.0  ;;  %v11466_v21 = vld [vmem:[%s15219_s4 + $0x298] sm:$0xff]  }
 0x397   :  { %v2193_v8 = vpop.f32.mrf.mxu0  ;;  %v2369_v40 = vmax.f32 %v2305_v56, 0.0  ;;  %v11467_v22 = vld [vmem:[%s15219_s4 + $0x638] sm:$0xff]   ;;  %v11468_v56 = vld [vmem:[%s15219_s4 + $0x2d0] sm:$0xff]  }
 0x398   :  { %v13554_v17 = vadd.f32 %v2193_v8, %v15308_v53  ;;  %10291 = vmatpush3.bf16.msra.mxu1 %v11458_v41  ;;  %v15310_v8 = vld [vmem:[#allocation51_spill] sm:$0xff] }
 0x399   :  { %10409 = vmatpush3.bf16.msra.mxu0 %v11459_v58  ;;  %v2195_v24 = vpop.f32.mrf.mxu0  ;;  %10292 = vmatprep.subr.bf16.mxu1 %v11460_v29  ;;  %v15309_v58 = vld [vmem:[#allocation50_spill] sm:$0xff] }
 0x39a   :  { %v13565_v9 = vadd.f32 %v2195_v24, %v1920_v61  ;;  %10410 = vmatprep.subr.bf16.mxu0 %v11461_v43  ;;  %v10055_v43 = vpack.c.bf16 %v2364_v63, %v2364_v63  ;;  %v10060_v61 = vpack.c.bf16 %v2369_v40, %v2369_v40  ;;  %v11471_v24 = vld [vmem:[%s15219_s4 + $0x630] sm:$0xff]   ;;  %v11472_v40 = vld [vmem:[%s15219_s4 + $0x2c8] sm:$0xff]  }
 0x39b   :  { %v2199_v41 = vpop.f32.mrf.mxu0 }
 0x39c   :  { %v13574_v29 = vadd.f32 %v2199_v41, %v15309_v58  ;;  %10293 = vmatpush3.bf16.msra.mxu1 %v11462_v4  ;;  %v11470_v4 = vld [vmem:[%s15219_s4 + $0x290] sm:$0xff]  }
 0x39d   :  { %10411 = vmatpush3.bf16.msra.mxu0 %v11463_v11  ;;  %v2201_v2 = vpop.f32.mrf.mxu0  ;;  %10294 = vmatprep.subr.bf16.mxu1 %v11464_v20  ;;  %v15311_v11 = vld [vmem:[#allocation3_spill] sm:$0xff]  ;;  %v15312_v20 = vld [vmem:[#allocation4_spill] sm:$0xff] }
 0x39e   :  { %v13580_v62 = vadd.f32 %v2201_v2, %v15310_v8  ;;  %10440 = vmatprep.subr.bf16.mxu0 %v11465_v18  ;;  %v1810_v63 = vadd.f32 %v15312_v20, %v15311_v11  ;;  %v15313_v18 = vld [vmem:[#allocation53_spill] sm:$0xff]  ;;  %v11473_v2 = vld [vmem:[%s15219_s4 + $0x668] sm:$0xff]  }
 0x39f   :  { %v2203_v53 = vpop.f32.mrf.mxu0  ;;  %v11482_v11 = vld [vmem:[%s15219_s4 + $0x3b8] sm:$0xff]  }
 0x3a0   :  { %5093 = vmatmul.mubr.bf16.vlgmr.msra.gmra.mxu0 %v10055_v43  ;;  %v13597_v41 = vadd.f32 %v2203_v53, %v15313_v18  ;;  %10295 = vmatpush3.bf16.msra.mxu1 %v11466_v21  ;;  %v2223_v58 = vadd.f32 %v13145_v45, %v1810_v63  ;;  %v11474_v43 = vld [vmem:[%s15219_s4 + $0x288] sm:$0xff]   ;;  %v2290_v45 = vadd.f32 %v13054_v28, %v13101_v59  ;;  %v11480_v59 = vld [vmem:[%s15219_s4 + $0x3f8] sm:$0xff]   ;;  %v11484_v63 = vld [vmem:[%s15219_s4 + $0x3f0] sm:$0xff]  }
 0x3a1   :  { %10441 = vmatpush3.bf16.msra.mxu0 %v11467_v22  ;;  %5372 = vmatprep.mubr.bf16.mxu0 %v10060_v61  ;;  %v11475_v21 = vld [vmem:[%s15219_s4 + $0x628] sm:$0xff]   ;;  %v11476_v22 = vld [vmem:[%s15219_s4 + $0x2c0] sm:$0xff]   ;;  %v11483_v20 = vld [vmem:[%s15219_s4 + $0x618] sm:$0xff]  }
 0x3a2   :  { %10296 = vmatprep.subr.bf16.mxu1 %v11468_v56  ;;  %10442 = vmatprep.subr.bf16.mxu0 %v11469_v49  ;;  %v2295_v8 = vadd.f32 %v13058_v35, %v2223_v58  ;;  %v11477_v56 = vld [vmem:[%s15219_s4 + $0x660] sm:$0xff]   ;;  %v2354_v53 = vmax.f32 %v2290_v45, 0.0  ;;  %v11485_v58 = vld [vmem:[%s15219_s4 + $0x650] sm:$0xff]   ;;  %v15315_v45 = vld [vmem:[#allocation13_spill] sm:$0xff] }
 0x3a3   :  { %v11478_v49 = vld [vmem:[%s15219_s4 + $0x280] sm:$0xff]  }
 0x3a4   :  { %10297 = vmatpush3.bf16.msra.mxu1 %v11470_v4  ;;  %v11479_v61 = vld [vmem:[%s15219_s4 + $0x620] sm:$0xff]   ;;  %v11481_v4 = vld [vmem:[%s15219_s4 + $0x658] sm:$0xff]   ;;  %v10045_v18 = vpack.c.bf16 %v2354_v53, %v2354_v53 }
 0x3a5   :  { %10443 = vmatpush3.bf16.msra.mxu0 %v11471_v24  ;;  %10298 = vmatprep.subr.bf16.mxu1 %v11472_v40  ;;  %v2359_v24 = vmax.f32 %v2295_v8, 0.0 }
 0x3a6   :  { %10444 = vmatprep.subr.bf16.mxu0 %v11473_v2  ;;  %v11486_v2 = vld [vmem:[%s15219_s4 + $0x3b0] sm:$0xff]  }
 0x3a7   :  { %v10050_v40 = vpack.c.bf16 %v2359_v24, %v2359_v24  ;;  %v11490_v24 = vld [vmem:[%s15219_s4 + $0x3a8] sm:$0xff]  }
 0x3a8   :  { %10299 = vmatpush3.bf16.msra.mxu1 %v11474_v43  ;;  %v11487_v43 = vld [vmem:[%s15219_s4 + $0x610] sm:$0xff]  }
 0x3a9   :  { %10445 = vmatpush3.bf16.msra.mxu0 %v11475_v21  ;;  %10300 = vmatprep.subr.bf16.mxu1 %v11476_v22  ;;  %v11488_v21 = vld [vmem:[%s15219_s4 + $0x3e8] sm:$0xff]   ;;  %v15314_v22 = vld [vmem:[#allocation10_spill] sm:$0xff] }
 0x3aa   :  { %10446 = vmatprep.subr.bf16.mxu0 %v11477_v56  ;;  %v1834_v8 = vadd.f32 %v15315_v45, %v15314_v22  ;;  %v15316_v56 = vld [vmem:[#allocation18_spill] sm:$0xff]  ;;  %v11499_v45 = vld [vmem:[%s15219_s4 + $0x738] sm:$0xff]  }
 0x3ac   :  { %10301 = vmatpush3.bf16.msra.mxu1 %v11478_v49  ;;  %v15317_v49 = vld [vmem:[#allocation20_spill] sm:$0xff]  ;;  %v2232_v53 = vadd.f32 %v13222_v16, %v1834_v8  ;;  %v11492_v16 = vld [vmem:[%s15219_s4 + $0x3e0] sm:$0xff]  }
 0x3ad   :  { %10447 = vmatpush3.bf16.msra.mxu0 %v11479_v61  ;;  %10330 = vmatprep.subr.bf16.mxu1 %v11480_v59  ;;  %v1846_v61 = vadd.f32 %v15317_v49, %v15316_v56  ;;  %v11489_v59 = vld [vmem:[%s15219_s4 + $0x648] sm:$0xff]   ;;  %v11500_v8 = vld [vmem:[%s15219_s4 + $0x3d0] sm:$0xff]  }
 0x3ae   :  { %10448 = vmatprep.subr.bf16.mxu0 %v11481_v4  ;;  %v11501_v49 = vld [vmem:[%s15219_s4 + $0x770] sm:$0xff]  }
 0x3af   :  { %4393 = vmatmul.mubr.bf16.vlgmr.msra.gmra.mxu1 %v10045_v18  ;;  %v2237_v4 = vadd.f32 %v13265_v51, %v1846_v61  ;;  %v2304_v51 = vadd.f32 %v13054_v28, %v2232_v53  ;;  %v11502_v61 = vld [vmem:[%s15219_s4 + $0x390] sm:$0xff]  }
 0x3b0   :  { %10331 = vmatpush3.bf16.msra.mxu1 %v11482_v11  ;;  %4672 = vmatprep.mubr.bf16.mxu1 %v10050_v40  ;;  %v11491_v11 = vld [vmem:[%s15219_s4 + $0x608] sm:$0xff]   ;;  %v11495_v40 = vld [vmem:[%s15219_s4 + $0x600] sm:$0xff]  }
 0x3b1   :  { %10449 = vmatpush3.bf16.msra.mxu0 %v11483_v20  ;;  %10332 = vmatprep.subr.bf16.mxu1 %v11484_v63  ;;  %v11493_v20 = vld [vmem:[%s15219_s4 + $0x640] sm:$0xff]   ;;  %v2309_v18 = vadd.f32 %v13058_v35, %v2237_v4  ;;  %v11504_v4 = vld [vmem:[%s15219_s4 + $0x3c8] sm:$0xff]  }
 0x3b2   :  { %10450 = vmatprep.subr.bf16.mxu0 %v11485_v58  ;;  %v11494_v63 = vld [vmem:[%s15219_s4 + $0x3a0] sm:$0xff]   ;;  %v11496_v58 = vld [vmem:[%s15219_s4 + $0x3d8] sm:$0xff]  }
 0x3b3   :  { %v2373_v22 = vmax.f32 %v2309_v18, 0.0  ;;  %v11507_v18 = vld [vmem:[%s15219_s4 + $0x728] sm:$0xff]  }
 0x3b4   :  { %10333 = vmatpush3.bf16.msra.mxu1 %v11486_v2  ;;  %v11497_v2 = vld [vmem:[%s15219_s4 + $0x778] sm:$0xff]  }
 0x3b5   :  { %10451 = vmatpush3.bf16.msra.mxu0 %v11487_v43  ;;  %10334 = vmatprep.subr.bf16.mxu1 %v11488_v21  ;;  %v2368_v43 = vmax.f32 %v2304_v51, 0.0  ;;  %v11498_v21 = vld [vmem:[%s15219_s4 + $0x398] sm:$0xff]   ;;  %v10064_v53 = vpack.c.bf16 %v2373_v22, %v2373_v22  ;;  %v11505_v51 = vld [vmem:[%s15219_s4 + $0x768] sm:$0xff]  }
 0x3b6   :  { %10452 = vmatprep.subr.bf16.mxu0 %v11489_v59  ;;  %v11503_v59 = vld [vmem:[%s15219_s4 + $0x730] sm:$0xff]  }
 0x3b7   :  { %v10059_v56 = vpack.c.bf16 %v2368_v43, %v2368_v43  ;;  %v11510_v43 = vld [vmem:[%s15219_s4 + $0x380] sm:$0xff]  }
 0x3b8   :  { %10335 = vmatpush3.bf16.msra.mxu1 %v11490_v24  ;;  %v15318_v24 = vld [vmem:[#allocation5_spill] sm:$0xff] }
 0x3b9   :  { %10453 = vmatpush3.bf16.msra.mxu0 %v11491_v11  ;;  %10336 = vmatprep.subr.bf16.mxu1 %v11492_v16  ;;  %v15319_v11 = vld [vmem:[#allocation7_spill] sm:$0xff] }
 0x3ba   :  { %10454 = vmatprep.subr.bf16.mxu0 %v11493_v20  ;;  %v1820_v16 = vadd.f32 %v15319_v11, %v15318_v24  ;;  %v11518_v24 = vld [vmem:[%s15219_s4 + $0x4b0] sm:$0xff]  }
 0x3bb   :  { %v11519_v11 = vld [vmem:[%s15219_s4 + $0x710] sm:$0xff]  }
 0x3bc   :  { %10337 = vmatpush3.bf16.msra.mxu1 %v11494_v63  ;;  %v2227_v20 = vadd.f32 %v13176_v50, %v1820_v16  ;;  %v11506_v63 = vld [vmem:[%s15219_s4 + $0x388] sm:$0xff]   ;;  %v2294_v50 = vadd.f32 %v13054_v28, %v13139_v15  ;;  %v11512_v15 = vld [vmem:[%s15219_s4 + $0x4f8] sm:$0xff]  }
 0x3bd   :  { %10455 = vmatpush3.bf16.msra.mxu0 %v11495_v40  ;;  %10338 = vmatprep.subr.bf16.mxu1 %v11496_v58  ;;  %v11508_v40 = vld [vmem:[%s15219_s4 + $0x3c0] sm:$0xff]   ;;  %v11520_v16 = vld [vmem:[%s15219_s4 + $0x4e8] sm:$0xff]  }
 0x3be   :  { %10484 = vmatprep.subr.bf16.mxu0 %v11497_v2  ;;  %v2299_v58 = vadd.f32 %v13058_v35, %v2227_v20  ;;  %v11509_v2 = vld [vmem:[%s15219_s4 + $0x760] sm:$0xff]   ;;  %v2358_v22 = vmax.f32 %v2294_v50, 0.0  ;;  %v15320_v20 = vld [vmem:[#allocation16_spill] sm:$0xff] }
 0x3c0   :  { %5373 = vmatmul.mubr.bf16.vlgmr.msra.gmra.mxu0 %v10059_v56  ;;  %10339 = vmatpush3.bf16.msra.mxu1 %v11498_v21  ;;  %v11511_v21 = vld [vmem:[%s15219_s4 + $0x720] sm:$0xff]   ;;  %v11514_v56 = vld [vmem:[%s15219_s4 + $0x4b8] sm:$0xff]  }
 0x3c1   :  { %10485 = vmatpush3.bf16.msra.mxu0 %v11499_v45  ;;  %5652 = vmatprep.mubr.bf16.mxu0 %v10064_v53  ;;  %v11513_v45 = vld [vmem:[%s15219_s4 + $0x758] sm:$0xff]   ;;  %v10049_v53 = vpack.c.bf16 %v2358_v22, %v2358_v22  ;;  %v11523_v22 = vld [vmem:[%s15219_s4 + $0x708] sm:$0xff]  }
 0x3c2   :  { %10340 = vmatprep.subr.bf16.mxu1 %v11500_v8  ;;  %10486 = vmatprep.subr.bf16.mxu0 %v11501_v49  ;;  %v2363_v8 = vmax.f32 %v2299_v58, 0.0  ;;  %v11515_v49 = vld [vmem:[%s15219_s4 + $0x718] sm:$0xff]  }
 0x3c4   :  { %10341 = vmatpush3.bf16.msra.mxu1 %v11502_v61  ;;  %v11516_v61 = vld [vmem:[%s15219_s4 + $0x4f0] sm:$0xff]  }
 0x3c5   :  { %10487 = vmatpush3.bf16.msra.mxu0 %v11503_v59  ;;  %10342 = vmatprep.subr.bf16.mxu1 %v11504_v4  ;;  %v10054_v59 = vpack.c.bf16 %v2363_v8, %v2363_v8  ;;  %v11517_v4 = vld [vmem:[%s15219_s4 + $0x750] sm:$0xff]  }
 0x3c6   :  { %10488 = vmatprep.subr.bf16.mxu0 %v11505_v51  ;;  %v15321_v51 = vld [vmem:[#allocation19_spill] sm:$0xff] }
 0x3c8   :  { %10343 = vmatpush3.bf16.msra.mxu1 %v11506_v63  ;;  %v1844_v63 = vadd.f32 %v15321_v51, %v15320_v20  ;;  %v11533_v20 = vld [vmem:[%s15219_s4 + $0x870] sm:$0xff]  }
 0x3c9   :  { %10489 = vmatpush3.bf16.msra.mxu0 %v11507_v18  ;;  %10344 = vmatprep.subr.bf16.mxu1 %v11508_v40  ;;  %v15322_v18 = vld [vmem:[#allocation23_spill] sm:$0xff]  ;;  %v15323_v40 = vld [vmem:[#allocation25_spill] sm:$0xff]  ;;  %v11534_v51 = vld [vmem:[%s15219_s4 + $0x490] sm:$0xff]  }
 0x3ca   :  { %10490 = vmatprep.subr.bf16.mxu0 %v11509_v2  ;;  %v1856_v50 = vadd.f32 %v15323_v40, %v15322_v18  ;;  %v2236_v58 = vadd.f32 %v13257_v23, %v1844_v63  ;;  %v11521_v2 = vld [vmem:[%s15219_s4 + $0x748] sm:$0xff]   ;;  %v11524_v23 = vld [vmem:[%s15219_s4 + $0x4e0] sm:$0xff]   ;;  %v11535_v18 = vld [vmem:[%s15219_s4 + $0x830] sm:$0xff]  }
 0x3cb   :  { %v11536_v40 = vld [vmem:[%s15219_s4 + $0x4c8] sm:$0xff]  }
 0x3cc   :  { %10345 = vmatpush3.bf16.msra.mxu1 %v11510_v43  ;;  %v2241_v43 = vadd.f32 %v13302_v60, %v1856_v50  ;;  %v2308_v60 = vadd.f32 %v13054_v28, %v2236_v58  ;;  %v15324_v50 = vld [vmem:[#allocation9_spill] sm:$0xff]  ;;  %v15325_v58 = vld [vmem:[#allocation11_spill] sm:$0xff] }
 0x3cd   :  { %10491 = vmatpush3.bf16.msra.mxu0 %v11511_v21  ;;  %10374 = vmatprep.subr.bf16.mxu1 %v11512_v15  ;;  %v11522_v21 = vld [vmem:[%s15219_s4 + $0x4a8] sm:$0xff]   ;;  %v11525_v15 = vld [vmem:[%s15219_s4 + $0x740] sm:$0xff]  }
 0x3ce   :  { %10492 = vmatprep.subr.bf16.mxu0 %v11513_v45  ;;  %v11526_v45 = vld [vmem:[%s15219_s4 + $0x4a0] sm:$0xff]   ;;  %v2313_v8 = vadd.f32 %v13058_v35, %v2241_v43 }
 0x3cf   :  { %4673 = vmatmul.mubr.bf16.vlgmr.msra.gmra.mxu1 %v10049_v53  ;;  %v2372_v53 = vmax.f32 %v2308_v60, 0.0 }
 0x3d0   :  { %10375 = vmatpush3.bf16.msra.mxu1 %v11514_v56  ;;  %4952 = vmatprep.mubr.bf16.mxu1 %v10054_v59  ;;  %v11527_v56 = vld [vmem:[%s15219_s4 + $0x700] sm:$0xff]   ;;  %v11530_v59 = vld [vmem:[%s15219_s4 + $0x498] sm:$0xff]  }
 0x3d1   :  { %10493 = vmatpush3.bf16.msra.mxu0 %v11515_v49  ;;  %10376 = vmatprep.subr.bf16.mxu1 %v11516_v61  ;;  %v11528_v49 = vld [vmem:[%s15219_s4 + $0x4d8] sm:$0xff]  }
 0x3d2   :  { %10494 = vmatprep.subr.bf16.mxu0 %v11517_v4  ;;  %v11529_v61 = vld [vmem:[%s15219_s4 + $0x878] sm:$0xff]   ;;  %v2377_v4 = vmax.f32 %v2313_v8, 0.0  ;;  %v11542_v8 = vld [vmem:[%s15219_s4 + $0x480] sm:$0xff]  }
 0x3d4   :  { %10377 = vmatpush3.bf16.msra.mxu1 %v11518_v24  ;;  %v11531_v24 = vld [vmem:[%s15219_s4 + $0x838] sm:$0xff]   ;;  %v10068_v63 = vpack.c.bf16 %v2377_v4, %v2377_v4 }
 0x3d5   :  { %10495 = vmatpush3.bf16.msra.mxu0 %v11519_v11  ;;  %10378 = vmatprep.subr.bf16.mxu1 %v11520_v16  ;;  %v11532_v11 = vld [vmem:[%s15219_s4 + $0x4d0] sm:$0xff]   ;;  %v10063_v16 = vpack.c.bf16 %v2372_v53, %v2372_v53  ;;  %v11547_v4 = vld [vmem:[%s15219_s4 + $0x818] sm:$0xff]  }
 0x3d6   :  { %10496 = vmatprep.subr.bf16.mxu0 %v11521_v2  ;;  %v1830_v2 = vadd.f32 %v15325_v58, %v15324_v50  ;;  %v11552_v50 = vld [vmem:[%s15219_s4 + $0x5e8] sm:$0xff]   ;;  %v15326_v58 = vld [vmem:[#allocation28_spill] sm:$0xff] }
 0x3d8   :  { %10379 = vmatpush3.bf16.msra.mxu1 %v11522_v21  ;;  %v2231_v43 = vadd.f32 %v13210_v32, %v1830_v2  ;;  %v11537_v21 = vld [vmem:[%s15219_s4 + $0x868] sm:$0xff]   ;;  %v2298_v32 = vadd.f32 %v13054_v28, %v13171_v26  ;;  %v11544_v26 = vld [vmem:[%s15219_s4 + $0x5f8] sm:$0xff]  }
 0x3d9   :  { %10497 = vmatpush3.bf16.msra.mxu0 %v11523_v22  ;;  %10380 = vmatprep.subr.bf16.mxu1 %v11524_v23  ;;  %v11538_v22 = vld [vmem:[%s15219_s4 + $0x488] sm:$0xff]   ;;  %v15327_v2 = vld [vmem:[#allocation29_spill] sm:$0xff] }
 0x3da   :  { %10498 = vmatprep.subr.bf16.mxu0 %v11525_v15  ;;  %v11539_v23 = vld [vmem:[%s15219_s4 + $0x828] sm:$0xff]   ;;  %v11540_v15 = vld [vmem:[%s15219_s4 + $0x4c0] sm:$0xff]   ;;  %v2303_v60 = vadd.f32 %v13058_v35, %v2231_v43  ;;  %v1866_v43 = vadd.f32 %v15327_v2, %v15326_v58  ;;  %v11565_v58 = vld [vmem:[%s15219_s4 + $0x970] sm:$0xff]  }
 0x3db   :  { %v11566_v2 = vld [vmem:[%s15219_s4 + $0x590] sm:$0xff]  }
 0x3dc   :  { %10381 = vmatpush3.bf16.msra.mxu1 %v11526_v45  ;;  %v11541_v45 = vld [vmem:[%s15219_s4 + $0x860] sm:$0xff]   ;;  %v2367_v53 = vmax.f32 %v2303_v60, 0.0  ;;  %v2245_v60 = vadd.f32 %v13343_v27, %v1866_v43 }
 0x3dd   :  { %10499 = vmatpush3.bf16.msra.mxu0 %v11527_v56  ;;  %10382 = vmatprep.subr.bf16.mxu1 %v11528_v49  ;;  %v11543_v56 = vld [vmem:[%s15219_s4 + $0x820] sm:$0xff]   ;;  %v2362_v49 = vmax.f32 %v2298_v32, 0.0  ;;  %v11553_v32 = vld [vmem:[%s15219_s4 + $0x848] sm:$0xff]  }
 0x3de   :  { %10528 = vmatprep.subr.bf16.mxu0 %v11529_v61  ;;  %v11545_v61 = vld [vmem:[%s15219_s4 + $0x858] sm:$0xff]   ;;  %v11557_v27 = vld [vmem:[%s15219_s4 + $0x840] sm:$0xff]  }
 0x3e0   :  { %5653 = vmatmul.mubr.bf16.vlgmr.msra.gmra.mxu0 %v10063_v16  ;;  %10383 = vmatpush3.bf16.msra.mxu1 %v11530_v59  ;;  %v11546_v59 = vld [vmem:[%s15219_s4 + $0x5b8] sm:$0xff]   ;;  %v10053_v16 = vpack.c.bf16 %v2362_v49, %v2362_v49  ;;  %v11556_v49 = vld [vmem:[%s15219_s4 + $0x5e0] sm:$0xff]  }
 0x3e1   :  { %10529 = vmatpush3.bf16.msra.mxu0 %v11531_v24  ;;  %5932 = vmatprep.mubr.bf16.mxu0 %v10068_v63  ;;  %v11548_v24 = vld [vmem:[%s15219_s4 + $0x5f0] sm:$0xff]  }
 0x3e2   :  { %10384 = vmatprep.subr.bf16.mxu1 %v11532_v11  ;;  %10530 = vmatprep.subr.bf16.mxu0 %v11533_v20  ;;  %v13862_v11 = vpop.f32.mrf.mxu1  ;;  %v10058_v20 = vpack.c.bf16 %v2367_v53, %v2367_v53  ;;  %v11550_v63 = vld [vmem:[%s15219_s4 + $0x5b0] sm:$0xff]   ;;  %v2317_v53 = vadd.f32 %v13058_v35, %v2245_v60  ;;  %v15330_v60 = vld [vmem:[#allocation17_spill] sm:$0xff] }
 0x3e4   :  { %10385 = vmatpush3.bf16.msra.mxu1 %v11534_v51  ;;  %v11549_v51 = vld [vmem:[%s15219_s4 + $0x850] sm:$0xff]  }
 0x3e5   :  { %10531 = vmatpush3.bf16.msra.mxu0 %v11535_v18  ;;  %10386 = vmatprep.subr.bf16.mxu1 %v11536_v40  ;;  %v11551_v40 = vld [vmem:[%s15219_s4 + $0x810] sm:$0xff]  }
 0x3e6   :  { %10532 = vmatprep.subr.bf16.mxu0 %v11537_v21 }
 0x3e8   :  { %10387 = vmatpush3.bf16.msra.mxu1 %v11538_v22  ;;  %v15328_v22 = vld [vmem:[#allocation24_spill] sm:$0xff] }
 0x3e9   :  { %10533 = vmatpush3.bf16.msra.mxu0 %v11539_v23  ;;  %10388 = vmatprep.subr.bf16.mxu1 %v11540_v15  ;;  %v2240_v23 = vadd.f32 %v13296_v10, %v15328_v22  ;;  %v11567_v22 = vld [vmem:[%s15219_s4 + $0x930] sm:$0xff]  }
 0x3ea   :  { %10534 = vmatprep.subr.bf16.mxu0 %v11541_v45 }
 0x3ec   :  { %10389 = vmatpush3.bf16.msra.mxu1 %v11542_v8  ;;  %v11554_v8 = vld [vmem:[%s15219_s4 + $0x5a8] sm:$0xff]  }
 0x3ed   :  { %10535 = vmatpush3.bf16.msra.mxu0 %v11543_v56  ;;  %10418 = vmatprep.subr.bf16.mxu1 %v11544_v26  ;;  %v11555_v56 = vld [vmem:[%s15219_s4 + $0x808] sm:$0xff]   ;;  %v2312_v26 = vadd.f32 %v13054_v28, %v2240_v23 }
 0x3ee   :  { %10536 = vmatprep.subr.bf16.mxu0 %v11545_v61  ;;  %v11558_v61 = vld [vmem:[%s15219_s4 + $0x5a0] sm:$0xff]   ;;  %v11568_v23 = vld [vmem:[%s15219_s4 + $0x5c8] sm:$0xff]  }
 0x3ef   :  { %4953 = vmatmul.mubr.bf16.vlgmr.msra.gmra.mxu1 %v10053_v16  ;;  %v10192_v18 = vpop.f32.mrf.mxu1  ;;  %v2376_v16 = vmax.f32 %v2312_v26, 0.0  ;;  %v11570_v26 = vld [vmem:[%s15219_s4 + $0x588] sm:$0xff]  }
 0x3f0   :  { %10419 = vmatpush3.bf16.msra.mxu1 %v11546_v59  ;;  %5232 = vmatprep.mubr.bf16.mxu1 %v10058_v20  ;;  %v11559_v59 = vld [vmem:[%s15219_s4 + $0x800] sm:$0xff]   ;;  %v11562_v20 = vld [vmem:[%s15219_s4 + $0x598] sm:$0xff]  }
 0x3f1   :  { %10537 = vmatpush3.bf16.msra.mxu0 %v11547_v4  ;;  %v10193_v21 = vpop.f32.mrf.mxu1  ;;  %10420 = vmatprep.subr.bf16.mxu1 %v11548_v24  ;;  %v11560_v4 = vld [vmem:[%s15219_s4 + $0x5d8] sm:$0xff]  }
 0x3f2   :  { %v13880_v15 = vadd.f32 %v10193_v21, %v10192_v18  ;;  %10538 = vmatprep.subr.bf16.mxu0 %v11549_v51  ;;  %v11561_v24 = vld [vmem:[%s15219_s4 + $0x978] sm:$0xff]   ;;  %v2381_v51 = vmax.f32 %v2317_v53, 0.0  ;;  %v11564_v18 = vld [vmem:[%s15219_s4 + $0x5d0] sm:$0xff]   ;;  %v2302_v53 = vadd.f32 %v13054_v28, %v13203_v54 }
 0x3f3   :  { %v10195_v45 = vpop.f32.mrf.mxu1 }
 0x3f4   :  { %10421 = vmatpush3.bf16.msra.mxu1 %v11550_v63  ;;  %v11563_v63 = vld [vmem:[%s15219_s4 + $0x938] sm:$0xff]   ;;  %v10072_v43 = vpack.c.bf16 %v2381_v51, %v2381_v51  ;;  %v2366_v54 = vmax.f32 %v2302_v53, 0.0 }
 0x3f5   :  { %10539 = vmatpush3.bf16.msra.mxu0 %v11551_v40  ;;  %v10196_v10 = vpop.f32.mrf.mxu1  ;;  %10422 = vmatprep.subr.bf16.mxu1 %v11552_v50  ;;  %v13921_v40 = vpop.f32.mrf.mxu0  ;;  %v10067_v50 = vpack.c.bf16 %v2376_v16, %v2376_v16  ;;  %v11574_v16 = vld [vmem:[%s15219_s4 + $0x580] sm:$0xff]   ;;  %v11576_v51 = vld [vmem:[%s15219_s4 + $0x6f8] sm:$0xff]  }
 0x3f6   :  { %10540 = vmatprep.subr.bf16.mxu0 %v11553_v32  ;;  %v15329_v32 = vld [vmem:[#allocation15_spill] sm:$0xff] }
 0x3f7   :  { %v1840_v45 = vadd.f32 %v15330_v60, %v15329_v32  ;;  %v11582_v32 = vld [vmem:[%s15219_s4 + $0x6b0] sm:$0xff]  }
 0x3f8   :  { %10423 = vmatpush3.bf16.msra.mxu1 %v11554_v8 }
 0x3f9   :  { %10541 = vmatpush3.bf16.msra.mxu0 %v11555_v56  ;;  %10424 = vmatprep.subr.bf16.mxu1 %v11556_v49  ;;  %v2235_v56 = vadd.f32 %v13246_v7, %v1840_v45  ;;  %v11569_v49 = vld [vmem:[%s15219_s4 + $0x968] sm:$0xff]   ;;  %v11572_v7 = vld [vmem:[%s15219_s4 + $0x5c0] sm:$0xff]   ;;  %v11583_v45 = vld [vmem:[%s15219_s4 + $0x910] sm:$0xff]  }
 0x3fa   :  { %10542 = vmatprep.subr.bf16.mxu0 %v11557_v27 }
 0x3fc   :  { %10425 = vmatpush3.bf16.msra.mxu1 %v11558_v61  ;;  %v11571_v61 = vld [vmem:[%s15219_s4 + $0x928] sm:$0xff]  }
 0x3fd   :  { %10543 = vmatpush3.bf16.msra.mxu0 %v11559_v59  ;;  %10426 = vmatprep.subr.bf16.mxu1 %v11560_v4  ;;  %v2307_v4 = vadd.f32 %v13058_v35, %v2235_v56 }
 0x3fe   :  { %10572 = vmatprep.subr.bf16.mxu0 %v11561_v24  ;;  %v11573_v24 = vld [vmem:[%s15219_s4 + $0x960] sm:$0xff]  }
 0x3ff   :  { %v10280_v21 = vpop.f32.mrf.mxu0 }
 0x400   :  { %5933 = vmatmul.mubr.bf16.vlgmr.msra.gmra.mxu0 %v10067_v50  ;;  %10427 = vmatpush3.bf16.msra.mxu1 %v11562_v20  ;;  %v11575_v20 = vld [vmem:[%s15219_s4 + $0x920] sm:$0xff]   ;;  %v11578_v50 = vld [vmem:[%s15219_s4 + $0x6b8] sm:$0xff]  }
 0x401   :  { %10573 = vmatpush3.bf16.msra.mxu0 %v11563_v63  ;;  %6212 = vmatprep.mubr.bf16.mxu0 %v10072_v43  ;;  %v10281_v8 = vpop.f32.mrf.mxu0  ;;  %v11577_v63 = vld [vmem:[%s15219_s4 + $0x958] sm:$0xff]   ;;  %v11580_v43 = vld [vmem:[%s15219_s4 + $0x6f0] sm:$0xff]  }
 0x402   :  { %v13938_v10 = vadd.f32 %v10281_v8, %v10280_v21  ;;  %10428 = vmatprep.subr.bf16.mxu1 %v11564_v18  ;;  %10574 = vmatprep.subr.bf16.mxu0 %v11565_v58  ;;  %v2371_v18 = vmax.f32 %v2307_v4, 0.0  ;;  %v11579_v58 = vld [vmem:[%s15219_s4 + $0x918] sm:$0xff]   ;;  %v11584_v8 = vld [vmem:[%s15219_s4 + $0x6e8] sm:$0xff]  }
 0x403   :  { %v10283_v27 = vpop.f32.mrf.mxu0  ;;  %v11587_v4 = vld [vmem:[%s15219_s4 + $0x908] sm:$0xff]  }
 0x404   :  { %10429 = vmatpush3.bf16.msra.mxu1 %v11566_v2  ;;  %v10057_v2 = vpack.c.bf16 %v2366_v54, %v2366_v54  ;;  %v10062_v21 = vpack.c.bf16 %v2371_v18, %v2371_v18  ;;  %v11590_v54 = vld [vmem:[%s15219_s4 + $0x6a0] sm:$0xff]  }
 0x405   :  { %10575 = vmatpush3.bf16.msra.mxu0 %v11567_v22  ;;  %v10284_v59 = vpop.f32.mrf.mxu0  ;;  %10430 = vmatprep.subr.bf16.mxu1 %v11568_v23  ;;  %v11581_v22 = vld [vmem:[%s15219_s4 + $0x950] sm:$0xff]  }
 0x406   :  { %10576 = vmatprep.subr.bf16.mxu0 %v11569_v49  ;;  %v11585_v49 = vld [vmem:[%s15219_s4 + $0x948] sm:$0xff]  }
 0x408   :  { %10431 = vmatpush3.bf16.msra.mxu1 %v11570_v26  ;;  %v8041_v26 = vsel %vm8040_vm5, %v13880_v15, 0.0  ;;  %v11588_v15 = vld [vmem:[%s15219_s4 + $0x6e0] sm:$0xff]  }
 0x409   :  { %10577 = vmatpush3.bf16.msra.mxu0 %v11571_v61  ;;  %10432 = vmatprep.subr.bf16.mxu1 %v11572_v7  ;;  %v11586_v7 = vld [vmem:[%s15219_s4 + $0x6a8] sm:$0xff]  }
 0x40a   :  { %10578 = vmatprep.subr.bf16.mxu0 %v11573_v24  ;;  %v2316_v24 = vadd.f32 %v13054_v28, %v13338_v12  ;;  %v11592_v12 = vld [vmem:[%s15219_s4 + $0x6d8] sm:$0xff]  }
 0x40c   :  { %10433 = vmatpush3.bf16.msra.mxu1 %v11574_v16  ;;  %v11589_v16 = vld [vmem:[%s15219_s4 + $0x940] sm:$0xff]  }
 0x40d   :  { %10579 = vmatpush3.bf16.msra.mxu0 %v11575_v20  ;;  %10462 = vmatprep.subr.bf16.mxu1 %v11576_v51  ;;  %v2321_v20 = vadd.f32 %v13058_v35, %v13385_v55  ;;  %v11591_v51 = vld [vmem:[%s15219_s4 + $0x900] sm:$0xff]   ;;  %v11593_v55 = vld [vmem:[%s15219_s4 + $0xa78] sm:$0xff]  }
 0x40e   :  { %10580 = vmatprep.subr.bf16.mxu0 %v11577_v63  ;;  %v2380_v63 = vmax.f32 %v2316_v24, 0.0  ;;  %v11604_v24 = vld [vmem:[%s15219_s4 + $0x6c0] sm:$0xff]  }
 0x40f   :  { %v10214_v23 = vpop.f32.mrf.mxu1  ;;  %5233 = vmatmul.mubr.bf16.vlgmr.msra.gmra.mxu1 %v10057_v2  ;;  %v2385_v18 = vmax.f32 %v2321_v20, 0.0 }
 0x410   :  { %10463 = vmatpush3.bf16.msra.mxu1 %v11578_v50  ;;  %5512 = vmatprep.mubr.bf16.mxu1 %v10062_v21  ;;  %v11594_v50 = vld [vmem:[%s15219_s4 + $0x698] sm:$0xff]   ;;  %v10071_v2 = vpack.c.bf16 %v2380_v63, %v2380_v63  ;;  %v11597_v21 = vld [vmem:[%s15219_s4 + $0xa70] sm:$0xff]  }
 0x411   :  { %10581 = vmatpush3.bf16.msra.mxu0 %v11579_v58  ;;  %v10215_v60 = vpop.f32.mrf.mxu1  ;;  %10464 = vmatprep.subr.bf16.mxu1 %v11580_v43  ;;  %v11595_v58 = vld [vmem:[%s15219_s4 + $0xa38] sm:$0xff]   ;;  %v11596_v43 = vld [vmem:[%s15219_s4 + $0x6d0] sm:$0xff]  }
 0x412   :  { %v10216_v56 = vadd.f32 %v10215_v60, %v10214_v23  ;;  %10582 = vmatprep.subr.bf16.mxu0 %v11581_v22  ;;  %v10076_v22 = vpack.c.bf16 %v2385_v18, %v2385_v18  ;;  %v15331_v23 = vld [vmem:[#allocation21_spill] sm:$0xff] }
 0x413   :  { %v10217_v27 = vpop.f32.mrf.mxu1  ;;  %v11608_v63 = vld [vmem:[%s15219_s4 + $0x7f8] sm:$0xff]  }
 0x414   :  { %v8042_v61 = vsel %vm8040_vm5, %v10216_v56, 0.0  ;;  %10465 = vmatpush3.bf16.msra.mxu1 %v11582_v32  ;;  %v15332_v32 = vld [vmem:[#allocation22_spill] sm:$0xff]  ;;  %v11599_v56 = vld [vmem:[%s15219_s4 + $0xa30] sm:$0xff]   ;;  %v11609_v18 = vld [vmem:[%s15219_s4 + $0xa58] sm:$0xff]  }
 0x415   :  { %v14000_v53 = vadd.f32 %v8042_v61, %v8041_v26  ;;  %10583 = vmatpush3.bf16.msra.mxu0 %v11583_v45  ;;  %v10218_v59 = vpop.f32.mrf.mxu1  ;;  %10466 = vmatprep.subr.bf16.mxu1 %v11584_v8  ;;  %v1850_v60 = vadd.f32 %v15332_v32, %v15331_v23  ;;  %v11598_v8 = vld [vmem:[%s15219_s4 + $0x690] sm:$0xff]   ;;  %v11601_v61 = vld [vmem:[%s15219_s4 + $0xa68] sm:$0xff]  }
 0x416   :  { %10584 = vmatprep.subr.bf16.mxu0 %v11585_v49  ;;  %v11600_v49 = vld [vmem:[%s15219_s4 + $0x6c8] sm:$0xff]   ;;  %v11614_v32 = vld [vmem:[%s15219_s4 + $0x7b0] sm:$0xff]  }
 0x417   :  { %v2239_v27 = vadd.f32 %v13287_v0, %v1850_v60  ;;  %v11603_v0 = vld [vmem:[%s15219_s4 + $0xa28] sm:$0xff]  }
 0x418   :  { %10467 = vmatpush3.bf16.msra.mxu1 %v11586_v7 }
 0x419   :  { %10585 = vmatpush3.bf16.msra.mxu0 %v11587_v4  ;;  %10468 = vmatprep.subr.bf16.mxu1 %v11588_v15  ;;  %v11602_v4 = vld [vmem:[%s15219_s4 + $0x688] sm:$0xff]   ;;  %v2306_v15 = vadd.f32 %v13054_v28, %v13241_v3  ;;  %v11606_v3 = vld [vmem:[%s15219_s4 + $0x680] sm:$0xff]  }
 0x41a   :  { %10586 = vmatprep.subr.bf16.mxu0 %v11589_v16  ;;  %v2311_v16 = vadd.f32 %v13058_v35, %v2239_v27 }
 0x41c   :  { %10469 = vmatpush3.bf16.msra.mxu1 %v11590_v54  ;;  %v11605_v54 = vld [vmem:[%s15219_s4 + $0xa60] sm:$0xff]  }
 0x41d   :  { %10587 = vmatpush3.bf16.msra.mxu0 %v11591_v51  ;;  %10470 = vmatprep.subr.bf16.mxu1 %v11592_v12  ;;  %v2370_v51 = vmax.f32 %v2306_v15, 0.0  ;;  %v11607_v12 = vld [vmem:[%s15219_s4 + $0xa20] sm:$0xff]   ;;  %v11619_v15 = vld [vmem:[%s15219_s4 + $0xa08] sm:$0xff]  }
 0x41e   :  { %10616 = vmatprep.subr.bf16.mxu0 %v11593_v55  ;;  %v2375_v55 = vmax.f32 %v2311_v16, 0.0  ;;  %v2325_v16 = vadd.f32 %v13058_v35, %v13421_v42  ;;  %v11625_v42 = vld [vmem:[%s15219_s4 + $0xb78] sm:$0xff]  }
 0x420   :  { %v10324_v45 = vpop.f32.mrf.mxu0  ;;  %6213 = vmatmul.mubr.bf16.vlgmr.msra.gmra.mxu0 %v10071_v2  ;;  %10471 = vmatpush3.bf16.msra.mxu1 %v11594_v50  ;;  %v11610_v50 = vld [vmem:[%s15219_s4 + $0x7b8] sm:$0xff]  }
 0x421   :  { %10617 = vmatpush3.bf16.msra.mxu0 %v11595_v58  ;;  %6492 = vmatprep.mubr.bf16.mxu0 %v10076_v22  ;;  %v10061_v58 = vpack.c.bf16 %v2370_v51, %v2370_v51  ;;  %v11611_v2 = vld [vmem:[%s15219_s4 + $0xa18] sm:$0xff]   ;;  %v11613_v22 = vld [vmem:[%s15219_s4 + $0xa50] sm:$0xff]   ;;  %v2389_v51 = vmax.f32 %v2325_v16, 0.0  ;;  %v11639_v16 = vld [vmem:[%s15219_s4 + $0xb20] sm:$0xff]  }
 0x422   :  { %v10325_v26 = vpop.f32.mrf.mxu0  ;;  %10472 = vmatprep.subr.bf16.mxu1 %v11596_v43  ;;  %10618 = vmatprep.subr.bf16.mxu0 %v11597_v21  ;;  %v11612_v43 = vld [vmem:[%s15219_s4 + $0x7f0] sm:$0xff]   ;;  %v10066_v21 = vpack.c.bf16 %v2375_v55, %v2375_v55 }
 0x423   :  { %v14054_v7 = vadd.f32 %v10325_v26, %v10324_v45  ;;  %v11615_v45 = vld [vmem:[%s15219_s4 + $0xa10] sm:$0xff]  }
 0x424   :  { %v10327_v59 = vpop.f32.mrf.mxu0  ;;  %10473 = vmatpush3.bf16.msra.mxu1 %v11598_v8  ;;  %v11616_v8 = vld [vmem:[%s15219_s4 + $0x7e8] sm:$0xff]  }
 0x425   :  { %10619 = vmatpush3.bf16.msra.mxu0 %v11599_v56  ;;  %10474 = vmatprep.subr.bf16.mxu1 %v11600_v49  ;;  %v11617_v49 = vld [vmem:[%s15219_s4 + $0xa48] sm:$0xff]  }
 0x426   :  { %v10328_v20 = vpop.f32.mrf.mxu0  ;;  %10620 = vmatprep.subr.bf16.mxu0 %v11601_v61  ;;  %v11618_v61 = vld [vmem:[%s15219_s4 + $0x7a8] sm:$0xff]  }
 0x427   :  { %v11622_v20 = vld [vmem:[%s15219_s4 + $0x7a0] sm:$0xff]  }
 0x428   :  { %10475 = vmatpush3.bf16.msra.mxu1 %v11602_v4 }
 0x429   :  { %10621 = vmatpush3.bf16.msra.mxu0 %v11603_v0  ;;  %10476 = vmatprep.subr.bf16.mxu1 %v11604_v24  ;;  %v11620_v0 = vld [vmem:[%s15219_s4 + $0x7e0] sm:$0xff]   ;;  %v2320_v24 = vadd.f32 %v13054_v28, %v13372_v13  ;;  %v11624_v13 = vld [vmem:[%s15219_s4 + $0x7d8] sm:$0xff]  }
 0x42a   :  { %10622 = vmatprep.subr.bf16.mxu0 %v11605_v54  ;;  %v11623_v54 = vld [vmem:[%s15219_s4 + $0xa00] sm:$0xff]  }
 0x42c   :  { %10477 = vmatpush3.bf16.msra.mxu1 %v11606_v3  ;;  %v2384_v3 = vmax.f32 %v2320_v24, 0.0  ;;  %v11637_v24 = vld [vmem:[%s15219_s4 + $0xb60] sm:$0xff]  }
 0x42d   :  { %10623 = vmatpush3.bf16.msra.mxu0 %v11607_v12  ;;  %10506 = vmatprep.subr.bf16.mxu1 %v11608_v63  ;;  %v11626_v12 = vld [vmem:[%s15219_s4 + $0x798] sm:$0xff]  }
 0x42e   :  { %10624 = vmatprep.subr.bf16.mxu0 %v11609_v18  ;;  %v11627_v63 = vld [vmem:[%s15219_s4 + $0xb38] sm:$0xff]   ;;  %v10075_v55 = vpack.c.bf16 %v2384_v3, %v2384_v3  ;;  %v11628_v18 = vld [vmem:[%s15219_s4 + $0x7d0] sm:$0xff]  }
 0x42f   :  { %v10236_v23 = vpop.f32.mrf.mxu1  ;;  %5513 = vmatmul.mubr.bf16.vlgmr.msra.gmra.mxu1 %v10061_v58  ;;  %v10080_v58 = vpack.c.bf16 %v2389_v51, %v2389_v51  ;;  %v11642_v3 = vld [vmem:[%s15219_s4 + $0x8b8] sm:$0xff]  }
 0x430   :  { %10507 = vmatpush3.bf16.msra.mxu1 %v11610_v50  ;;  %5792 = vmatprep.mubr.bf16.mxu1 %v10066_v21  ;;  %v11629_v50 = vld [vmem:[%s15219_s4 + $0xb70] sm:$0xff]   ;;  %v11643_v51 = vld [vmem:[%s15219_s4 + $0xb18] sm:$0xff]  }
 0x431   :  { %10625 = vmatpush3.bf16.msra.mxu0 %v11611_v2  ;;  %v10237_v60 = vpop.f32.mrf.mxu1  ;;  %10508 = vmatprep.subr.bf16.mxu1 %v11612_v43  ;;  %v15333_v2 = vld [vmem:[#allocation26_spill] sm:$0xff]  ;;  %v15334_v43 = vld [vmem:[#allocation27_spill] sm:$0xff] }
 0x432   :  { %v10238_v56 = vadd.f32 %v10237_v60, %v10236_v23  ;;  %10626 = vmatprep.subr.bf16.mxu0 %v11613_v22  ;;  %v1860_v21 = vadd.f32 %v15334_v43, %v15333_v2  ;;  %v11630_v23 = vld [vmem:[%s15219_s4 + $0x790] sm:$0xff]   ;;  %v11632_v60 = vld [vmem:[%s15219_s4 + $0x7c8] sm:$0xff]  }
 0x433   :  { %v10239_v27 = vpop.f32.mrf.mxu1  ;;  %v11647_v2 = vld [vmem:[%s15219_s4 + $0xb10] sm:$0xff]   ;;  %v11648_v43 = vld [vmem:[%s15219_s4 + $0x8e8] sm:$0xff]  }
 0x434   :  { %v8044_v26 = vsel %vm8040_vm5, %v10238_v56, 0.0  ;;  %10509 = vmatpush3.bf16.msra.mxu1 %v11614_v32  ;;  %v11631_v32 = vld [vmem:[%s15219_s4 + $0xb30] sm:$0xff]   ;;  %v11633_v56 = vld [vmem:[%s15219_s4 + $0xb68] sm:$0xff]  }
 0x435   :  { %v14112_v59 = vadd.f32 %v8044_v26, %v14000_v53  ;;  %10627 = vmatpush3.bf16.msra.mxu0 %v11615_v45  ;;  %v10240_v4 = vpop.f32.mrf.mxu1  ;;  %10510 = vmatprep.subr.bf16.mxu1 %v11616_v8  ;;  %v11621_v53 = vld [vmem:[%s15219_s4 + $0xa40] sm:$0xff]   ;;  %v2243_v45 = vadd.f32 %v13323_v1, %v1860_v21  ;;  %v11634_v26 = vld [vmem:[%s15219_s4 + $0x788] sm:$0xff]  }
 0x436   :  { %10628 = vmatprep.subr.bf16.mxu0 %v11617_v49  ;;  %v11635_v1 = vld [vmem:[%s15219_s4 + $0xb28] sm:$0xff]   ;;  %v11636_v4 = vld [vmem:[%s15219_s4 + $0x7c0] sm:$0xff]  }
 0x438   :  { %10511 = vmatpush3.bf16.msra.mxu1 %v11618_v61  ;;  %v2310_v61 = vadd.f32 %v13054_v28, %v13281_v47  ;;  %v11638_v47 = vld [vmem:[%s15219_s4 + $0x780] sm:$0xff]  }
 0x439   :  { %10629 = vmatpush3.bf16.msra.mxu0 %v11619_v15  ;;  %10512 = vmatprep.subr.bf16.mxu1 %v11620_v0  ;;  %v2315_v15 = vadd.f32 %v13058_v35, %v2243_v45 }
 0x43a   :  { %10630 = vmatprep.subr.bf16.mxu0 %v11621_v53  ;;  %v2374_v53 = vmax.f32 %v2310_v61, 0.0  ;;  %v8048_v61 = vsel %vm8040_vm5, %v13938_v10, 0.0  ;;  %v11656_v10 = vld [vmem:[%s15219_s4 + $0x8d8] sm:$0xff]  }
 0x43c   :  { %10513 = vmatpush3.bf16.msra.mxu1 %v11622_v20  ;;  %v11640_v20 = vld [vmem:[%s15219_s4 + $0x8f8] sm:$0xff]  }
 0x43d   :  { %10631 = vmatpush3.bf16.msra.mxu0 %v11623_v54  ;;  %10514 = vmatprep.subr.bf16.mxu1 %v11624_v13  ;;  %v2379_v54 = vmax.f32 %v2315_v15, 0.0  ;;  %v11641_v13 = vld [vmem:[%s15219_s4 + $0xb58] sm:$0xff]   ;;  %v11654_v15 = vld [vmem:[%s15219_s4 + $0x8a0] sm:$0xff]  }
 0x43e   :  { %10660 = vmatprep.subr.bf16.mxu0 %v11625_v42  ;;  %v10065_v42 = vpack.c.bf16 %v2374_v53, %v2374_v53  ;;  %v11659_v53 = vld [vmem:[%s15219_s4 + $0xc38] sm:$0xff]  }
 0x440   :  { %v10368_v22 = vpop.f32.mrf.mxu0  ;;  %6493 = vmatmul.mubr.bf16.vlgmr.msra.gmra.mxu0 %v10075_v55  ;;  %10515 = vmatpush3.bf16.msra.mxu1 %v11626_v12  ;;  %v11644_v12 = vld [vmem:[%s15219_s4 + $0x8f0] sm:$0xff]  }
 0x441   :  { %10661 = vmatpush3.bf16.msra.mxu0 %v11627_v63  ;;  %6772 = vmatprep.mubr.bf16.mxu0 %v10080_v58  ;;  %v10070_v63 = vpack.c.bf16 %v2379_v54, %v2379_v54  ;;  %v11645_v55 = vld [vmem:[%s15219_s4 + $0xb50] sm:$0xff]  }
 0x442   :  { %v10369_v8 = vpop.f32.mrf.mxu0  ;;  %10516 = vmatprep.subr.bf16.mxu1 %v11628_v18  ;;  %10662 = vmatprep.subr.bf16.mxu0 %v11629_v50  ;;  %v11646_v50 = vld [vmem:[%s15219_s4 + $0x8b0] sm:$0xff]  }
 0x443   :  { %v14166_v49 = vadd.f32 %v10369_v8, %v10368_v22  ;;  %v11649_v22 = vld [vmem:[%s15219_s4 + $0xb48] sm:$0xff]   ;;  %v11661_v54 = vld [vmem:[%s15219_s4 + $0xc70] sm:$0xff]  }
 0x444   :  { %v10371_v27 = vpop.f32.mrf.mxu0  ;;  %10517 = vmatpush3.bf16.msra.mxu1 %v11630_v23 }
 0x445   :  { %10663 = vmatpush3.bf16.msra.mxu0 %v11631_v32  ;;  %10518 = vmatprep.subr.bf16.mxu1 %v11632_v60  ;;  %v11650_v60 = vld [vmem:[%s15219_s4 + $0x8a8] sm:$0xff]   ;;  %v11652_v27 = vld [vmem:[%s15219_s4 + $0x8e0] sm:$0xff]  }
 0x446   :  { %v10372_v0 = vpop.f32.mrf.mxu0  ;;  %10664 = vmatprep.subr.bf16.mxu0 %v11633_v56  ;;  %v11651_v56 = vld [vmem:[%s15219_s4 + $0xb08] sm:$0xff]  }
 0x448   :  { %10519 = vmatpush3.bf16.msra.mxu1 %v11634_v26  ;;  %v2324_v26 = vadd.f32 %v13054_v28, %v13412_v30  ;;  %v11655_v30 = vld [vmem:[%s15219_s4 + $0xb00] sm:$0xff]  }
 0x449   :  { %10665 = vmatpush3.bf16.msra.mxu0 %v11635_v1  ;;  %10520 = vmatprep.subr.bf16.mxu1 %v11636_v4  ;;  %v2329_v1 = vadd.f32 %v13058_v35, %v13464_v6  ;;  %v11657_v6 = vld [vmem:[%s15219_s4 + $0xc78] sm:$0xff]  }
 0x44a   :  { %10666 = vmatprep.subr.bf16.mxu0 %v11637_v24  ;;  %v2388_v0 = vmax.f32 %v2324_v26, 0.0  ;;  %v11672_v26 = vld [vmem:[%s15219_s4 + $0x9f8] sm:$0xff]  }
 0x44b   :  { %v2393_v24 = vmax.f32 %v2329_v1, 0.0  ;;  %v11674_v1 = vld [vmem:[%s15219_s4 + $0x9b8] sm:$0xff]  }
 0x44c   :  { %10521 = vmatpush3.bf16.msra.mxu1 %v11638_v47  ;;  %v11658_v47 = vld [vmem:[%s15219_s4 + $0x898] sm:$0xff]  }
 0x44d   :  { %10667 = vmatpush3.bf16.msra.mxu0 %v11639_v16  ;;  %10550 = vmatprep.subr.bf16.mxu1 %v11640_v20  ;;  %v10079_v16 = vpack.c.bf16 %v2388_v0, %v2388_v0  ;;  %v11660_v20 = vld [vmem:[%s15219_s4 + $0x8d0] sm:$0xff]  }
 0x44e   :  { %10668 = vmatprep.subr.bf16.mxu0 %v11641_v13  ;;  %v10084_v13 = vpack.c.bf16 %v2393_v24, %v2393_v24 }
 0x44f   :  { %v10258_v18 = vpop.f32.mrf.mxu1  ;;  %5793 = vmatmul.mubr.bf16.vlgmr.msra.gmra.mxu1 %v10065_v42  ;;  %v15336_v42 = vld [vmem:[#allocation31_spill] sm:$0xff] }
 0x450   :  { %10551 = vmatpush3.bf16.msra.mxu1 %v11642_v3  ;;  %6072 = vmatprep.mubr.bf16.mxu1 %v10070_v63  ;;  %v15335_v3 = vld [vmem:[#allocation30_spill] sm:$0xff]  ;;  %v11662_v63 = vld [vmem:[%s15219_s4 + $0x890] sm:$0xff]  }
 0x451   :  { %10669 = vmatpush3.bf16.msra.mxu0 %v11643_v51  ;;  %v10259_v58 = vpop.f32.mrf.mxu1  ;;  %10552 = vmatprep.subr.bf16.mxu1 %v11644_v12  ;;  %v1870_v51 = vadd.f32 %v15336_v42, %v15335_v3 }
 0x452   :  { %v10260_v21 = vadd.f32 %v10259_v58, %v10258_v18  ;;  %10670 = vmatprep.subr.bf16.mxu0 %v11645_v55  ;;  %v11663_v55 = vld [vmem:[%s15219_s4 + $0xc30] sm:$0xff]   ;;  %v11664_v18 = vld [vmem:[%s15219_s4 + $0x8c8] sm:$0xff]  }
 0x453   :  { %v10261_v23 = vpop.f32.mrf.mxu1 }
 0x454   :  { %v8046_v32 = vsel %vm8040_vm5, %v10260_v21, 0.0  ;;  %10553 = vmatpush3.bf16.msra.mxu1 %v11646_v50  ;;  %v2247_v50 = vadd.f32 %v13364_v39, %v1870_v51  ;;  %v2314_v23 = vadd.f32 %v13054_v28, %v13318_v14  ;;  %v11667_v39 = vld [vmem:[%s15219_s4 + $0xc28] sm:$0xff]   ;;  %v11670_v14 = vld [vmem:[%s15219_s4 + $0x880] sm:$0xff]  }
 0x455   :  { %v8047_v45 = vadd.f32 %v8046_v32, %v14112_v59  ;;  %10671 = vmatpush3.bf16.msra.mxu0 %v11647_v2  ;;  %v10262_v8 = vpop.f32.mrf.mxu1  ;;  %10554 = vmatprep.subr.bf16.mxu1 %v11648_v43  ;;  %v11653_v59 = vld [vmem:[%s15219_s4 + $0xb40] sm:$0xff]   ;;  %v11665_v2 = vld [vmem:[%s15219_s4 + $0xc68] sm:$0xff]  }
 0x456   :  { %10672 = vmatprep.subr.bf16.mxu0 %v11649_v22  ;;  %v11666_v22 = vld [vmem:[%s15219_s4 + $0x888] sm:$0xff]   ;;  %v11668_v32 = vld [vmem:[%s15219_s4 + $0x8c0] sm:$0xff]  }
 0x457   :  { %v14239_v4 = vadd.f32 %v8048_v61, %v8047_v45  ;;  %v11669_v8 = vld [vmem:[%s15219_s4 + $0xc60] sm:$0xff]   ;;  %v11682_v51 = vld [vmem:[%s15219_s4 + $0x9a8] sm:$0xff]  }
 0x458   :  { %10555 = vmatpush3.bf16.msra.mxu1 %v11650_v60  ;;  %v2319_v60 = vadd.f32 %v13058_v35, %v2247_v50  ;;  %v2328_v50 = vadd.f32 %v13054_v28, %v13449_v36  ;;  %v11687_v36 = vld [vmem:[%s15219_s4 + $0xc00] sm:$0xff]  }
 0x459   :  { %10673 = vmatpush3.bf16.msra.mxu0 %v11651_v56  ;;  %10556 = vmatprep.subr.bf16.mxu1 %v11652_v27  ;;  %v2378_v56 = vmax.f32 %v2314_v23, 0.0  ;;  %v11671_v27 = vld [vmem:[%s15219_s4 + $0xc20] sm:$0xff]  }
 0x45a   :  { %10674 = vmatprep.subr.bf16.mxu0 %v11653_v59  ;;  %v2383_v61 = vmax.f32 %v2319_v60, 0.0  ;;  %v11673_v59 = vld [vmem:[%s15219_s4 + $0xc58] sm:$0xff]   ;;  %v2392_v23 = vmax.f32 %v2328_v50, 0.0 }
 0x45b   :  { %v11691_v60 = vld [vmem:[%s15219_s4 + $0xd38] sm:$0xff]  }
 0x45c   :  { %10557 = vmatpush3.bf16.msra.mxu1 %v11654_v15  ;;  %v10069_v15 = vpack.c.bf16 %v2378_v56, %v2378_v56  ;;  %v10074_v0 = vpack.c.bf16 %v2383_v61, %v2383_v61 }
 0x45d   :  { %10675 = vmatpush3.bf16.msra.mxu0 %v11655_v30  ;;  %10558 = vmatprep.subr.bf16.mxu1 %v11656_v10  ;;  %v11675_v30 = vld [vmem:[%s15219_s4 + $0xc18] sm:$0xff]   ;;  %v11676_v10 = vld [vmem:[%s15219_s4 + $0x9f0] sm:$0xff]  }
 0x45e   :  { %10704 = vmatprep.subr.bf16.mxu0 %v11657_v6  ;;  %v11677_v6 = vld [vmem:[%s15219_s4 + $0xc50] sm:$0xff]  }
 0x460   :  { %v10412_v12 = vpop.f32.mrf.mxu0  ;;  %6773 = vmatmul.mubr.bf16.vlgmr.msra.gmra.mxu0 %v10079_v16  ;;  %10559 = vmatpush3.bf16.msra.mxu1 %v11658_v47  ;;  %v11678_v47 = vld [vmem:[%s15219_s4 + $0x9b0] sm:$0xff]  }
 0x461   :  { %10705 = vmatpush3.bf16.msra.mxu0 %v11659_v53  ;;  %7052 = vmatprep.mubr.bf16.mxu0 %v10084_v13  ;;  %v11679_v16 = vld [vmem:[%s15219_s4 + $0xc10] sm:$0xff]   ;;  %v11681_v13 = vld [vmem:[%s15219_s4 + $0xc48] sm:$0xff]  }
 0x462   :  { %v10413_v58 = vpop.f32.mrf.mxu0  ;;  %10560 = vmatprep.subr.bf16.mxu1 %v11660_v20  ;;  %10706 = vmatprep.subr.bf16.mxu0 %v11661_v54  ;;  %v11680_v20 = vld [vmem:[%s15219_s4 + $0x9e8] sm:$0xff]  }
 0x463   :  { %v14280_v43 = vadd.f32 %v10413_v58, %v10412_v12  ;;  %v8052_v58 = vsel %vm8040_vm5, %v14054_v7, 0.0  ;;  %v11688_v7 = vld [vmem:[%s15219_s4 + $0x9d8] sm:$0xff]  }
 0x464   :  { %v10415_v21 = vpop.f32.mrf.mxu0  ;;  %10561 = vmatpush3.bf16.msra.mxu1 %v11662_v63 }
 0x465   :  { %10707 = vmatpush3.bf16.msra.mxu0 %v11663_v55  ;;  %10562 = vmatprep.subr.bf16.mxu1 %v11664_v18  ;;  %v11683_v55 = vld [vmem:[%s15219_s4 + $0xc08] sm:$0xff]   ;;  %v11684_v18 = vld [vmem:[%s15219_s4 + $0x9e0] sm:$0xff]  }
 0x466   :  { %v10416_v45 = vpop.f32.mrf.mxu0  ;;  %10708 = vmatprep.subr.bf16.mxu0 %v11665_v2  ;;  %v2333_v2 = vadd.f32 %v13058_v35, %v13501_v37  ;;  %v11689_v37 = vld [vmem:[%s15219_s4 + $0xd78] sm:$0xff]  }
 0x467   :  { %v10083_v45 = vpack.c.bf16 %v2392_v23, %v2392_v23 }
 0x468   :  { %10563 = vmatpush3.bf16.msra.mxu1 %v11666_v22  ;;  %v11686_v22 = vld [vmem:[%s15219_s4 + $0x9a0] sm:$0xff]  }
 0x469   :  { %10709 = vmatpush3.bf16.msra.mxu0 %v11667_v39  ;;  %10564 = vmatprep.subr.bf16.mxu1 %v11668_v32  ;;  %v2397_v39 = vmax.f32 %v2333_v2, 0.0  ;;  %v11690_v32 = vld [vmem:[%s15219_s4 + $0x998] sm:$0xff]  }
 0x46a   :  { %10710 = vmatprep.subr.bf16.mxu0 %v11669_v8  ;;  %v11692_v8 = vld [vmem:[%s15219_s4 + $0x9d0] sm:$0xff]  }
 0x46b   :  { %v10088_v56 = vpack.c.bf16 %v2397_v39, %v2397_v39  ;;  %v11712_v39 = vld [vmem:[%s15219_s4 + $0xae8] sm:$0xff]  }
 0x46c   :  { %10565 = vmatpush3.bf16.msra.mxu1 %v11670_v14  ;;  %v11693_v14 = vld [vmem:[%s15219_s4 + $0xd70] sm:$0xff]  }
 0x46d   :  { %10711 = vmatpush3.bf16.msra.mxu0 %v11671_v27  ;;  %10594 = vmatprep.subr.bf16.mxu1 %v11672_v26  ;;  %v15337_v27 = vld [vmem:[#allocation32_spill] sm:$0xff]  ;;  %v15338_v26 = vld [vmem:[#allocation33_spill] sm:$0xff] }
 0x46e   :  { %10712 = vmatprep.subr.bf16.mxu0 %v11673_v59  ;;  %v1880_v61 = vadd.f32 %v15338_v26, %v15337_v27  ;;  %v11715_v26 = vld [vmem:[%s15219_s4 + $0xd08] sm:$0xff]  }
 0x46f   :  { %v10302_v24 = vpop.f32.mrf.mxu1  ;;  %6073 = vmatmul.mubr.bf16.vlgmr.msra.gmra.mxu1 %v10069_v15  ;;  %v11695_v15 = vld [vmem:[%s15219_s4 + $0xd30] sm:$0xff]  }
 0x470   :  { %10595 = vmatpush3.bf16.msra.mxu1 %v11674_v1  ;;  %6352 = vmatprep.mubr.bf16.mxu1 %v10074_v0  ;;  %v11694_v1 = vld [vmem:[%s15219_s4 + $0x990] sm:$0xff]  }
 0x471   :  { %10713 = vmatpush3.bf16.msra.mxu0 %v11675_v30  ;;  %v10303_v53 = vpop.f32.mrf.mxu1  ;;  %10596 = vmatprep.subr.bf16.mxu1 %v11676_v10  ;;  %v11696_v30 = vld [vmem:[%s15219_s4 + $0x9c8] sm:$0xff]   ;;  %v2251_v10 = vadd.f32 %v13397_v46, %v1880_v61  ;;  %v11716_v61 = vld [vmem:[%s15219_s4 + $0xae0] sm:$0xff]  }
 0x472   :  { %v10304_v54 = vadd.f32 %v10303_v53, %v10302_v24  ;;  %10714 = vmatprep.subr.bf16.mxu0 %v11677_v6  ;;  %v11697_v6 = vld [vmem:[%s15219_s4 + $0xd68] sm:$0xff]  }
 0x473   :  { %v10305_v3 = vpop.f32.mrf.mxu1  ;;  %v11698_v53 = vld [vmem:[%s15219_s4 + $0x988] sm:$0xff]  }
 0x474   :  { %v8050_v42 = vsel %vm8040_vm5, %v10304_v54, 0.0  ;;  %10597 = vmatpush3.bf16.msra.mxu1 %v11678_v47  ;;  %v11699_v46 = vld [vmem:[%s15219_s4 + $0xd28] sm:$0xff]   ;;  %v2323_v54 = vadd.f32 %v13058_v35, %v2251_v10  ;;  %v11701_v3 = vld [vmem:[%s15219_s4 + $0xd60] sm:$0xff]  }
 0x475   :  { %v8051_v12 = vadd.f32 %v8050_v42, %v14239_v4  ;;  %10715 = vmatpush3.bf16.msra.mxu0 %v11679_v16  ;;  %v10306_v63 = vpop.f32.mrf.mxu1  ;;  %10598 = vmatprep.subr.bf16.mxu1 %v11680_v20  ;;  %v11685_v4 = vld [vmem:[%s15219_s4 + $0xc40] sm:$0xff]   ;;  %v2318_v16 = vadd.f32 %v13054_v28, %v13357_v48 }
 0x476   :  { %10716 = vmatprep.subr.bf16.mxu0 %v11681_v13  ;;  %v11700_v20 = vld [vmem:[%s15219_s4 + $0x9c0] sm:$0xff]   ;;  %v2387_v63 = vmax.f32 %v2323_v54, 0.0 }
 0x477   :  { %v14353_v21 = vadd.f32 %v8052_v58, %v8051_v12  ;;  %v11702_v48 = vld [vmem:[%s15219_s4 + $0x980] sm:$0xff]   ;;  %v2382_v42 = vmax.f32 %v2318_v16, 0.0  ;;  %v11704_v12 = vld [vmem:[%s15219_s4 + $0xaf8] sm:$0xff]  }
 0x478   :  { %10599 = vmatpush3.bf16.msra.mxu1 %v11682_v51  ;;  %v11703_v51 = vld [vmem:[%s15219_s4 + $0xd20] sm:$0xff]   ;;  %v11707_v58 = vld [vmem:[%s15219_s4 + $0xd18] sm:$0xff]   ;;  %v10078_v2 = vpack.c.bf16 %v2387_v63, %v2387_v63 }
 0x479   :  { %10717 = vmatpush3.bf16.msra.mxu0 %v11683_v55  ;;  %10600 = vmatprep.subr.bf16.mxu1 %v11684_v18  ;;  %v11705_v55 = vld [vmem:[%s15219_s4 + $0xd58] sm:$0xff]   ;;  %v10073_v50 = vpack.c.bf16 %v2382_v42, %v2382_v42  ;;  %v11718_v10 = vld [vmem:[%s15219_s4 + $0xaa0] sm:$0xff]   ;;  %v11728_v42 = vld [vmem:[%s15219_s4 + $0xac8] sm:$0xff]  }
 0x47a   :  { %10718 = vmatprep.subr.bf16.mxu0 %v11685_v4  ;;  %v11706_v18 = vld [vmem:[%s15219_s4 + $0xab8] sm:$0xff]   ;;  %v11708_v4 = vld [vmem:[%s15219_s4 + $0xaf0] sm:$0xff]  }
 0x47c   :  { %10601 = vmatpush3.bf16.msra.mxu1 %v11686_v22  ;;  %v11709_v22 = vld [vmem:[%s15219_s4 + $0xd50] sm:$0xff]  }
 0x47d   :  { %10719 = vmatpush3.bf16.msra.mxu0 %v11687_v36  ;;  %10602 = vmatprep.subr.bf16.mxu1 %v11688_v7  ;;  %v11710_v7 = vld [vmem:[%s15219_s4 + $0xab0] sm:$0xff]  }
 0x47e   :  { %10748 = vmatprep.subr.bf16.mxu0 %v11689_v37  ;;  %v11711_v37 = vld [vmem:[%s15219_s4 + $0xd10] sm:$0xff]  }
 0x480   :  { %v10456_v59 = vpop.f32.mrf.mxu0  ;;  %7053 = vmatmul.mubr.bf16.vlgmr.msra.gmra.mxu0 %v10083_v45  ;;  %10603 = vmatpush3.bf16.msra.mxu1 %v11690_v32 }
 0x481   :  { %10749 = vmatpush3.bf16.msra.mxu0 %v11691_v60  ;;  %7332 = vmatprep.mubr.bf16.mxu0 %v10088_v56  ;;  %v11713_v60 = vld [vmem:[%s15219_s4 + $0xd48] sm:$0xff]  }
 0x482   :  { %v10457_v0 = vpop.f32.mrf.mxu0  ;;  %10604 = vmatprep.subr.bf16.mxu1 %v11692_v8  ;;  %10750 = vmatprep.subr.bf16.mxu0 %v11693_v14  ;;  %v11714_v14 = vld [vmem:[%s15219_s4 + $0xaa8] sm:$0xff]  }
 0x483   :  { %v14394_v24 = vadd.f32 %v10457_v0, %v10456_v59  ;;  %v2332_v59 = vadd.f32 %v13054_v28, %v13495_v31  ;;  %v11719_v31 = vld [vmem:[%s15219_s4 + $0xd00] sm:$0xff]  }
 0x484   :  { %v10459_v47 = vpop.f32.mrf.mxu0  ;;  %10605 = vmatpush3.bf16.msra.mxu1 %v11694_v1  ;;  %v8056_v1 = vsel %vm8040_vm5, %v14166_v49, 0.0  ;;  %v11720_v49 = vld [vmem:[%s15219_s4 + $0xad8] sm:$0xff]  }
 0x485   :  { %10751 = vmatpush3.bf16.msra.mxu0 %v11695_v15  ;;  %10606 = vmatprep.subr.bf16.mxu1 %v11696_v30  ;;  %v2337_v15 = vadd.f32 %v13058_v35, %v13545_v5  ;;  %v2396_v0 = vmax.f32 %v2332_v59, 0.0  ;;  %v11721_v5 = vld [vmem:[%s15219_s4 + $0xe78] sm:$0xff]   ;;  %v11743_v59 = vld [vmem:[%s15219_s4 + $0xe10] sm:$0xff]  }
 0x486   :  { %v10460_v13 = vpop.f32.mrf.mxu0  ;;  %10752 = vmatprep.subr.bf16.mxu0 %v11697_v6  ;;  %v11722_v47 = vld [vmem:[%s15219_s4 + $0xa98] sm:$0xff]  }
 0x487   :  { %v2401_v6 = vmax.f32 %v2337_v15, 0.0  ;;  %v10087_v16 = vpack.c.bf16 %v2396_v0, %v2396_v0  ;;  %v11745_v15 = vld [vmem:[%s15219_s4 + $0xe48] sm:$0xff]  }
 0x488   :  { %10607 = vmatpush3.bf16.msra.mxu1 %v11698_v53  ;;  %v11723_v53 = vld [vmem:[%s15219_s4 + $0xe38] sm:$0xff]  }
 0x489   :  { %10753 = vmatpush3.bf16.msra.mxu0 %v11699_v46  ;;  %10608 = vmatprep.subr.bf16.mxu1 %v11700_v20  ;;  %v11724_v46 = vld [vmem:[%s15219_s4 + $0xad0] sm:$0xff]   ;;  %v10092_v54 = vpack.c.bf16 %v2401_v6, %v2401_v6  ;;  %v11747_v6 = vld [vmem:[%s15219_s4 + $0xe08] sm:$0xff]  }
 0x48a   :  { %10754 = vmatprep.subr.bf16.mxu0 %v11701_v3  ;;  %v11725_v20 = vld [vmem:[%s15219_s4 + $0xe70] sm:$0xff]  }
 0x48b   :  { %v11726_v3 = vld [vmem:[%s15219_s4 + $0xa90] sm:$0xff]  }
 0x48c   :  { %10609 = vmatpush3.bf16.msra.mxu1 %v11702_v48  ;;  %v11727_v48 = vld [vmem:[%s15219_s4 + $0xe30] sm:$0xff]  }
 0x48d   :  { %10755 = vmatpush3.bf16.msra.mxu0 %v11703_v51  ;;  %10638 = vmatprep.subr.bf16.mxu1 %v11704_v12  ;;  %v11729_v12 = vld [vmem:[%s15219_s4 + $0xe68] sm:$0xff]  }
 0x48e   :  { %10756 = vmatprep.subr.bf16.mxu0 %v11705_v55 }
 0x48f   :  { %v10346_v36 = vpop.f32.mrf.mxu1  ;;  %6353 = vmatmul.mubr.bf16.vlgmr.msra.gmra.mxu1 %v10073_v50  ;;  %v2322_v50 = vadd.f32 %v13054_v28, %v13392_v52  ;;  %v11734_v52 = vld [vmem:[%s15219_s4 + $0xa80] sm:$0xff]  }
 0x490   :  { %10639 = vmatpush3.bf16.msra.mxu1 %v11706_v18  ;;  %6632 = vmatprep.mubr.bf16.mxu1 %v10078_v2  ;;  %v11730_v18 = vld [vmem:[%s15219_s4 + $0xa88] sm:$0xff]   ;;  %v2327_v2 = vadd.f32 %v13058_v35, %v13443_v33  ;;  %v11736_v33 = vld [vmem:[%s15219_s4 + $0xbf8] sm:$0xff]  }
 0x491   :  { %10757 = vmatpush3.bf16.msra.mxu0 %v11707_v58  ;;  %v10347_v23 = vpop.f32.mrf.mxu1  ;;  %10640 = vmatprep.subr.bf16.mxu1 %v11708_v4  ;;  %v11731_v58 = vld [vmem:[%s15219_s4 + $0xe28] sm:$0xff]   ;;  %v11732_v4 = vld [vmem:[%s15219_s4 + $0xac0] sm:$0xff]  }
 0x492   :  { %v10348_v32 = vadd.f32 %v10347_v23, %v10346_v36  ;;  %10758 = vmatprep.subr.bf16.mxu0 %v11709_v22  ;;  %v11733_v36 = vld [vmem:[%s15219_s4 + $0xe60] sm:$0xff]  }
 0x493   :  { %v10349_v45 = vpop.f32.mrf.mxu1  ;;  %v11735_v23 = vld [vmem:[%s15219_s4 + $0xe20] sm:$0xff]  }
 0x494   :  { %v8054_v8 = vsel %vm8040_vm5, %v10348_v32, 0.0  ;;  %10641 = vmatpush3.bf16.msra.mxu1 %v11710_v7  ;;  %v2386_v7 = vmax.f32 %v2322_v50, 0.0  ;;  %v11738_v32 = vld [vmem:[%s15219_s4 + $0xbb8] sm:$0xff]  }
 0x495   :  { %v8055_v56 = vadd.f32 %v8054_v8, %v14353_v21  ;;  %10759 = vmatpush3.bf16.msra.mxu0 %v11711_v37  ;;  %v10350_v27 = vpop.f32.mrf.mxu1  ;;  %10642 = vmatprep.subr.bf16.mxu1 %v11712_v39  ;;  %v11717_v21 = vld [vmem:[%s15219_s4 + $0xd40] sm:$0xff]   ;;  %v2391_v37 = vmax.f32 %v2327_v2, 0.0  ;;  %v11737_v39 = vld [vmem:[%s15219_s4 + $0xe58] sm:$0xff]   ;;  %v11740_v8 = vld [vmem:[%s15219_s4 + $0xbf0] sm:$0xff]  }
 0x496   :  { %10760 = vmatprep.subr.bf16.mxu0 %v11713_v60  ;;  %v10077_v60 = vpack.c.bf16 %v2386_v7, %v2386_v7  ;;  %v11739_v45 = vld [vmem:[%s15219_s4 + $0xe18] sm:$0xff]   ;;  %v11760_v2 = vld [vmem:[%s15219_s4 + $0xbc8] sm:$0xff]  }
 0x497   :  { %v14467_v30 = vadd.f32 %v8056_v1, %v8055_v56  ;;  %v11741_v56 = vld [vmem:[%s15219_s4 + $0xe50] sm:$0xff]   ;;  %v11744_v1 = vld [vmem:[%s15219_s4 + $0xbe8] sm:$0xff]  }
 0x498   :  { %10643 = vmatpush3.bf16.msra.mxu1 %v11714_v14  ;;  %v10082_v14 = vpack.c.bf16 %v2391_v37, %v2391_v37  ;;  %v11763_v37 = vld [vmem:[%s15219_s4 + $0xf28] sm:$0xff]  }
 0x499   :  { %10761 = vmatpush3.bf16.msra.mxu0 %v11715_v26  ;;  %10644 = vmatprep.subr.bf16.mxu1 %v11716_v61  ;;  %v11742_v26 = vld [vmem:[%s15219_s4 + $0xbb0] sm:$0xff]  }
 0x49a   :  { %10762 = vmatprep.subr.bf16.mxu0 %v11717_v21 }
 0x49c   :  { %10645 = vmatpush3.bf16.msra.mxu1 %v11718_v10 }
 0x49d   :  { %10763 = vmatpush3.bf16.msra.mxu0 %v11719_v31  ;;  %10646 = vmatprep.subr.bf16.mxu1 %v11720_v49  ;;  %v11746_v49 = vld [vmem:[%s15219_s4 + $0xba8] sm:$0xff]  }
 0x49e   :  { %10792 = vmatprep.subr.bf16.mxu0 %v11721_v5 }
 0x4a0   :  { %v10500_v13 = vpop.f32.mrf.mxu0  ;;  %7333 = vmatmul.mubr.bf16.vlgmr.msra.gmra.mxu0 %v10087_v16  ;;  %10647 = vmatpush3.bf16.msra.mxu1 %v11722_v47  ;;  %v11748_v47 = vld [vmem:[%s15219_s4 + $0xbe0] sm:$0xff]   ;;  %v8060_v16 = vsel %vm8040_vm5, %v14280_v43, 0.0  ;;  %v11752_v43 = vld [vmem:[%s15219_s4 + $0xbd8] sm:$0xff]  }
 0x4a1   :  { %10793 = vmatpush3.bf16.msra.mxu0 %v11723_v53  ;;  %7612 = vmatprep.mubr.bf16.mxu0 %v10092_v54  ;;  %v2336_v53 = vadd.f32 %v13054_v28, %v13532_v34  ;;  %v11750_v54 = vld [vmem:[%s15219_s4 + $0xba0] sm:$0xff]  }
 0x4a2   :  { %v10501_v51 = vpop.f32.mrf.mxu0  ;;  %10648 = vmatprep.subr.bf16.mxu1 %v11724_v46  ;;  %10794 = vmatprep.subr.bf16.mxu0 %v11725_v20  ;;  %v2341_v46 = vadd.f32 %v13058_v35, %v13580_v62  ;;  %v11751_v34 = vld [vmem:[%s15219_s4 + $0xe00] sm:$0xff]   ;;  %v11753_v62 = vld [vmem:[%s15219_s4 + $0xf78] sm:$0xff]  }
 0x4a3   :  { %v14505_v63 = vadd.f32 %v10501_v51, %v10500_v13  ;;  %v2400_v13 = vmax.f32 %v2336_v53, 0.0 }
 0x4a4   :  { %v10503_v55 = vpop.f32.mrf.mxu0  ;;  %10649 = vmatpush3.bf16.msra.mxu1 %v11726_v3  ;;  %v2405_v3 = vmax.f32 %v2341_v46, 0.0 }
 0x4a5   :  { %10795 = vmatpush3.bf16.msra.mxu0 %v11727_v48  ;;  %10650 = vmatprep.subr.bf16.mxu1 %v11728_v42  ;;  %v11754_v48 = vld [vmem:[%s15219_s4 + $0xb98] sm:$0xff]   ;;  %v10091_v51 = vpack.c.bf16 %v2400_v13, %v2400_v13  ;;  %v11757_v55 = vld [vmem:[%s15219_s4 + $0xf70] sm:$0xff]   ;;  %v2340_v13 = vadd.f32 %v13054_v28, %v13574_v29  ;;  %v11783_v29 = vld [vmem:[%s15219_s4 + $0xf00] sm:$0xff]  }
 0x4a6   :  { %v10504_v22 = vpop.f32.mrf.mxu0  ;;  %10796 = vmatprep.subr.bf16.mxu0 %v11729_v12  ;;  %v11755_v42 = vld [vmem:[%s15219_s4 + $0xf38] sm:$0xff]   ;;  %v11756_v12 = vld [vmem:[%s15219_s4 + $0xbd0] sm:$0xff]  }
 0x4a8   :  { %10651 = vmatpush3.bf16.msra.mxu1 %v11730_v18  ;;  %v10096_v18 = vpack.c.bf16 %v2405_v3, %v2405_v3 }
 0x4a9   :  { %10797 = vmatpush3.bf16.msra.mxu0 %v11731_v58  ;;  %10652 = vmatprep.subr.bf16.mxu1 %v11732_v4  ;;  %v11758_v58 = vld [vmem:[%s15219_s4 + $0xb90] sm:$0xff]  }
 0x4aa   :  { %10798 = vmatprep.subr.bf16.mxu0 %v11733_v36  ;;  %v11759_v4 = vld [vmem:[%s15219_s4 + $0xf30] sm:$0xff]   ;;  %v11761_v36 = vld [vmem:[%s15219_s4 + $0xf68] sm:$0xff]  }
 0x4ac   :  { %10653 = vmatpush3.bf16.msra.mxu1 %v11734_v52 }
 0x4ad   :  { %10799 = vmatpush3.bf16.msra.mxu0 %v11735_v23  ;;  %10682 = vmatprep.subr.bf16.mxu1 %v11736_v33  ;;  %v11762_v23 = vld [vmem:[%s15219_s4 + $0xb88] sm:$0xff]   ;;  %v2326_v33 = vadd.f32 %v13054_v28, %v13437_v19  ;;  %v11766_v19 = vld [vmem:[%s15219_s4 + $0xb80] sm:$0xff]  }
 0x4ae   :  { %10800 = vmatprep.subr.bf16.mxu0 %v11737_v39  ;;  %v11764_v39 = vld [vmem:[%s15219_s4 + $0xbc0] sm:$0xff]  }
 0x4af   :  { %v10390_v27 = vpop.f32.mrf.mxu1  ;;  %6633 = vmatmul.mubr.bf16.vlgmr.msra.gmra.mxu1 %v10077_v60 }
 0x4b0   :  { %10683 = vmatpush3.bf16.msra.mxu1 %v11738_v32  ;;  %6912 = vmatprep.mubr.bf16.mxu1 %v10082_v14  ;;  %v2331_v32 = vadd.f32 %v13058_v35, %v13486_v25  ;;  %v11767_v14 = vld [vmem:[%s15219_s4 + $0xf20] sm:$0xff]   ;;  %v11768_v25 = vld [vmem:[%s15219_s4 + $0xcf8] sm:$0xff]  }
 0x4b1   :  { %10801 = vmatpush3.bf16.msra.mxu0 %v11739_v45  ;;  %v10391_v61 = vpop.f32.mrf.mxu1  ;;  %10684 = vmatprep.subr.bf16.mxu1 %v11740_v8  ;;  %v11765_v45 = vld [vmem:[%s15219_s4 + $0xf60] sm:$0xff]   ;;  %v2390_v8 = vmax.f32 %v2326_v33, 0.0  ;;  %v2335_v33 = vadd.f32 %v13058_v35, %v13525_v44  ;;  %v11794_v44 = vld [vmem:[%s15219_s4 + $0xdf0] sm:$0xff]  }
 0x4b2   :  { %v10392_v21 = vadd.f32 %v10391_v61, %v10390_v27  ;;  %10802 = vmatprep.subr.bf16.mxu0 %v11741_v56  ;;  %v2395_v56 = vmax.f32 %v2331_v32, 0.0  ;;  %v11769_v27 = vld [vmem:[%s15219_s4 + $0xf58] sm:$0xff]  }
 0x4b3   :  { %v10393_v10 = vpop.f32.mrf.mxu1  ;;  %v10081_v61 = vpack.c.bf16 %v2390_v8, %v2390_v8 }
 0x4b4   :  { %v8058_v31 = vsel %vm8040_vm5, %v10392_v21, 0.0  ;;  %10685 = vmatpush3.bf16.msra.mxu1 %v11742_v26  ;;  %v11770_v26 = vld [vmem:[%s15219_s4 + $0xcb8] sm:$0xff]   ;;  %v10086_v21 = vpack.c.bf16 %v2395_v56, %v2395_v56 }
 0x4b5   :  { %v8059_v0 = vadd.f32 %v8058_v31, %v14467_v30  ;;  %10803 = vmatpush3.bf16.msra.mxu0 %v11743_v59  ;;  %v10394_v5 = vpop.f32.mrf.mxu1  ;;  %10686 = vmatprep.subr.bf16.mxu1 %v11744_v1  ;;  %v11749_v30 = vld [vmem:[%s15219_s4 + $0xe40] sm:$0xff]   ;;  %v11771_v59 = vld [vmem:[%s15219_s4 + $0xf18] sm:$0xff]   ;;  %v11772_v1 = vld [vmem:[%s15219_s4 + $0xcf0] sm:$0xff]  }
 0x4b6   :  { %10804 = vmatprep.subr.bf16.mxu0 %v11745_v15  ;;  %v11773_v15 = vld [vmem:[%s15219_s4 + $0xf50] sm:$0xff]   ;;  %v11776_v5 = vld [vmem:[%s15219_s4 + $0xce8] sm:$0xff]  }
 0x4b7   :  { %v14579_v20 = vadd.f32 %v8060_v16, %v8059_v0  ;;  %v11774_v31 = vld [vmem:[%s15219_s4 + $0xcb0] sm:$0xff]  }
 0x4b8   :  { %10687 = vmatpush3.bf16.msra.mxu1 %v11746_v49  ;;  %v11775_v0 = vld [vmem:[%s15219_s4 + $0xf10] sm:$0xff]  }
 0x4b9   :  { %10805 = vmatpush3.bf16.msra.mxu0 %v11747_v6  ;;  %10688 = vmatprep.subr.bf16.mxu1 %v11748_v47  ;;  %v11777_v47 = vld [vmem:[%s15219_s4 + $0xf48] sm:$0xff]  }
 0x4ba   :  { %10806 = vmatprep.subr.bf16.mxu0 %v11749_v30  ;;  %v11778_v30 = vld [vmem:[%s15219_s4 + $0xca8] sm:$0xff]  }
 0x4bc   :  { %10689 = vmatpush3.bf16.msra.mxu1 %v11750_v54 }
 0x4bd   :  { %10807 = vmatpush3.bf16.msra.mxu0 %v11751_v34  ;;  %10690 = vmatprep.subr.bf16.mxu1 %v11752_v43  ;;  %v11779_v34 = vld [vmem:[%s15219_s4 + $0xf08] sm:$0xff]   ;;  %v11780_v43 = vld [vmem:[%s15219_s4 + $0xce0] sm:$0xff]  }
 0x4be   :  { %10836 = vmatprep.subr.bf16.mxu0 %v11753_v62  ;;  %v8064_v62 = vsel %vm8040_vm5, %v14394_v24, 0.0  ;;  %v11784_v24 = vld [vmem:[%s15219_s4 + $0xcd8] sm:$0xff]  }
 0x4c0   :  { %v10544_v50 = vpop.f32.mrf.mxu0  ;;  %7613 = vmatmul.mubr.bf16.vlgmr.msra.gmra.mxu0 %v10091_v51  ;;  %10691 = vmatpush3.bf16.msra.mxu1 %v11754_v48  ;;  %v11782_v48 = vld [vmem:[%s15219_s4 + $0xca0] sm:$0xff]   ;;  %v11785_v51 = vld [vmem:[%s15219_s4 + $0xc98] sm:$0xff]  }
 0x4c1   :  { %10837 = vmatpush3.bf16.msra.mxu0 %v11755_v42  ;;  %7892 = vmatprep.mubr.bf16.mxu0 %v10096_v18  ;;  %v2404_v42 = vmax.f32 %v2340_v13, 0.0  ;;  %v11806_v13 = vld [vmem:[%s15219_s4 + $0xdc0] sm:$0xff]  }
 0x4c2   :  { %v10545_v22 = vpop.f32.mrf.mxu0  ;;  %10692 = vmatprep.subr.bf16.mxu1 %v11756_v12  ;;  %10838 = vmatprep.subr.bf16.mxu0 %v11757_v55  ;;  %v11786_v12 = vld [vmem:[%s15219_s4 + $0xcd0] sm:$0xff]  }
 0x4c3   :  { %v14617_v52 = vadd.f32 %v10545_v22, %v10544_v50  ;;  %v10095_v55 = vpack.c.bf16 %v2404_v42, %v2404_v42  ;;  %v11787_v50 = vld [vmem:[%s15219_s4 + $0xc90] sm:$0xff]  }
 0x4c4   :  { %v10547_v7 = vpop.f32.mrf.mxu0  ;;  %10693 = vmatpush3.bf16.msra.mxu1 %v11758_v58  ;;  %v11788_v58 = vld [vmem:[%s15219_s4 + $0xcc8] sm:$0xff]  }
 0x4c5   :  { %10839 = vmatpush3.bf16.msra.mxu0 %v11759_v4  ;;  %10694 = vmatprep.subr.bf16.mxu1 %v11760_v2  ;;  %v2330_v7 = vadd.f32 %v13054_v28, %v13475_v57  ;;  %v11792_v57 = vld [vmem:[%s15219_s4 + $0xdf8] sm:$0xff]  }
 0x4c6   :  { %v10548_v60 = vpop.f32.mrf.mxu0  ;;  %10840 = vmatprep.subr.bf16.mxu0 %v11761_v36  ;;  %v11789_v36 = vld [vmem:[%s15219_s4 + $0xc88] sm:$0xff]  }
 0x4c7   :  { %v2394_v32 = vmax.f32 %v2330_v7, 0.0  ;;  %v2399_v60 = vmax.f32 %v2335_v33, 0.0  ;;  %v11814_v33 = vld [vmem:[%s15219_s4 + $0xee0] sm:$0xff]  }
 0x4c8   :  { %10695 = vmatpush3.bf16.msra.mxu1 %v11762_v23  ;;  %v11790_v23 = vld [vmem:[%s15219_s4 + $0xcc0] sm:$0xff]  }
 0x4c9   :  { %10841 = vmatpush3.bf16.msra.mxu0 %v11763_v37  ;;  %10696 = vmatprep.subr.bf16.mxu1 %v11764_v39  ;;  %v11791_v39 = vld [vmem:[%s15219_s4 + $0xc80] sm:$0xff]   ;;  %v10090_v8 = vpack.c.bf16 %v2399_v60, %v2399_v60  ;;  %v11817_v60 = vld [vmem:[%s15219_s4 + $0xe98] sm:$0xff]  }
 0x4ca   :  { %10842 = vmatprep.subr.bf16.mxu0 %v11765_v45  ;;  %v11793_v45 = vld [vmem:[%s15219_s4 + $0xdb8] sm:$0xff]  }
 0x4cc   :  { %10697 = vmatpush3.bf16.msra.mxu1 %v11766_v19  ;;  %v10085_v19 = vpack.c.bf16 %v2394_v32, %v2394_v32  ;;  %v11815_v32 = vld [vmem:[%s15219_s4 + $0xea0] sm:$0xff]  }
 0x4cd   :  { %10843 = vmatpush3.bf16.msra.mxu0 %v11767_v14  ;;  %10726 = vmatprep.subr.bf16.mxu1 %v11768_v25  ;;  %v11795_v25 = vld [vmem:[%s15219_s4 + $0xdb0] sm:$0xff]  }
 0x4ce   :  { %10844 = vmatprep.subr.bf16.mxu0 %v11769_v27  ;;  %v11796_v27 = vld [vmem:[%s15219_s4 + $0xde8] sm:$0xff]  }
 0x4cf   :  { %v10434_v10 = vpop.f32.mrf.mxu1  ;;  %6913 = vmatmul.mubr.bf16.vlgmr.msra.gmra.mxu1 %v10081_v61 }
 0x4d0   :  { %10727 = vmatpush3.bf16.msra.mxu1 %v11770_v26  ;;  %7192 = vmatprep.mubr.bf16.mxu1 %v10086_v21 }
 0x4d1   :  { %10845 = vmatpush3.bf16.msra.mxu0 %v11771_v59  ;;  %v10435_v49 = vpop.f32.mrf.mxu1  ;;  %10728 = vmatprep.subr.bf16.mxu1 %v11772_v1  ;;  %v11797_v1 = vld [vmem:[%s15219_s4 + $0xda8] sm:$0xff]  }
 0x4d2   :  { %v10436_v6 = vadd.f32 %v10435_v49, %v10434_v10  ;;  %10846 = vmatprep.subr.bf16.mxu0 %v11773_v15  ;;  %v11798_v10 = vld [vmem:[%s15219_s4 + $0xde0] sm:$0xff]  }
 0x4d3   :  { %v10437_v53 = vpop.f32.mrf.mxu1 }
 0x4d4   :  { %v8062_v16 = vsel %vm8040_vm5, %v10436_v6, 0.0  ;;  %10729 = vmatpush3.bf16.msra.mxu1 %v11774_v31  ;;  %v8068_v31 = vsel %vm8040_vm5, %v14505_v63, 0.0  ;;  %v11801_v6 = vld [vmem:[%s15219_s4 + $0xd98] sm:$0xff]   ;;  %v11802_v63 = vld [vmem:[%s15219_s4 + $0xdd0] sm:$0xff]  }
 0x4d5   :  { %v8063_v46 = vadd.f32 %v8062_v16, %v14579_v20  ;;  %10847 = vmatpush3.bf16.msra.mxu0 %v11775_v0  ;;  %v10438_v54 = vpop.f32.mrf.mxu1  ;;  %10730 = vmatprep.subr.bf16.mxu1 %v11776_v5  ;;  %v11781_v20 = vld [vmem:[%s15219_s4 + $0xf40] sm:$0xff]   ;;  %v11800_v5 = vld [vmem:[%s15219_s4 + $0xdd8] sm:$0xff]   ;;  %v11803_v53 = vld [vmem:[%s15219_s4 + $0xd90] sm:$0xff]  }
 0x4d6   :  { %10848 = vmatprep.subr.bf16.mxu0 %v11777_v47  ;;  %v11799_v0 = vld [vmem:[%s15219_s4 + $0xda0] sm:$0xff]   ;;  %v11804_v16 = vld [vmem:[%s15219_s4 + $0xdc8] sm:$0xff]  }
 0x4d7   :  { %v8065_v3 = vadd.f32 %v8064_v62, %v8063_v46  ;;  %v2339_v62 = vadd.f32 %v13058_v35, %v13565_v9  ;;  %v11810_v9 = vld [vmem:[%s15219_s4 + $0xef0] sm:$0xff]  }
 0x4d8   :  { %10731 = vmatpush3.bf16.msra.mxu1 %v11778_v30 }
 0x4d9   :  { %10849 = vmatpush3.bf16.msra.mxu0 %v11779_v34  ;;  %10732 = vmatprep.subr.bf16.mxu1 %v11780_v43  ;;  %v11805_v34 = vld [vmem:[%s15219_s4 + $0xd88] sm:$0xff]   ;;  %v2334_v43 = vadd.f32 %v13054_v28, %v13517_v38  ;;  %v11808_v38 = vld [vmem:[%s15219_s4 + $0xef8] sm:$0xff]  }
 0x4da   :  { %10850 = vmatprep.subr.bf16.mxu0 %v11781_v20 }
 0x4dc   :  { %10733 = vmatpush3.bf16.msra.mxu1 %v11782_v48  ;;  %v2398_v48 = vmax.f32 %v2334_v43, 0.0 }
 0x4dd   :  { %10851 = vmatpush3.bf16.msra.mxu0 %v11783_v29  ;;  %10734 = vmatprep.subr.bf16.mxu1 %v11784_v24  ;;  %v2403_v29 = vmax.f32 %v2339_v62, 0.0  ;;  %v11809_v24 = vld [vmem:[%s15219_s4 + $0xeb8] sm:$0xff]  }
 0x4de   :  { %v10089_v42 = vpack.c.bf16 %v2398_v48, %v2398_v48  ;;  %v11832_v48 = vld [vmem:[%s15219_s4 + $0xfd8] sm:$0xff]  }
 0x4e0   :  { %v10588_v18 = vpop.f32.mrf.mxu0  ;;  %7893 = vmatmul.mubr.bf16.vlgmr.msra.gmra.mxu0 %v10095_v55  ;;  %10735 = vmatpush3.bf16.msra.mxu1 %v11785_v51  ;;  %v10094_v51 = vpack.c.bf16 %v2403_v29, %v2403_v29  ;;  %v11811_v55 = vld [vmem:[%s15219_s4 + $0xeb0] sm:$0xff]  }
 0x4e1   :  { %10736 = vmatprep.subr.bf16.mxu1 %v11786_v12 }
 0x4e2   :  { %v10589_v4 = vpop.f32.mrf.mxu0 }
 0x4e3   :  { %v14710_v2 = vadd.f32 %v10589_v4, %v10588_v18 }
 0x4e4   :  { %v10591_v22 = vpop.f32.mrf.mxu0  ;;  %10737 = vmatpush3.bf16.msra.mxu1 %v11787_v50  ;;  %v11812_v50 = vld [vmem:[%s15219_s4 + $0xee8] sm:$0xff]  }
 0x4e5   :  { %10738 = vmatprep.subr.bf16.mxu1 %v11788_v58  ;;  %v8076_v62 = vsel %vm8040_vm5, %v14710_v2, 0.0  ;;  %v11834_v2 = vld [vmem:[%s15219_s4 + $0xfd0] sm:$0xff]  }
 0x4e6   :  { %v10592_v37 = vpop.f32.mrf.mxu0 }
 0x4e7   :  { %v8072_v37 = vsel %vm8040_vm5, %v14617_v52, 0.0  ;;  %v11818_v52 = vld [vmem:[%s15219_s4 + $0xed0] sm:$0xff]  }
 0x4e8   :  { %10739 = vmatpush3.bf16.msra.mxu1 %v11789_v36  ;;  %v11813_v36 = vld [vmem:[%s15219_s4 + $0xea8] sm:$0xff]  }
 0x4e9   :  { %10740 = vmatprep.subr.bf16.mxu1 %v11790_v23 }
 0x4ec   :  { %10741 = vmatpush3.bf16.msra.mxu1 %v11791_v39 }
 0x4ed   :  { %10770 = vmatprep.subr.bf16.mxu1 %v11792_v57  ;;  %v11816_v57 = vld [vmem:[%s15219_s4 + $0xed8] sm:$0xff]  }
 0x4ef   :  { %v10478_v14 = vpop.f32.mrf.mxu1  ;;  %7193 = vmatmul.mubr.bf16.vlgmr.msra.gmra.mxu1 %v10085_v19 }
 0x4f0   :  { %10771 = vmatpush3.bf16.msra.mxu1 %v11793_v45  ;;  %7472 = vmatprep.mubr.bf16.mxu1 %v10090_v8  ;;  %v15339_v45 = vld [vmem:[#allocation52_spill] sm:$0xff] }
 0x4f1   :  { %v10479_v56 = vpop.f32.mrf.mxu1  ;;  %10772 = vmatprep.subr.bf16.mxu1 %v11794_v44  ;;  %v1930_v19 = vadd.f32 %v13862_v11, %v15339_v45  ;;  %v11819_v8 = vld [vmem:[%s15219_s4 + $0xe90] sm:$0xff]   ;;  %v11821_v11 = vld [vmem:[%s15219_s4 + $0xe88] sm:$0xff]  }
 0x4f2   :  { %v10480_v26 = vadd.f32 %v10479_v56, %v10478_v14  ;;  %v11820_v14 = vld [vmem:[%s15219_s4 + $0xec8] sm:$0xff]  }
 0x4f3   :  { %v10481_v61 = vpop.f32.mrf.mxu1 }
 0x4f4   :  { %v8066_v59 = vsel %vm8040_vm5, %v10480_v26, 0.0  ;;  %10773 = vmatpush3.bf16.msra.mxu1 %v11795_v25  ;;  %v2271_v25 = vadd.f32 %v13921_v40, %v1930_v19  ;;  %v2338_v61 = vadd.f32 %v13054_v28, %v13554_v17 }
 0x4f5   :  { %v8067_v21 = vadd.f32 %v8066_v59, %v8065_v3  ;;  %v10482_v15 = vpop.f32.mrf.mxu1  ;;  %10774 = vmatprep.subr.bf16.mxu1 %v11796_v27  ;;  %v11807_v3 = vld [vmem:[%s15219_s4 + $0xd80] sm:$0xff]  }
 0x4f6   :  { %v11822_v59 = vld [vmem:[%s15219_s4 + $0xec0] sm:$0xff]   ;;  %v2402_v15 = vmax.f32 %v2338_v61, 0.0 }
 0x4f7   :  { %v8069_v49 = vadd.f32 %v8068_v31, %v8067_v21  ;;  %v11823_v21 = vld [vmem:[%s15219_s4 + $0xe80] sm:$0xff]   ;;  %v11825_v31 = vld [vmem:[%s15219_s4 + $0xfb8] sm:$0xff]  }
 0x4f8   :  { %10775 = vmatpush3.bf16.msra.mxu1 %v11797_v1  ;;  %v2343_v1 = vadd.f32 %v13058_v35, %v2271_v25  ;;  %v11826_v35 = vld [vmem:[%s15219_s4 + $0xff0] sm:$0xff]  }
 0x4f9   :  { %10776 = vmatprep.subr.bf16.mxu1 %v11798_v10  ;;  %v11824_v10 = vld [vmem:[%s15219_s4 + $0xff8] sm:$0xff]  }
 0x4fa   :  { %v2407_v17 = vmax.f32 %v2343_v1, 0.0 }
 0x4fc   :  { %10777 = vmatpush3.bf16.msra.mxu1 %v11799_v0  ;;  %v10098_v0 = vpack.c.bf16 %v2407_v17, %v2407_v17 }
 0x4fd   :  { %10778 = vmatprep.subr.bf16.mxu1 %v11800_v5 }
 0x500   :  { %v10632_v47 = vpop.f32.mrf.mxu0  ;;  %10779 = vmatpush3.bf16.msra.mxu1 %v11801_v6  ;;  %v11827_v6 = vld [vmem:[%s15219_s4 + $0xfb0] sm:$0xff]  }
 0x501   :  { %10780 = vmatprep.subr.bf16.mxu1 %v11802_v63 }
 0x502   :  { %v10633_v30 = vpop.f32.mrf.mxu0 }
 0x503   :  { %v14767_v46 = vadd.f32 %v10633_v30, %v10632_v47  ;;  %v11828_v47 = vld [vmem:[%s15219_s4 + $0xfe8] sm:$0xff]  }
 0x504   :  { %v10635_v54 = vpop.f32.mrf.mxu0  ;;  %10781 = vmatpush3.bf16.msra.mxu1 %v11803_v53 }
 0x505   :  { %10782 = vmatprep.subr.bf16.mxu1 %v11804_v16  ;;  %v11829_v54 = vld [vmem:[%s15219_s4 + $0xfa8] sm:$0xff]  }
 0x506   :  { %v10636_v20 = vpop.f32.mrf.mxu0 }
 0x508   :  { %10783 = vmatpush3.bf16.msra.mxu1 %v11805_v34 }
 0x509   :  { %10784 = vmatprep.subr.bf16.mxu1 %v11806_v13  ;;  %v11830_v13 = vld [vmem:[%s15219_s4 + $0xfe0] sm:$0xff]  }
 0x50c   :  { %10785 = vmatpush3.bf16.msra.mxu1 %v11807_v3  ;;  %v11831_v3 = vld [vmem:[%s15219_s4 + $0xfa0] sm:$0xff]  }
 0x50d   :  { %10814 = vmatprep.subr.bf16.mxu1 %v11808_v38  ;;  %v11833_v38 = vld [vmem:[%s15219_s4 + $0xf98] sm:$0xff]  }
 0x50f   :  { %v10522_v12 = vpop.f32.mrf.mxu1  ;;  %7473 = vmatmul.mubr.bf16.vlgmr.msra.gmra.mxu1 %v10089_v42  ;;  %v11836_v42 = vld [vmem:[%s15219_s4 + $0xfc8] sm:$0xff]  }
 0x510   :  { %10815 = vmatpush3.bf16.msra.mxu1 %v11809_v24  ;;  %7752 = vmatprep.mubr.bf16.mxu1 %v10094_v51  ;;  %v11835_v24 = vld [vmem:[%s15219_s4 + $0xf90] sm:$0xff]  }
 0x511   :  { %v10523_v18 = vpop.f32.mrf.mxu1  ;;  %10816 = vmatprep.subr.bf16.mxu1 %v11810_v9 }
 0x512   :  { %v10524_v58 = vadd.f32 %v10523_v18, %v10522_v12  ;;  %v2342_v18 = vadd.f32 %v13054_v28, %v13597_v41 }
 0x513   :  { %v10525_v4 = vpop.f32.mrf.mxu1 }
 0x514   :  { %v8070_v22 = vsel %vm8040_vm5, %v10524_v58, 0.0  ;;  %10817 = vmatpush3.bf16.msra.mxu1 %v11811_v55  ;;  %v11837_v55 = vld [vmem:[%s15219_s4 + $0xf88] sm:$0xff]   ;;  %v11839_v4 = vld [vmem:[%s15219_s4 + $0xf80] sm:$0xff]  }
 0x515   :  { %v8071_v7 = vadd.f32 %v8070_v22, %v8069_v49  ;;  %v10526_v23 = vpop.f32.mrf.mxu1  ;;  %10818 = vmatprep.subr.bf16.mxu1 %v11812_v50  ;;  %v10093_v49 = vpack.c.bf16 %v2402_v15, %v2402_v15  ;;  %v11838_v50 = vld [vmem:[%s15219_s4 + $0xfc0] sm:$0xff]   ;;  %v2406_v22 = vmax.f32 %v2342_v18, 0.0 }
 0x516   :  { %v15340_v23 = vmov 0  }
 0x517   :  { %v8073_v39 = vadd.f32 %v8072_v37, %v8071_v7 }
 0x518   :  { %10819 = vmatpush3.bf16.msra.mxu1 %v11813_v36  ;;  %v10097_v36 = vpack.c.bf16 %v2406_v22, %v2406_v22 }
 0x519   :  { %10820 = vmatprep.subr.bf16.mxu1 %v11814_v33 }
 0x51c   :  { %10821 = vmatpush3.bf16.msra.mxu1 %v11815_v32 }
 0x51d   :  { %10822 = vmatprep.subr.bf16.mxu1 %v11816_v57  ;;  %v8080_v57 = vsel %vm8040_vm5, %v14767_v46, 0.0 }
 0x520   :  { %v10676_v44 = vpop.f32.mrf.mxu0  ;;  %10823 = vmatpush3.bf16.msra.mxu1 %v11817_v60 }
 0x521   :  { %10824 = vmatprep.subr.bf16.mxu1 %v11818_v52 }
 0x522   :  { %v10677_v56 = vpop.f32.mrf.mxu0 }
 0x523   :  { %v14827_v27 = vadd.f32 %v10677_v56, %v10676_v44 }
 0x524   :  { %v10679_v26 = vpop.f32.mrf.mxu0  ;;  %10825 = vmatpush3.bf16.msra.mxu1 %v11819_v8 }
 0x525   :  { %10826 = vmatprep.subr.bf16.mxu1 %v11820_v14  ;;  %v8084_v1 = vsel %vm8040_vm5, %v14827_v27, 0.0 }
 0x526   :  { %v10680_v40 = vpop.f32.mrf.mxu0 }
 0x528   :  { %10827 = vmatpush3.bf16.msra.mxu1 %v11821_v11 }
 0x529   :  { %10828 = vmatprep.subr.bf16.mxu1 %v11822_v59 }
 0x52c   :  { %10829 = vmatpush3.bf16.msra.mxu1 %v11823_v21 }
 0x52d   :  { %10858 = vmatprep.subr.bf16.mxu1 %v11824_v10 }
 0x52f   :  { %v10566_v5 = vpop.f32.mrf.mxu1  ;;  %7753 = vmatmul.mubr.bf16.vlgmr.msra.gmra.mxu1 %v10093_v49 }
 0x530   :  { %10859 = vmatpush3.bf16.msra.mxu1 %v11825_v31  ;;  %8032 = vmatprep.mubr.bf16.mxu1 %v10098_v0 }
 0x531   :  { %v10567_v63 = vpop.f32.mrf.mxu1  ;;  %10860 = vmatprep.subr.bf16.mxu1 %v11826_v35 }
 0x532   :  { %v10568_v53 = vadd.f32 %v10567_v63, %v10566_v5 }
 0x533   :  { %v10569_v16 = vpop.f32.mrf.mxu1 }
 0x534   :  { %v8074_v30 = vsel %vm8040_vm5, %v10568_v53, 0.0  ;;  %10861 = vmatpush3.bf16.msra.mxu1 %v11827_v6 }
 0x535   :  { %v8075_v34 = vadd.f32 %v8074_v30, %v8073_v39  ;;  %v10570_v43 = vpop.f32.mrf.mxu1  ;;  %10862 = vmatprep.subr.bf16.mxu1 %v11828_v47 }
 0x536   :  { %v11840_v43 = vld [vmem:[%s15220_s5] ss:$8 sps:$4 sm:$0xff]  }
 0x537   :  { %v8077_v20 = vadd.f32 %v8076_v62, %v8075_v34 }
 0x538   :  { %10863 = vmatpush3.bf16.msra.mxu1 %v11829_v54 }
 0x539   :  { %10864 = vmatprep.subr.bf16.mxu1 %v11830_v13  ;;  %v11842_v13 = vld [vmem:[%s15220_s5 + $0x4] ss:$8 sps:$4 sm:$0xff]  }
 0x53c   :  { %10865 = vmatpush3.bf16.msra.mxu1 %v11831_v3 }
 0x53d   :  { %10866 = vmatprep.subr.bf16.mxu1 %v11832_v48 }
 0x540   :  { %v10720_v29 = vpop.f32.mrf.mxu0  ;;  %10867 = vmatpush3.bf16.msra.mxu1 %v11833_v38 }
 0x541   :  { %10868 = vmatprep.subr.bf16.mxu1 %v11834_v2 }
 0x542   :  { %v10721_v9 = vpop.f32.mrf.mxu0 }
 0x543   :  { %v10722_v51 = vadd.f32 %v10721_v9, %v10720_v29 }
 0x544   :  { %v10723_v12 = vpop.f32.mrf.mxu0  ;;  %10869 = vmatpush3.bf16.msra.mxu1 %v11835_v24 }
 0x545   :  { %10870 = vmatprep.subr.bf16.mxu1 %v11836_v42  ;;  %v8088_v47 = vsel %vm8040_vm5, %v10722_v51, 0.0 }
 0x546   :  { %v10724_v58 = vpop.f32.mrf.mxu0 }
 0x548   :  { %10871 = vmatpush3.bf16.msra.mxu1 %v11837_v55 }
 0x549   :  { %10872 = vmatprep.subr.bf16.mxu1 %v11838_v50 }
 0x54c   :  { %10873 = vmatpush3.bf16.msra.mxu1 %v11839_v4 }
 0x54d   :  { %8158 = vmatprep.subr.bf16.mxu1 %v11842_v13  ;;  %v11850_v13 = vld [vmem:[%s15222_s6 + $0x130] sm:$0xff]  }
 0x54f   :  { %v10610_v7 = vpop.f32.mrf.mxu1  ;;  %8033 = vmatmul.mubr.bf16.vlgmr.msra.gmra.mxu1 %v10097_v36 }
 0x550   :  { %8176 = vmatprep.mubr.bf16.mxu1 %v15340_v23  ;;  %8159 = vmatpush1.bf16.msra.mxu1 %v11840_v43  ;;  %v11848_v43 = vld [vmem:[%s15222_s6 + $0x170] sm:$0xff]  }
 0x551   :  { %v10611_v28 = vpop.f32.mrf.mxu1 }
 0x552   :  { %v10612_v41 = vadd.f32 %v10611_v28, %v10610_v7 }
 0x553   :  { %v10613_v33 = vpop.f32.mrf.mxu1 }
 0x554   :  { %v8078_v37 = vsel %vm8040_vm5, %v10612_v41, 0.0 }
 0x555   :  { %v8079_v39 = vadd.f32 %v8078_v37, %v8077_v20  ;;  %v10614_v32 = vpop.f32.mrf.mxu1 }
 0x557   :  { %v8081_v60 = vadd.f32 %v8080_v57, %v8079_v39 }
 0x560   :  { %v10764_v52 = vpop.f32.mrf.mxu0 }
 0x562   :  { %v10765_v45 = vpop.f32.mrf.mxu0 }
 0x563   :  { %v10766_v19 = vadd.f32 %v10765_v45, %v10764_v52 }
 0x564   :  { %v10767_v44 = vpop.f32.mrf.mxu0 }
 0x565   :  { %v8092_v24 = vsel %vm8040_vm5, %v10766_v19, 0.0  ;;  %v14919_v44 = vld [vmem:[%s15217_s9] sm:$0xff] }
 0x566   :  { %v10768_v8 = vpop.f32.mrf.mxu0 }
 0x56f   :  { %v10654_v14 = vpop.f32.mrf.mxu1 }
 0x571   :  { %v10655_v25 = vpop.f32.mrf.mxu1 }
 0x572   :  { %v10656_v56 = vadd.f32 %v10655_v25, %v10654_v14 }
 0x573   :  { %v10657_v26 = vpop.f32.mrf.mxu1 }
 0x574   :  { %v8082_v11 = vsel %vm8040_vm5, %v10656_v56, 0.0 }
 0x575   :  { %v8083_v61 = vadd.f32 %v8082_v11, %v8081_v60  ;;  %v10658_v59 = vpop.f32.mrf.mxu1  ;;  %v15341_v60 = vld [vmem:[#allocation2_spill] sm:$0xff] }
 0x576   :  { %v8106_v52 = vsub.s32 3, %v15341_v60  ;;  %v11949_v59 = vmov 0.0  }
 0x577   :  { %v8085_v40 = vadd.f32 %v8084_v1, %v8083_v61 }
 0x578   :  { %v8107_v8 = vrot.slane %v14919_v44, %v8106_v52 }
 0x580   :  { %v10808_v21 = vpop.f32.mrf.mxu0 }
 0x582   :  { %v10809_v46 = vpop.f32.mrf.mxu0 }
 0x583   :  { %v10810_v15 = vadd.f32 %v10809_v46, %v10808_v21  ;;  %v11844_v21 = vld [vmem:[%s15222_s6 + $0x178] sm:$0xff]  }
 0x584   :  { %v10811_v10 = vpop.f32.mrf.mxu0  ;;  %v11845_v46 = vld [vmem:[%s15222_s6 + $0xb8] sm:$0xff]   ;;  %10902 = vmatprep.subr.bf16.mxu1 %v11844_v21  ;;  %v11887_v21 = vld [vmem:[%s15224_s7 + $0x48] sm:$0xff]  }
 0x585   :  { %v8096_v4 = vsel %vm8040_vm5, %v10810_v15, 0.0  ;;  %v11847_v15 = vld [vmem:[%s15222_s6 + $0xf0] sm:$0xff]  }
 0x586   :  { %v10812_v17 = vpop.f32.mrf.mxu0 }
 0x587   :  { %v11849_v17 = vld [vmem:[%s15222_s6 + $0xb0] sm:$0xff]  }
 0x58f   :  { %v10698_v31 = vpop.f32.mrf.mxu1 }
 0x591   :  { %v10699_v49 = vpop.f32.mrf.mxu1 }
 0x592   :  { %v10700_v35 = vadd.f32 %v10699_v49, %v10698_v31  ;;  %v11851_v31 = vld [vmem:[%s15222_s6 + $0xe8] sm:$0xff]  }
 0x593   :  { %v10701_v0 = vpop.f32.mrf.mxu1  ;;  %v11853_v49 = vld [vmem:[%s15222_s6 + $0xa8] sm:$0xff]  }
 0x594   :  { %v8086_v5 = vsel %vm8040_vm5, %v10700_v35, 0.0  ;;  %v11855_v35 = vld [vmem:[%s15222_s6 + $0xe0] sm:$0xff]  }
 0x595   :  { %v8087_v6 = vadd.f32 %v8086_v5, %v8085_v40  ;;  %v10702_v63 = vpop.f32.mrf.mxu1  ;;  %v11843_v40 = vld [vmem:[%s15222_s6 + $0xf8] sm:$0xff]   ;;  %v11857_v0 = vld [vmem:[%s15222_s6 + $0xa0] sm:$0xff]  }
 0x596   :  { %10880 = vmatprep.subr.bf16.mxu0 %v11843_v40  ;;  %v11859_v5 = vld [vmem:[%s15222_s6 + $0xd8] sm:$0xff]   ;;  %v11863_v63 = vld [vmem:[%s15222_s6 + $0xd0] sm:$0xff]  }
 0x597   :  { %v8089_v53 = vadd.f32 %v8088_v47, %v8087_v6  ;;  %10881 = vmatpush3.bf16.msra.mxu0 %v11845_v46  ;;  %v11861_v6 = vld [vmem:[%s15222_s6 + $0x98] sm:$0xff]   ;;  %v11865_v47 = vld [vmem:[%s15222_s6 + $0x90] sm:$0xff]   ;;  %v11888_v46 = vld [vmem:[%s15224_s7 + $0x8] sm:$0xff]  }
 0x598   :  { %10882 = vmatprep.subr.bf16.mxu0 %v11847_v15  ;;  %v11886_v40 = vld [vmem:[%s15224_s7 + $0x10] sm:$0xff]   ;;  %v11889_v15 = vld [vmem:[%s15224_s7 + $0x40] sm:$0xff]  }
 0x59b   :  { %10883 = vmatpush3.bf16.msra.mxu0 %v11849_v17  ;;  %v8525_v17 = vsub.s32 5, %v15341_v60 }
 0x59c   :  { %10884 = vmatprep.subr.bf16.mxu0 %v11851_v31 }
 0x59f   :  { %10885 = vmatpush3.bf16.msra.mxu0 %v11853_v49 }
 0x5a0   :  { %v10852_v16 = vpop.f32.mrf.mxu0  ;;  %10886 = vmatprep.subr.bf16.mxu0 %v11855_v35  ;;  %v8526_v35 = vrot.slane %v14919_v44, %v8525_v17 }
 0x5a2   :  { %v10853_v30 = vpop.f32.mrf.mxu0 }
 0x5a3   :  { %v10854_v27 = vadd.f32 %v10853_v30, %v10852_v16  ;;  %10887 = vmatpush3.bf16.msra.mxu0 %v11857_v0 }
 0x5a4   :  { %v10855_v54 = vpop.f32.mrf.mxu0  ;;  %10888 = vmatprep.subr.bf16.mxu0 %v11859_v5 }
 0x5a5   :  { %v8100_v39 = vsel %vm8040_vm5, %v10854_v27, 0.0  ;;  %v11846_v54 = vld [vmem:[%s15222_s6 + $0x138] sm:$0xff]  }
 0x5a6   :  { %v10856_v34 = vpop.f32.mrf.mxu0 }
 0x5a7   :  { %10889 = vmatpush3.bf16.msra.mxu0 %v11861_v6 }
 0x5a8   :  { %10890 = vmatprep.subr.bf16.mxu0 %v11863_v63 }
 0x5ab   :  { %10891 = vmatpush3.bf16.msra.mxu0 %v11865_v47 }
 0x5af   :  { %v10742_v62 = vpop.f32.mrf.mxu1 }
 0x5b1   :  { %v10743_v20 = vpop.f32.mrf.mxu1 }
 0x5b2   :  { %v10744_v3 = vadd.f32 %v10743_v20, %v10742_v62  ;;  %v11852_v62 = vld [vmem:[%s15222_s6 + $0x168] sm:$0xff]  }
 0x5b3   :  { %v10745_v48 = vpop.f32.mrf.mxu1  ;;  %v11854_v20 = vld [vmem:[%s15222_s6 + $0x128] sm:$0xff]  }
 0x5b4   :  { %v8090_v38 = vsel %vm8040_vm5, %v10744_v3, 0.0  ;;  %v11856_v3 = vld [vmem:[%s15222_s6 + $0x160] sm:$0xff]  }
 0x5b5   :  { %v8091_v2 = vadd.f32 %v8090_v38, %v8089_v53  ;;  %v10746_v29 = vpop.f32.mrf.mxu1  ;;  %v8109_v53 = vld [vmem:[%s15223_s10] sm:$0xff]  ;;  %v11860_v38 = vld [vmem:[%s15222_s6 + $0x158] sm:$0xff]   ;;  %s11954_s10 = smov 96  }
 0x5b6   :  { %v11858_v48 = vld [vmem:[%s15222_s6 + $0x120] sm:$0xff]   ;;  %v11864_v29 = vld [vmem:[%s15222_s6 + $0x150] sm:$0xff]  }
 0x5b7   :  { %v8093_v42 = vadd.f32 %v8092_v24, %v8091_v2  ;;  %v11862_v2 = vld [vmem:[%s15222_s6 + $0x118] sm:$0xff]   ;;  %v11866_v24 = vld [vmem:[%s15222_s6 + $0x110] sm:$0xff]  }
 0x5cf   :  { %v10786_v9 = vpop.f32.mrf.mxu1 }
 0x5d1   :  { %v10787_v51 = vpop.f32.mrf.mxu1 }
 0x5d2   :  { %v10788_v12 = vadd.f32 %v10787_v51, %v10786_v9  ;;  %v11868_v9 = vld [vmem:[%s15222_s6 + $0x148] sm:$0xff]  }
 0x5d3   :  { %v10789_v55 = vpop.f32.mrf.mxu1  ;;  %v11869_v51 = vld [vmem:[%s15222_s6 + $0x88] sm:$0xff]  }
 0x5d4   :  { %v8094_v18 = vsel %vm8040_vm5, %v10788_v12, 0.0  ;;  %v11870_v12 = vld [vmem:[%s15222_s6 + $0x108] sm:$0xff]   ;;  %v11871_v55 = vld [vmem:[%s15222_s6 + $0xc0] sm:$0xff]  }
 0x5d5   :  { %v8095_v50 = vadd.f32 %v8094_v18, %v8093_v42  ;;  %v10790_v58 = vpop.f32.mrf.mxu1  ;;  %v11867_v42 = vld [vmem:[%s15222_s6 + $0xc8] sm:$0xff]   ;;  %v11872_v18 = vld [vmem:[%s15222_s6 + $0x140] sm:$0xff]  }
 0x5d6   :  { %10892 = vmatprep.subr.bf16.mxu0 %v11867_v42  ;;  %v11874_v58 = vld [vmem:[%s15222_s6 + $0x100] sm:$0xff]  }
 0x5d7   :  { %v8097_v22 = vadd.f32 %v8096_v4, %v8095_v50  ;;  %10893 = vmatpush3.bf16.msra.mxu0 %v11869_v51  ;;  %v11873_v50 = vld [vmem:[%s15222_s6 + $0x80] sm:$0xff]   ;;  %v8124_v4 = vsub.s32 4, %v15341_v60  ;;  %v11900_v51 = vld [vmem:[%s15225_s8 + $0x58] sm:$0xff]  }
 0x5d8   :  { %10894 = vmatprep.subr.bf16.mxu0 %v11871_v55  ;;  %v11898_v42 = vld [vmem:[%s15224_s7 + $0x80] sm:$0xff]   ;;  %v11903_v55 = vld [vmem:[%s15225_s8 + $0x28] sm:$0xff]  }
 0x5db   :  { %10895 = vmatpush3.bf16.msra.mxu0 %v11873_v50  ;;  %v11905_v50 = vld [vmem:[%s15225_s8 + $0x20] sm:$0xff]  }
 0x5dc   :  { %11123 = vmatprep.subr.bf16.mxu0 %v11949_v59 }
 0x5ef   :  { %v10830_v36 = vpop.f32.mrf.mxu1 }
 0x5f1   :  { %v10831_v7 = vpop.f32.mrf.mxu1 }
 0x5f2   :  { %v10832_v23 = vadd.f32 %v10831_v7, %v10830_v36  ;;  %v11947_v36 = vld [vmem:[%s15217_s9 + $0x8] sm:$0xff] }
 0x5f3   :  { %v10833_v28 = vpop.f32.mrf.mxu1  ;;  %v8129_v7 = vrot.slane %v11947_v36, %v8124_v4 }
 0x5f4   :  { %v8098_v41 = vsel %vm8040_vm5, %v10832_v23, 0.0 }
 0x5f5   :  { %v8099_v33 = vadd.f32 %v8098_v41, %v8097_v22  ;;  %v10834_v37 = vpop.f32.mrf.mxu1  ;;  %v8125_v22 = vrot.slane %v14919_v44, %v8124_v4  ;;  %v11907_v4 = vld [vmem:[%s15225_s8 + $0x18] sm:$0xff]  }
 0x5f7   :  { %v8101_v32 = vadd.f32 %v8100_v39, %v8099_v33 }
 0x60f   :  { %v10874_v57 = vpop.f32.mrf.mxu1 }
 0x611   :  { %v10875_v45 = vpop.f32.mrf.mxu1 }
 0x612   :  { %v10876_v19 = vadd.f32 %v10875_v45, %v10874_v57  ;;  %v11876_v57 = vld [vmem:[%s15224_s7 + $0x38] sm:$0xff]  }
 0x613   :  { %v10877_v14 = vpop.f32.mrf.mxu1 }
 0x614   :  { %v8102_v25 = vsel %vm8040_vm5, %v10876_v19, 0.0  ;;  %v11877_v19 = vld [vmem:[%s15224_s7 + $0x70] sm:$0xff]   ;;  %v11879_v14 = vld [vmem:[%s15224_s7 + $0x68] sm:$0xff]  }
 0x615   :  { %v8103_v56 = vadd.f32 %v8102_v25, %v8101_v32  ;;  %v10878_v26 = vpop.f32.mrf.mxu1  ;;  %v11875_v32 = vld [vmem:[%s15224_s7 + $0x78] sm:$0xff]   ;;  %v11880_v25 = vld [vmem:[%s15224_s7 + $0x28] sm:$0xff]  }
 0x616   :  { %v11882_v26 = vld [vmem:[%s15224_s7 + $0x20] sm:$0xff]  }
 0x617   :  { %v8108_v11 = vadd.f32 %v8107_v8, %v8103_v56  ;;  %v11878_v8 = vld [vmem:[%s15224_s7 + $0x30] sm:$0xff]   ;;  %v11881_v56 = vld [vmem:[%s15224_s7 + $0x60] sm:$0xff]  }
 0x619   :  { %v8110_v61 = vmul.f32 0.5, %v8108_v11  ;;  %9222 = vst.msk [vmem:[%s15221_s11 + $0x10] sm:$0xff] %vm8040_vm5, %v8108_v11 }
 0x61a   :  { %9224 = vst.msk [vmem:[%s15221_s11 + $0x10] sm:$0xff] %vm9223_vm6, %v11949_v59 }
 0x61b   :  { %v8111_v1 = vmul.f32 1.442695, %v8110_v61  ;;  %v11884_v61 = vld [vmem:[%s15224_s7 + $0x18] sm:$0xff]  }
 0x61d   :  { %11911 = vpow2.f32 %v8111_v1  ;;  %v11885_v1 = vld [vmem:[%s15224_s7 + $0x50] sm:$0xff]  }
 0x62a   :  { %v11912_v10 = vpop.eup %11911 }
 0x62b   :  { %8114 = vrot.lane.b32.xlu0 %v11912_v10, %s11950_s29  ;;  %v11890_v10 = vld [vmem:[%s15224_s7] sm:$0xff]   ;;  %s11952_s29 = smov 64  }
 0x69d   :  { %v8115_v16 = vpop.permute.xlu0 %8114 }
 0x69e   :  { %v8117_v30 = vmul.f32 %v8115_v16, %v8109_v53 }
 0x6a0   :  { %v8118_v27 = vadd.f32 %v8117_v30, %v8108_v11  ;;  %v11883_v11 = vld [vmem:[%s15224_s7 + $0x58] sm:$0xff]  }
 0x6a2   :  { %v8119_v34 = vpack.c.bf16 %v8118_v27, %v8118_v27 }
 0x6a4   :  { %9951 = vmatmul.mubr.msk.bf16.vlgmr.msra.gmra.mxu1 %vm8140_vm7, %v8119_v34 }
 0x6a5   :  { %10903 = vmatpush3.bf16.msra.mxu1 %v11846_v54 }
 0x6a6   :  { %10904 = vmatprep.subr.bf16.mxu1 %v11848_v43 }
 0x6a9   :  { %10905 = vmatpush3.bf16.msra.mxu1 %v11850_v13  ;;  %v11891_v13 = vld [vmem:[%s15224_s7 + $0xb8] sm:$0xff]  }
 0x6aa   :  { %10906 = vmatprep.subr.bf16.mxu1 %v11852_v62 }
 0x6ad   :  { %10907 = vmatpush3.bf16.msra.mxu1 %v11854_v20 }
 0x6ae   :  { %10908 = vmatprep.subr.bf16.mxu1 %v11856_v3  ;;  %v11892_v3 = vld [vmem:[%s15224_s7 + $0xb0] sm:$0xff]  }
 0x6b1   :  { %10909 = vmatpush3.bf16.msra.mxu1 %v11858_v48  ;;  %v11893_v48 = vld [vmem:[%s15224_s7 + $0xa8] sm:$0xff]  }
 0x6b2   :  { %10910 = vmatprep.subr.bf16.mxu1 %v11860_v38  ;;  %v11894_v38 = vld [vmem:[%s15224_s7 + $0xa0] sm:$0xff]  }
 0x6b5   :  { %10911 = vmatpush3.bf16.msra.mxu1 %v11862_v2  ;;  %v11895_v2 = vld [vmem:[%s15224_s7 + $0x98] sm:$0xff]  }
 0x6b6   :  { %10912 = vmatprep.subr.bf16.mxu1 %v11864_v29  ;;  %v11896_v29 = vld [vmem:[%s15224_s7 + $0x90] sm:$0xff]  }
 0x6b9   :  { %10913 = vmatpush3.bf16.msra.mxu1 %v11866_v24  ;;  %v11897_v24 = vld [vmem:[%s15224_s7 + $0x88] sm:$0xff]  }
 0x6ba   :  { %10914 = vmatprep.subr.bf16.mxu1 %v11868_v9  ;;  %v11899_v9 = vld [vmem:[%s15225_s8 + $0x38] sm:$0xff]  }
 0x6bd   :  { %10915 = vmatpush3.bf16.msra.mxu1 %v11870_v12  ;;  %v11901_v12 = vld [vmem:[%s15225_s8 + $0x30] sm:$0xff]  }
 0x6be   :  { %10916 = vmatprep.subr.bf16.mxu1 %v11872_v18  ;;  %v11904_v18 = vld [vmem:[%s15225_s8 + $0x48] sm:$0xff]  }
 0x6c1   :  { %10917 = vmatpush3.bf16.msra.mxu1 %v11874_v58  ;;  %v11906_v58 = vld [vmem:[%s15225_s8 + $0x40] sm:$0xff]  }
 0x6c2   :  { %11143 = vmatprep.subr.bf16.mxu1 %v11949_v59 }
 0x764   :  { %v8178_v23 = vpop.f32.mrf.mxu1 }
 0x765   :  { %v8179_v28 = vadd.f32 %v8178_v23, %v8125_v22 }
 0x766   :  { %v8180_v41 = vpop.f32.mrf.mxu1 }
 0x767   :  { %v8181_v33 = vadd.f32 %v8180_v41, %v8129_v7  ;;  %v8185_v52 = vpack.c.bf16 %v8179_v28, %v8179_v28 }
 0x768   :  { %v8182_v37 = vpop.f32.mrf.mxu1 }
 0x769   :  { %v8186_v39 = vpack.c.bf16 %v8181_v33, %v8181_v33 }
 0x76a   :  { %v8183_v45 = vpop.f32.mrf.mxu1 }
 0x76b   :  { %8379 = vmatprep.mubr.bf16.mxu0 %v8186_v39  ;;  %8515 = vmatprep.mubr.bf16.mxu1 %v8186_v39  ;;  %v8854_v39 = vsub.s32 6, %v15341_v60 }
 0x76c   :  { %8380 = vmatmul.mubr.bf16.vlgmr.msra.gmra.mxu0 %v8185_v52  ;;  %8516 = vmatmul.mubr.bf16.vlgmr.msra.gmra.mxu1 %v8185_v52 }
 0x76d   :  { %11124 = vmatpush3.bf16.msra.mxu0 %v11875_v32  ;;  %11144 = vmatpush3.bf16.msra.mxu1 %v11876_v57  ;;  %v8855_v32 = vrot.slane %v14919_v44, %v8854_v39 }
 0x76e   :  { %11125 = vmatprep.subr.bf16.mxu0 %v11949_v59  ;;  %11145 = vmatprep.subr.bf16.mxu1 %v11949_v59 }
 0x76f   :  { %11139 = vmatprep.mubr.msk.bf16.mxu0 %vm11951_vm8, %v11949_v59  ;;  %11159 = vmatprep.mubr.msk.bf16.mxu1 %vm11951_vm8, %v11949_v59 }
 0x771   :  { %11126 = vmatpush3.bf16.msra.mxu0 %v11877_v19  ;;  %11146 = vmatpush3.bf16.msra.mxu1 %v11878_v8 }
 0x772   :  { %11127 = vmatprep.subr.bf16.mxu0 %v11949_v59  ;;  %11147 = vmatprep.subr.bf16.mxu1 %v11949_v59 }
 0x775   :  { %11128 = vmatpush3.bf16.msra.mxu0 %v11879_v14  ;;  %11148 = vmatpush3.bf16.msra.mxu1 %v11880_v25 }
 0x776   :  { %11129 = vmatprep.subr.bf16.mxu0 %v11949_v59  ;;  %11149 = vmatprep.subr.bf16.mxu1 %v11949_v59 }
 0x779   :  { %11130 = vmatpush3.bf16.msra.mxu0 %v11881_v56  ;;  %11150 = vmatpush3.bf16.msra.mxu1 %v11882_v26 }
 0x77a   :  { %11131 = vmatprep.subr.bf16.mxu0 %v11949_v59  ;;  %11151 = vmatprep.subr.bf16.mxu1 %v11949_v59 }
 0x77d   :  { %11132 = vmatpush3.bf16.msra.mxu0 %v11883_v11  ;;  %11152 = vmatpush3.bf16.msra.mxu1 %v11884_v61 }
 0x77e   :  { %11133 = vmatprep.subr.bf16.mxu0 %v11949_v59  ;;  %11153 = vmatprep.subr.bf16.mxu1 %v11949_v59 }
 0x781   :  { %11134 = vmatpush3.bf16.msra.mxu0 %v11885_v1  ;;  %11154 = vmatpush3.bf16.msra.mxu1 %v11886_v40 }
 0x782   :  { %11135 = vmatprep.subr.bf16.mxu0 %v11949_v59  ;;  %11155 = vmatprep.subr.bf16.mxu1 %v11949_v59 }
 0x785   :  { %11136 = vmatpush3.bf16.msra.mxu0 %v11887_v21  ;;  %11156 = vmatpush3.bf16.msra.mxu1 %v11888_v46 }
 0x786   :  { %11137 = vmatprep.subr.bf16.mxu0 %v11949_v59  ;;  %11157 = vmatprep.subr.bf16.mxu1 %v11949_v59 }
 0x789   :  { %11138 = vmatpush3.bf16.msra.mxu0 %v11889_v15  ;;  %11158 = vmatpush3.bf16.msra.mxu1 %v11890_v10  ;;  %v11908_v10 = vld [vmem:[%s15225_s8 + $0x10] sm:$0xff]  }
 0x78a   :  { %11163 = vmatprep.subr.bf16.mxu0 %v11949_v59  ;;  %11183 = vmatprep.subr.bf16.mxu1 %v11899_v9 }
 0x82c   :  { %v10896_v31 = vpop.f32.mrf.mxu0  ;;  %v10918_v49 = vpop.f32.mrf.mxu1 }
 0x82e   :  { %v10897_v0 = vpop.f32.mrf.mxu0  ;;  %v10919_v5 = vpop.f32.mrf.mxu1 }
 0x82f   :  { %v10898_v6 = vadd.f32 %v10897_v0, %v10896_v31  ;;  %v10920_v63 = vadd.f32 %v10919_v5, %v10918_v49  ;;  %v11910_v0 = vld [vmem:[%s15225_s8] sm:$0xff]  }
 0x830   :  { %v10899_v47 = vpop.f32.mrf.mxu0  ;;  %v10921_v53 = vpop.f32.mrf.mxu1 }
 0x831   :  { %v8527_v16 = vadd.f32 %v10898_v6, %v8526_v35  ;;  %v8528_v30 = vadd.f32 %v10920_v63, %v8526_v35  ;;  %v11909_v35 = vld [vmem:[%s15225_s8 + $0x8] sm:$0xff]   ;;  %v9129_v6 = vsub.s32 7, %v15341_v60 }
 0x832   :  { %v10900_v27 = vpop.f32.mrf.mxu0  ;;  %v10922_v54 = vpop.f32.mrf.mxu1 }
 0x833   :  { %v8529_v34 = vmax.f32 %v8527_v16, 0.0  ;;  %v8530_v43 = vmax.f32 %v8528_v30, 0.0  ;;  %v9130_v63 = vrot.slane %v14919_v44, %v9129_v6 }
 0x835   :  { %v8531_v62 = vpack.c.bf16 %v8530_v43, %v8529_v34 }
 0x837   :  { %v8670_v20 = vrot.slane %v8531_v62, 4  ;;  %11140 = vmatmul.mubr.bf16.vlgmr.msra.gmra.mxu0 %v8531_v62 }
 0x838   :  { %11164 = vmatpush3.bf16.msra.mxu0 %v11891_v13  ;;  %11179 = vmatprep.mubr.msk.bf16.mxu0 %vm11951_vm8, %v11949_v59 }
 0x839   :  { %11160 = vmatmul.mubr.msk.bf16.vlgmr.msra.gmra.mxu1 %vm466_vm3, %v8670_v20  ;;  %11165 = vmatprep.subr.bf16.mxu0 %v11949_v59 }
 0x83a   :  { %11184 = vmatpush3.bf16.msra.mxu1 %v11899_v9 }
 0x83b   :  { %11185 = vmatprep.subr.bf16.mxu1 %v11901_v12 }
 0x83c   :  { %11166 = vmatpush3.bf16.msra.mxu0 %v11892_v3 }
 0x83d   :  { %11167 = vmatprep.subr.bf16.mxu0 %v11949_v59 }
 0x83e   :  { %11186 = vmatpush3.bf16.msra.mxu1 %v11901_v12 }
 0x83f   :  { %11187 = vmatprep.subr.bf16.mxu1 %v11903_v55 }
 0x840   :  { %11168 = vmatpush3.bf16.msra.mxu0 %v11893_v48 }
 0x841   :  { %11169 = vmatprep.subr.bf16.mxu0 %v11949_v59 }
 0x842   :  { %11188 = vmatpush3.bf16.msra.mxu1 %v11903_v55 }
 0x843   :  { %11189 = vmatprep.subr.bf16.mxu1 %v11905_v50 }
 0x844   :  { %11170 = vmatpush3.bf16.msra.mxu0 %v11894_v38 }
 0x845   :  { %11171 = vmatprep.subr.bf16.mxu0 %v11949_v59 }
 0x846   :  { %11190 = vmatpush3.bf16.msra.mxu1 %v11905_v50 }
 0x847   :  { %11195 = vmatprep.subr.bf16.mxu1 %v11907_v4 }
 0x848   :  { %11172 = vmatpush3.bf16.msra.mxu0 %v11895_v2 }
 0x849   :  { %11173 = vmatprep.subr.bf16.mxu0 %v11949_v59 }
 0x84c   :  { %11174 = vmatpush3.bf16.msra.mxu0 %v11896_v29 }
 0x84d   :  { %11175 = vmatprep.subr.bf16.mxu0 %v11949_v59 }
 0x850   :  { %11176 = vmatpush3.bf16.msra.mxu0 %v11897_v24 }
 0x851   :  { %11177 = vmatprep.subr.bf16.mxu0 %v11949_v59  ;;  %v11902_v59 = vld [vmem:[%s15225_s8 + $0x50] sm:$0xff]  }
 0x854   :  { %11178 = vmatpush3.bf16.msra.mxu0 %v11898_v42 }
 0x855   :  { %11207 = vmatprep.subr.bf16.mxu0 %v11900_v51 }
 0x857   :  { %11180 = vmatmul.mubr.bf16.vlgmr.msra.gmra.mxu0 %v8531_v62 }
 0x858   :  { %11208 = vmatpush3.bf16.msra.mxu0 %v11900_v51 }
 0x859   :  { %11209 = vmatprep.subr.bf16.mxu0 %v11902_v59 }
 0x85c   :  { %11210 = vmatpush3.bf16.msra.mxu0 %v11902_v59 }
 0x85d   :  { %11211 = vmatprep.subr.bf16.mxu0 %v11904_v18 }
 0x860   :  { %11212 = vmatpush3.bf16.msra.mxu0 %v11904_v18 }
 0x861   :  { %11213 = vmatprep.subr.bf16.mxu0 %v11906_v58 }
 0x864   :  { %11214 = vmatpush3.bf16.msra.mxu0 %v11906_v58 }
 0x8f7   :  { %v8662_v22 = vpop.f32.mrf.mxu0 }
 0x8f8   :  { %v8856_v52 = vadd.f32 %v8855_v32, %v8662_v22 }
 0x8f9   :  { %v11141_v36 = vpop.f32.mrf.mxu0  ;;  %v8756_v7 = vpop.f32.mrf.mxu1 }
 0x8fa   :  { %v8860_v25 = vmax.f32 %v8856_v52, 0.0 }
 0x8fb   :  { %v8665_v23 = vpop.f32.mrf.mxu0  ;;  %v11161_v28 = vpop.f32.mrf.mxu1 }
 0x8fc   :  { %v8858_v56 = vadd.f32 %v8855_v32, %v8665_v23 }
 0x8fd   :  { %v11142_v41 = vpop.f32.mrf.mxu0  ;;  %v8759_v33 = vpop.f32.mrf.mxu1 }
 0x8fe   :  { %v8862_v21 = vmax.f32 %v8858_v56, 0.0 }
 0x8ff   :  { %v11162_v37 = vpop.f32.mrf.mxu1 }
 0x917   :  { %v8845_v57 = vpop.f32.mrf.mxu0 }
 0x918   :  { %v8846_v45 = vadd.f32 %v8845_v57, %v8756_v7 }
 0x919   :  { %v11181_v19 = vpop.f32.mrf.mxu0 }
 0x91a   :  { %v8857_v8 = vadd.f32 %v8855_v32, %v8846_v45 }
 0x91b   :  { %v8848_v14 = vpop.f32.mrf.mxu0 }
 0x91c   :  { %v8861_v26 = vmax.f32 %v8857_v8, 0.0  ;;  %v8849_v11 = vadd.f32 %v8848_v14, %v8759_v33 }
 0x91d   :  { %v11182_v61 = vpop.f32.mrf.mxu0 }
 0x91e   :  { %v8864_v1 = vpack.c.bf16 %v8861_v26, %v8860_v25  ;;  %v8859_v40 = vadd.f32 %v8855_v32, %v8849_v11 }
 0x920   :  { %v8863_v46 = vmax.f32 %v8859_v40, 0.0  ;;  %11191 = vmatprep.mubr.msk.bf16.mxu1 %vm526_vm2, %v8864_v1  ;;  %11215 = vmatprep.mubr.msk.bf16.mxu0 %vm526_vm2, %v8864_v1  ;;  %v8971_v17 = vrot.slane %v8864_v1, 4 }
 0x922   :  { %v8865_v15 = vpack.c.bf16 %v8863_v46, %v8862_v21 }
 0x924   :  { %11192 = vmatmul.mubr.msk.bf16.vlgmr.msra.gmra.mxu1 %vm526_vm2, %v8865_v15  ;;  %11216 = vmatmul.mubr.msk.bf16.vlgmr.msra.gmra.mxu0 %vm526_vm2, %v8865_v15  ;;  %v8972_v31 = vrot.slane %v8865_v15, 4 }
 0x925   :  { %11196 = vmatpush3.bf16.msra.mxu1 %v11907_v4 }
 0x926   :  { %11197 = vmatprep.subr.bf16.mxu1 %v11908_v10  ;;  %v8973_v49 = vsel %vm466_vm3, %v8971_v17, %v8972_v31  ;;  %v8975_v5 = vsel %vm466_vm3, %v8972_v31, 0 }
 0x927   :  { %11203 = vmatprep.mubr.msk.bf16.mxu1 %vm526_vm2, %v8973_v49 }
 0x929   :  { %11198 = vmatpush3.bf16.msra.mxu1 %v11908_v10 }
 0x92a   :  { %11199 = vmatprep.subr.bf16.mxu1 %v11909_v35 }
 0x92d   :  { %11200 = vmatpush3.bf16.msra.mxu1 %v11909_v35 }
 0x92e   :  { %11201 = vmatprep.subr.bf16.mxu1 %v11910_v0 }
 0x931   :  { %11202 = vmatpush3.bf16.msra.mxu1 %v11910_v0 }
 0x934   :  { %11204 = vmatmul.mubr.msk.bf16.vlgmr.msra.gmra.mxu1 %vm526_vm2, %v8975_v5 }
 0x9e4   :  { %v11193_v47 = vpop.f32.mrf.mxu1  ;;  %v11217_v48 = vpop.f32.mrf.mxu0 }
 0x9e5   :  { %v9135_v53 = vadd.f32 %v11193_v47, %v9130_v63 }
 0x9e6   :  { %v8954_v16 = vpop.f32.mrf.mxu1  ;;  %v9112_v60 = vpop.f32.mrf.mxu0 }
 0x9e7   :  { %v10031_v30 = vmul.f32 -1.442695, %v9135_v53  ;;  %v9131_v27 = vadd.f32 %v9130_v63, %v8954_v16 }
 0x9e8   :  { %v11194_v54 = vpop.f32.mrf.mxu1  ;;  %v11218_v29 = vpop.f32.mrf.mxu0 }
 0x9e9   :  { %11913 = vpow2.f32 %v10031_v30  ;;  %v10027_v34 = vmul.f32 -1.442695, %v9131_v27  ;;  %v9137_v43 = vadd.f32 %v11194_v54, %v9130_v63 }
 0x9ea   :  { %v8957_v13 = vpop.f32.mrf.mxu1  ;;  %v9115_v4 = vpop.f32.mrf.mxu0 }
 0x9eb   :  { %11915 = vpow2.f32 %v10027_v34  ;;  %v10033_v62 = vmul.f32 -1.442695, %v9137_v43  ;;  %v9133_v20 = vadd.f32 %v9130_v63, %v8957_v13 }
 0x9ed   :  { %11917 = vpow2.f32 %v10033_v62  ;;  %v10029_v3 = vmul.f32 -1.442695, %v9133_v20 }
 0x9ef   :  { %11919 = vpow2.f32 %v10029_v3 }
 0x9f4   :  { %v11205_v38 = vpop.f32.mrf.mxu1 }
 0x9f5   :  { %v9121_v44 = vadd.f32 %v11217_v48, %v11205_v38 }
 0x9f6   :  { %v11914_v2 = vpop.eup %11913  ;;  %v9039_v24 = vpop.f32.mrf.mxu1 }
 0x9f7   :  { %v9167_v42 = vadd.f32 1.0, %v11914_v2  ;;  %v9136_v9 = vadd.f32 %v9130_v63, %v9121_v44  ;;  %v9113_v51 = vadd.f32 %v9112_v60, %v9039_v24 }
 0x9f8   :  { %v11916_v12 = vpop.eup %11915  ;;  %v11206_v59 = vpop.f32.mrf.mxu1 }
 0x9f9   :  { %11921 = vrcp.f32 %v9167_v42  ;;  %v9163_v55 = vadd.f32 1.0, %v11916_v12  ;;  %v10032_v18 = vmul.f32 -1.442695, %v9136_v9  ;;  %v9132_v50 = vadd.f32 %v9130_v63, %v9113_v51 }
 0x9fa   :  { %v11918_v58 = vpop.eup %11917  ;;  %v9124_v22 = vadd.f32 %v11218_v29, %v11206_v59  ;;  %v9042_v36 = vpop.f32.mrf.mxu1 }
 0x9fb   :  { %11923 = vrcp.f32 %v9163_v55  ;;  %v9169_v7 = vadd.f32 1.0, %v11918_v58  ;;  %v10028_v23 = vmul.f32 -1.442695, %v9132_v50  ;;  %v9116_v28 = vadd.f32 %v9115_v4, %v9042_v36 }
 0x9fc   :  { %v11920_v41 = vpop.eup %11919  ;;  %11925 = vpow2.f32 %v10032_v18  ;;  %v9138_v33 = vadd.f32 %v9130_v63, %v9124_v22 }
 0x9fd   :  { %11927 = vrcp.f32 %v9169_v7  ;;  %v9165_v37 = vadd.f32 1.0, %v11920_v41  ;;  %v9134_v39 = vadd.f32 %v9130_v63, %v9116_v28 }
 0x9fe   :  { %11929 = vpow2.f32 %v10028_v23  ;;  %v10034_v32 = vmul.f32 -1.442695, %v9138_v33 }
 0x9ff   :  { %11931 = vrcp.f32 %v9165_v37  ;;  %v10030_v57 = vmul.f32 -1.442695, %v9134_v39 }
 0xa00   :  { %11933 = vpow2.f32 %v10034_v32 }
 0xa01   :  { %11935 = vpow2.f32 %v10030_v57 }
 0xa06   :  { %v11922_v52 = vpop.eup %11921 }
 0xa07   :  { %9206 = vst.msk [vmem:[%s15221_s11 + $0x8] sm:$0xff] %vm8040_vm5, %v11922_v52 }
 0xa08   :  { %v11924_v45 = vpop.eup %11923 }
 0xa09   :  { %v11926_v19 = vpop.eup %11925  ;;  %9187 = vst.msk [vmem:[%s15221_s11] sm:$0xff] %vm8040_vm5, %v11924_v45 }
 0xa0a   :  { %v11928_v8 = vpop.eup %11927  ;;  %v9168_v14 = vadd.f32 1.0, %v11926_v19 }
 0xa0b   :  { %v11930_v25 = vpop.eup %11929  ;;  %9213 = vrot.lane.b32.xlu0 %v11928_v8, %s11952_s29 }
 0xa0c   :  { %v11932_v56 = vpop.eup %11931  ;;  %11937 = vrcp.f32 %v9168_v14  ;;  %v9164_v26 = vadd.f32 1.0, %v11930_v25 }
 0xa0d   :  { %v11934_v11 = vpop.eup %11933  ;;  %9195 = vrot.lane.b32.xlu1 %v11932_v56, %s11952_s29 }
 0xa0e   :  { %v11936_v61 = vpop.eup %11935  ;;  %11939 = vrcp.f32 %v9164_v26  ;;  %v9170_v1 = vadd.f32 1.0, %v11934_v11 }
 0xa0f   :  { %v9166_v40 = vadd.f32 1.0, %v11936_v61 }
 0xa11   :  { %11941 = vrcp.f32 %v9166_v40 }
 0xa12   :  { %11943 = vrcp.f32 %v9170_v1 }
 0xa19   :  { %v11938_v21 = vpop.eup %11937 }
 0xa1a   :  { %9208 = vrot.lane.b32.xlu1 %v11938_v21, %s11953_s30 }
 0xa1b   :  { %v11940_v46 = vpop.eup %11939 }
 0xa1c   :  { %9189 = vrot.lane.b32.xlu0 %v11940_v46, %s11953_s30 }
 0xa1e   :  { %v11942_v15 = vpop.eup %11941 }
 0xa1f   :  { %v11944_v10 = vpop.eup %11943  ;;  %9201 = vrot.lane.b32.xlu1 %v11942_v15, %s11954_s10 }
 0xa20   :  { %9218 = vrot.lane.b32.xlu0 %v11944_v10, %s11954_s10 }
 0xa7d   :  { %v9214_v31 = vpop.permute.xlu0 %9213 }
 0xa7f   :  { %v9196_v17 = vpop.permute.xlu1 %9195 }
 0xa8c   :  { %v9209_v49 = vpop.permute.xlu1 %9208 }
 0xa8d   :  { %9211 = vst.msk [vmem:[%s15221_s11 + $0x8] sm:$0xff] %vm9192_vm9, %v9209_v49 }
 0xa8e   :  { %v9190_v35 = vpop.permute.xlu0 %9189  ;;  %9216 = vst.msk [vmem:[%s15221_s11 + $0x8] sm:$0xff] %vm9198_vm10, %v9214_v31 }
 0xa8f   :  { %9193 = vst.msk [vmem:[%s15221_s11] sm:$0xff] %vm9192_vm9, %v9190_v35 }
 0xa90   :  { %9199 = vst.msk [vmem:[%s15221_s11] sm:$0xff] %vm9198_vm10, %v9196_v17 }
 0xa91   :  { %v9202_v0 = vpop.permute.xlu1 %9201 }
 0xa92   :  { %9205 = vst.msk [vmem:[%s15221_s11] sm:$0xff] %vm9204_vm11, %v9202_v0  ;;  %v9219_v5 = vpop.permute.xlu0 %9218 }
 0xa93   :  { %9221 = vst.msk [vmem:[%s15221_s11 + $0x8] sm:$0xff] %vm9204_vm11, %v9219_v5 }

</bundles_post_ra>
